<compile_context>
chip_gen: v7x
topology: tpu7x:2x2x1
jax: 0.10.0
libtpu: 0.0.40
codegen_flags: <defaults>
</compile_context>

<pallas_src>
import functools

import numpy as np
import jax
import jax.numpy as jnp
from jax.experimental import pallas as pl
from jax.experimental.pallas import tpu as pltpu

EPS = 1e-5                      # nn.BatchNorm2d default eps
LANE = 128                      # channel pad target (TPU lane width)
ROW_TILE = 1024                 # target rows per (M, C) tile for pointwise passes
VMEM_LIMIT = 32 * 1024 * 1024   # above v5e's 16 MiB scoped default, <= v7x physical


def _round_up(x, m):
    return (x + m - 1) // m * m


def _pad_channels(x):
    c = x.shape[-1]
    cp = _round_up(c, LANE)
    if cp == c:
        return x
    return jnp.pad(x, [(0, 0)] * (x.ndim - 1) + [(0, cp - c)])


def _pick_row_tile(m):
    return m if m <= ROW_TILE else ROW_TILE


def _pick_th(ho, wo):
    """Largest divisor of Ho such that the (th*Wo, C) tile stays <= ROW_TILE rows."""
    best = 1
    for th in range(1, ho + 1):
        if ho % th == 0 and th * wo <= ROW_TILE:
            best = th
    return best


# ----------------------------------------------------------------------------
# Pallas kernels
# ----------------------------------------------------------------------------
def _conv_stats_kernel(x_ref, w_ref, y_ref, st_ref, *, k, stride, th, wo, m_total):
    """Pass 1: tap-accumulated conv + per-channel sum / sum-of-squares.

    x_ref : (s*s, Hph, Wph, Cpi) bf16  phase-split padded image (resident per n)
    w_ref : (k*k, Cpi, Cpo)      bf16  (resident)
    y_ref : (1, 1, th*Wo, Cpo)   f32   raw conv-output tile
    st_ref: (2, Cpo)             f32   resident accumulator -> (mean, inv_std)
    """
    n_i, h_i = pl.program_id(0), pl.program_id(1)
    is_first = (n_i == 0) & (h_i == 0)
    is_last = ((n_i == pl.num_programs(0) - 1)
               & (h_i == pl.num_programs(1) - 1))

    @pl.when(is_first)
    def _():
        st_ref[...] = jnp.zeros_like(st_ref)

    cpi = x_ref.shape[-1]
    row0 = pl.multiple_of(h_i * th, th)

    acc = jnp.zeros((th * wo, y_ref.shape[-1]), jnp.float32)
    for ky in range(k):                       # static unroll: k*k bf16 MXU matmuls
        for kx in range(k):
            phase = (ky % stride) * stride + (kx % stride)
            xt = x_ref[phase,
                       pl.ds(row0 + ky // stride, th),
                       pl.ds(kx // stride, wo), :]          # (th, wo, cpi) bf16
            acc = acc + jnp.dot(xt.reshape(th * wo, cpi),
                                w_ref[ky * k + kx],
                                preferred_element_type=jnp.float32)
    y_ref[0, 0] = acc

    # single-pass batch statistics (f32 accumulation; var = E[y^2] - mean^2)
    st_ref[0:1, :] += jnp.sum(acc, axis=0, keepdims=True)
    st_ref[1:2, :] += jnp.sum(acc * acc, axis=0, keepdims=True)

    @pl.when(is_last)
    def _():
        inv_m = 1.0 / m_total
        ssum = st_ref[0:1, :]
        ssq = st_ref[1:2, :]
        mean = ssum * inv_m
        var = jnp.maximum(ssq * inv_m - mean * mean, 0.0)   # biased (train-mode BN)
        st_ref[0:1, :] = mean
        st_ref[1:2, :] = jax.lax.rsqrt(var + EPS)


def _bn_apply_kernel(y_ref, st_ref, g_ref, b_ref, o_ref, *, relu):
    """Pass 2: out = relu?((y - mean) * inv_std * gamma + beta), all math in f32."""
    mean = st_ref[0:1, :]
    inv = st_ref[1:2, :]
    out = (y_ref[...] - mean) * (inv * g_ref[...]) + b_ref[...]
    if relu:
        out = jnp.maximum(out, 0.0)
    o_ref[...] = out.astype(o_ref.dtype)


def _sum_relu_kernel(*refs):
    """out = relu(sum_j in_j); inputs/output are (TM, C) tiles."""
    o_ref = refs[-1]
    acc = refs[0][...].astype(jnp.float32)
    for r in refs[1:-1]:
        acc = acc + r[...].astype(jnp.float32)
    o_ref[...] = jnp.maximum(acc, 0.0)


# ----------------------------------------------------------------------------
# Wrappers
# ----------------------------------------------------------------------------
def conv_bn_act(x, w_pt, gamma, beta, *, stride, apply_relu):
    """Conv2d(k, stride, pad=k//2) + train-mode BatchNorm2d + optional ReLU.

    x    : (N, H, W, Cpi) bf16 channel-padded NHWC.
    w_pt : (Cout, Cin, k, k) f32 PyTorch-layout weight (bias is omitted: it is
           cancelled exactly by batch-statistics BN).
    Returns (N, Ho, Wo, Cpo) bf16 with Cpo = round_up(Cout, 128).
    """
    N, H, W, cpi = x.shape
    Cout, Cin, kh, kw = w_pt.shape
    assert kh == kw
    k, s, p = kh, stride, kh // 2
    cpo = _round_up(Cout, LANE)

    Ho = (H + 2 * p - k) // s + 1
    Wo = (W + 2 * p - k) // s + 1
    moff = (k - 1) // s
    Hph, Wph = Ho + moff, Wo + moff

    # glue: spatial pad + stride-phase split so every in-kernel tap read is a
    # contiguous slice (no strided access inside the kernel).
    pad_b = s * Hph - (H + p)
    pad_r = s * Wph - (W + p)
    xp = jnp.pad(x, ((0, 0), (p, pad_b), (p, pad_r), (0, 0)))
    xph = (xp.reshape(N, Hph, s, Wph, s, cpi)
             .transpose(0, 2, 4, 1, 3, 5)
             .reshape(N * s * s, Hph, Wph, cpi))

    # weights -> (k*k, Cpi, Cpo) bf16, zero-padded to lane width
    wt = jnp.transpose(w_pt, (2, 3, 1, 0)).reshape(k * k, Cin, Cout).astype(jnp.bfloat16)
    wfull = jnp.zeros((k * k, cpi, cpo), jnp.bfloat16).at[:, :Cin, :Cout].set(wt)

    th = _pick_th(Ho, Wo)
    n_h = Ho // th
    M = N * Ho * Wo

    conv = functools.partial(_conv_stats_kernel, k=k, stride=s, th=th, wo=Wo,
                             m_total=M)
    y, stats = pl.pallas_call(
        conv,
        grid=(N, n_h),
        in_specs=[
            pl.BlockSpec((s * s, Hph, Wph, cpi), lambda n, h: (n, 0, 0, 0)),
            pl.BlockSpec((k * k, cpi, cpo), lambda n, h: (0, 0, 0)),
        ],
        out_specs=[
            pl.BlockSpec((1, 1, th * Wo, cpo), lambda n, h: (n, h, 0, 0)),
            pl.BlockSpec((2, cpo), lambda n, h: (0, 0)),
        ],
        out_shape=[
            jax.ShapeDtypeStruct((N, n_h, th * Wo, cpo), jnp.float32),
            jax.ShapeDtypeStruct((2, cpo), jnp.float32),
        ],
        compiler_params=pltpu.CompilerParams(
            # the stats block accumulates serially across the whole grid
            dimension_semantics=("arbitrary", "arbitrary"),
            vmem_limit_bytes=VMEM_LIMIT),
    )(xph, wfull)

    # pass 2: normalize + affine (+ReLU), lane-dense and M-tiled ("parallel").
    gp = jnp.zeros((1, cpo), jnp.float32).at[0, :Cout].set(gamma)
    bp = jnp.zeros((1, cpo), jnp.float32).at[0, :Cout].set(beta)
    yflat = y.reshape(M, cpo)
    tm = _pick_row_tile(M)
    out = pl.pallas_call(
        functools.partial(_bn_apply_kernel, relu=apply_relu),
        grid=(pl.cdiv(M, tm),),
        in_specs=[
            pl.BlockSpec((tm, cpo), lambda i: (i, 0)),
            pl.BlockSpec((2, cpo), lambda i: (0, 0)),
            pl.BlockSpec((1, cpo), lambda i: (0, 0)),
            pl.BlockSpec((1, cpo), lambda i: (0, 0)),
        ],
        out_specs=pl.BlockSpec((tm, cpo), lambda i: (i, 0)),
        out_shape=jax.ShapeDtypeStruct((M, cpo), jnp.bfloat16),
        compiler_params=pltpu.CompilerParams(
            dimension_semantics=("parallel",),
            vmem_limit_bytes=VMEM_LIMIT),
    )(yflat, stats, gp, bp)
    return out.reshape(N, Ho, Wo, cpo)


def fuse_sum_relu(tensors):
    """relu(sum_j tensors[j]) over same-shape channel-padded NHWC tensors."""
    N, H, W, C = tensors[0].shape
    M = N * H * W
    flats = [t.reshape(M, C) for t in tensors]
    tm = _pick_row_tile(M)
    out = pl.pallas_call(
        _sum_relu_kernel,
        grid=(pl.cdiv(M, tm),),
        in_specs=[pl.BlockSpec((tm, C), lambda i: (i, 0)) for _ in flats],
        out_specs=pl.BlockSpec((tm, C), lambda i: (i, 0)),
        out_shape=jax.ShapeDtypeStruct((M, C), jnp.float32),
        compiler_params=pltpu.CompilerParams(
            dimension_semantics=("parallel",),
            vmem_limit_bytes=VMEM_LIMIT),
    )(*flats)
    return out.reshape(N, H, W, C)


def bilinear_upsample(x_nhwc, factor):
    """nn.Upsample(scale_factor=factor, mode='bilinear', align_corners=False).

    # TODO(synk): fuse this gather + weighted-add into the Pallas fuse kernel
    # (fixed 0.75/0.25 weights per parity for 2x) instead of materializing the
    # upsampled tensor in HBM.
    """
    def idx(in_size, out_size):
        scale = in_size / out_size
        src = (np.arange(out_size) + 0.5) * scale - 0.5
        src = np.maximum(src, 0.0)                      # PyTorch clamps src >= 0
        i0 = np.minimum(np.floor(src), in_size - 1).astype(np.int32)
        i1 = np.minimum(i0 + 1, in_size - 1)
        w1 = (src - i0).astype(np.float32)
        return i0, i1, (1.0 - w1), w1

    N, H, W, C = x_nhwc.shape
    hi0, hi1, hw0, hw1 = idx(H, H * factor)
    x = (x_nhwc[:, hi0] * hw0[None, :, None, None]
         + x_nhwc[:, hi1] * hw1[None, :, None, None])
    wi0, wi1, ww0, ww1 = idx(W, W * factor)
    x = (x[:, :, wi0] * ww0[None, None, :, None]
         + x[:, :, wi1] * ww1[None, None, :, None])
    return x


# ----------------------------------------------------------------------------
# HighResolutionModule: parameters + forward
# ----------------------------------------------------------------------------
def init_params(key, num_branches, num_blocks, num_channels):
    def nxt():
        nonlocal key
        key, sub = jax.random.split(key)
        return sub

    branches = []
    for i in range(num_branches):
        c = num_channels[i]
        blocks = []
        for _ in range(num_blocks[i]):
            blocks.append(dict(
                w=0.1 * jax.random.normal(nxt(), (c, c, 3, 3), jnp.float32),
                # conv bias exists in the PyTorch module but is a mathematical
                # no-op under batch-statistics BN, so it is never applied.
                b=0.1 * jax.random.normal(nxt(), (c,), jnp.float32),
                gamma=1.0 + 0.1 * jax.random.normal(nxt(), (c,), jnp.float32),
                beta=0.1 * jax.random.normal(nxt(), (c,), jnp.float32),
            ))
        branches.append(blocks)

    fuse = []
    if num_branches > 1:
        for i in range(num_branches):
            row = []
            for j in range(num_branches):
                if j > i:
                    ci, cj = num_channels[i], num_channels[j]
                    row.append(dict(
                        w=0.1 * jax.random.normal(nxt(), (ci, cj, 1, 1), jnp.float32),
                        gamma=1.0 + 0.1 * jax.random.normal(nxt(), (ci,), jnp.float32),
                        beta=0.1 * jax.random.normal(nxt(), (ci,), jnp.float32),
                    ))
                elif j == i:
                    row.append(None)
                else:
                    steps = []
                    for k in range(i - j):
                        if k == i - j - 1:
                            cin, cout = num_channels[j], num_channels[i]
                        else:
                            cin = cout = num_channels[j]
                        steps.append(dict(
                            w=0.1 * jax.random.normal(nxt(), (cout, cin, 3, 3), jnp.float32),
                            gamma=1.0 + 0.1 * jax.random.normal(nxt(), (cout,), jnp.float32),
                            beta=0.1 * jax.random.normal(nxt(), (cout,), jnp.float32),
                        ))
                    row.append(steps)
            fuse.append(row)
    return dict(branches=branches, fuse=fuse)


def high_resolution_module_forward(params, xs, num_branches, multi_scale_output=True):
    """xs: list of NHWC f32 tensors (true channel counts).

    Returns a list of NHWC float32 tensors whose channel dim is padded to 128;
    slice [..., :C_i] to recover the real channels.
    """
    # channel-pad + cast to bf16 once at the module boundary (lane-dense, MXU bf16)
    xs = [_pad_channels(x).astype(jnp.bfloat16) for x in xs]

    # --- branches: num_blocks[i] x (Conv3x3 s1 + BN + ReLU) ---
    branch_outputs = []
    for i in range(num_branches):
        y = xs[i]
        for blk in params['branches'][i]:
            y = conv_bn_act(y, blk['w'], blk['gamma'], blk['beta'],
                            stride=1, apply_relu=True)
        branch_outputs.append(y)

    if num_branches == 1:
        return [b.astype(jnp.float32) for b in branch_outputs]

    # --- fuse layers ---
    outs = []
    n_out = num_branches if multi_scale_output else 1
    for i in range(n_out):
        terms = []
        for j in range(num_branches):
            if j == i:
                terms.append(branch_outputs[j])            # Identity
            elif j > i:
                fl = params['fuse'][i][j]                  # 1x1 conv (no bias) + BN + Upsample
                t = conv_bn_act(branch_outputs[j], fl['w'], fl['gamma'], fl['beta'],
                                stride=1, apply_relu=False)
                t = bilinear_upsample(t, 2 ** (j - i))
                terms.append(t)
            else:
                steps = params['fuse'][i][j]               # (i-j) strided 3x3 convs
                t = branch_outputs[j]
                for kk, st in enumerate(steps):
                    t = conv_bn_act(t, st['w'], st['gamma'], st['beta'],
                                    stride=2, apply_relu=(kk < len(steps) - 1))
                terms.append(t)
        outs.append(fuse_sum_relu(terms))
    return outs


# ----------------------------------------------------------------------------
if __name__ == "__main__":
    num_branches = 2
    num_blocks = [1, 1]
    num_channels = [4, 8]
    N = 2
    spatial = [16, 8]   # branch j runs at resolution H / 2**j

    key = jax.random.PRNGKey(0)
    k0, k1, kp = jax.random.split(key, 3)

    # PyTorch-style NCHW inputs, one per branch.
    x_nchw = [
        jax.random.normal(k0, (N, num_channels[0], spatial[0], spatial[0]), jnp.float32),
        jax.random.normal(k1, (N, num_channels[1], spatial[1], spatial[1]), jnp.float32),
    ]
    xs = [jnp.transpose(x, (0, 2, 3, 1)) for x in x_nchw]   # -> NHWC for kernels

    params = init_params(kp, num_branches, num_blocks, num_channels)

    outs = high_resolution_module_forward(params, xs, num_branches,
                                          multi_scale_output=True)
    # strip channel padding and go back to NCHW
    outs_nchw = [jnp.transpose(o[..., :num_channels[i]], (0, 3, 1, 2))
                 for i, o in enumerate(outs)]

    for o in outs_nchw:
        jax.block_until_ready(o)

    assert outs_nchw[0].shape == (N, num_channels[0], spatial[0], spatial[0])
    assert outs_nchw[1].shape == (N, num_channels[1], spatial[1], spatial[1])
    assert all(bool(jnp.all(jnp.isfinite(o))) for o in outs_nchw)
    print("KERNEL_OK")
</pallas_src>

<mosaic_0001>
module attributes {stable_mosaic.version = 11 : i64} {
  func.func @_conv_stats_kernel(%arg0: i32, %arg1: i32, %arg2: memref<1x18x18x128xbf16, #tpu.memory_space<vmem>>, %arg3: memref<9x128x128xbf16, #tpu.memory_space<vmem>>, %arg4: memref<1x1x256x128xf32, #tpu.memory_space<vmem>>, %arg5: memref<2x128xf32, #tpu.memory_space<vmem>>) attributes {dimension_semantics = [#tpu.dimension_semantics<arbitrary>, #tpu.dimension_semantics<arbitrary>], iteration_bounds = array<i64: 2, 1>, scalar_prefetch = 0 : i64, scratch_operands = 0 : i64, tpu.core_type = #tpu.core_type<tc>, window_params = [{transform_indices = @transform_0, window_bounds = array<i64: 1, 18, 18, 128>}, {pipeline_mode = #tpu.pipeline_mode<synchronous>, transform_indices = @transform_1, window_bounds = array<i64: 9, 128, 128>}, {transform_indices = @transform_2, window_bounds = array<i64: 1, 1, 256, 128>}, {pipeline_mode = #tpu.pipeline_mode<synchronous>, transform_indices = @transform_3, window_bounds = array<i64: 2, 128>}]} {
    %c0_i32 = arith.constant 0 : i32
    %0 = arith.cmpi eq, %arg0, %c0_i32 : i32
    %c0_i32_0 = arith.constant 0 : i32
    %1 = arith.cmpi eq, %arg1, %c0_i32_0 : i32
    %2 = arith.andi %0, %1 : i1
    %c1_i32 = arith.constant 1 : i32
    %3 = arith.cmpi eq, %arg0, %c1_i32 : i32
    %c0_i32_1 = arith.constant 0 : i32
    %4 = arith.cmpi eq, %arg1, %c0_i32_1 : i32
    %5 = arith.andi %3, %4 : i1
    %6 = arith.extui %2 : i1 to i32
    %c0_i32_2 = arith.constant 0 : i32
    %7 = arith.cmpi ne, %6, %c0_i32_2 : i32
    scf.if %7 {
      %cst_80 = arith.constant 0.000000e+00 : f32
      %108 = vector.broadcast %cst_80 : f32 to vector<2x128xf32>
      %c0_81 = arith.constant 0 : index
      %c0_82 = arith.constant 0 : index
      %109 = vector.load %arg5[%c0_81, %c0_82] : memref<2x128xf32, #tpu.memory_space<vmem>>, vector<2x128xf32>
      tpu.vector_store %arg5[%c0_81, %c0_82], %108 {strides = array<i32>} : memref<2x128xf32, #tpu.memory_space<vmem>>, vector<2x128xf32>,
    } else {
    }
    %c16_i32 = arith.constant 16 : i32
    %8 = arith.muli %arg1, %c16_i32 : i32
    %9 = tpu.assume_multiple %8, 16 : i32
    %cst = arith.constant 0.000000e+00 : f32
    %10 = vector.broadcast %cst : f32 to vector<256x128xf32>
    %c0_i32_3 = arith.constant 0 : i32
    %11 = arith.addi %9, %c0_i32_3 : i32
    %c0 = arith.constant 0 : index
    %12 = arith.index_cast %11 : i32 to index
    %c0_4 = arith.constant 0 : index
    %c0_5 = arith.constant 0 : index
    %13 = vector.load %arg2[%c0, %12, %c0_4, %c0_5] : memref<1x18x18x128xbf16, #tpu.memory_space<vmem>>, vector<1x16x16x128xbf16>
    %14 = vector.shape_cast %13 : vector<1x16x16x128xbf16> to vector<16x16x128xbf16>
    %15 = vector.shape_cast %14 : vector<16x16x128xbf16> to vector<256x128xbf16>
    %c0_6 = arith.constant 0 : index
    %c0_7 = arith.constant 0 : index
    %c0_8 = arith.constant 0 : index
    %16 = vector.load %arg3[%c0_6, %c0_7, %c0_8] : memref<9x128x128xbf16, #tpu.memory_space<vmem>>, vector<1x128x128xbf16>
    %17 = vector.shape_cast %16 : vector<1x128x128xbf16> to vector<128x128xbf16>
    %cst_9 = arith.constant dense<0.000000e+00> : vector<256x128xf32>
    %18 = tpu.matmul %15, %17, %cst_9 {dimension_numbers = #tpu.dot_dimension_numbers<[1], [0], [0], [1], [0, 0, 1, 1], [], []>} : vector<256x128xbf16>, vector<128x128xbf16>, vector<256x128xf32> -> vector<256x128xf32>
    %19 = arith.addf %10, %18 : vector<256x128xf32>
    %c0_i32_10 = arith.constant 0 : i32
    %20 = arith.addi %9, %c0_i32_10 : i32
    %c0_11 = arith.constant 0 : index
    %21 = arith.index_cast %20 : i32 to index
    %c1 = arith.constant 1 : index
    %c0_12 = arith.constant 0 : index
    %22 = vector.load %arg2[%c0_11, %21, %c1, %c0_12] : memref<1x18x18x128xbf16, #tpu.memory_space<vmem>>, vector<1x16x16x128xbf16>
    %23 = vector.shape_cast %22 : vector<1x16x16x128xbf16> to vector<16x16x128xbf16>
    %24 = vector.shape_cast %23 : vector<16x16x128xbf16> to vector<256x128xbf16>
    %c1_13 = arith.constant 1 : index
    %c0_14 = arith.constant 0 : index
    %c0_15 = arith.constant 0 : index
    %25 = vector.load %arg3[%c1_13, %c0_14, %c0_15] : memref<9x128x128xbf16, #tpu.memory_space<vmem>>, vector<1x128x128xbf16>
    %26 = vector.shape_cast %25 : vector<1x128x128xbf16> to vector<128x128xbf16>
    %cst_16 = arith.constant dense<0.000000e+00> : vector<256x128xf32>
    %27 = tpu.matmul %24, %26, %cst_16 {dimension_numbers = #tpu.dot_dimension_numbers<[1], [0], [0], [1], [0, 0, 1, 1], [], []>} : vector<256x128xbf16>, vector<128x128xbf16>, vector<256x128xf32> -> vector<256x128xf32>
    %28 = arith.addf %19, %27 : vector<256x128xf32>
    %c0_i32_17 = arith.constant 0 : i32
    %29 = arith.addi %9, %c0_i32_17 : i32
    %c0_18 = arith.constant 0 : index
    %30 = arith.index_cast %29 : i32 to index
    %c2 = arith.constant 2 : index
    %c0_19 = arith.constant 0 : index
    %31 = vector.load %arg2[%c0_18, %30, %c2, %c0_19] : memref<1x18x18x128xbf16, #tpu.memory_space<vmem>>, vector<1x16x16x128xbf16>
    %32 = vector.shape_cast %31 : vector<1x16x16x128xbf16> to vector<16x16x128xbf16>
    %33 = vector.shape_cast %32 : vector<16x16x128xbf16> to vector<256x128xbf16>
    %c2_20 = arith.constant 2 : index
    %c0_21 = arith.constant 0 : index
    %c0_22 = arith.constant 0 : index
    %34 = vector.load %arg3[%c2_20, %c0_21, %c0_22] : memref<9x128x128xbf16, #tpu.memory_space<vmem>>, vector<1x128x128xbf16>
    %35 = vector.shape_cast %34 : vector<1x128x128xbf16> to vector<128x128xbf16>
    %cst_23 = arith.constant dense<0.000000e+00> : vector<256x128xf32>
    %36 = tpu.matmul %33, %35, %cst_23 {dimension_numbers = #tpu.dot_dimension_numbers<[1], [0], [0], [1], [0, 0, 1, 1], [], []>} : vector<256x128xbf16>, vector<128x128xbf16>, vector<256x128xf32> -> vector<256x128xf32>
    %37 = arith.addf %28, %36 : vector<256x128xf32>
    %c1_i32_24 = arith.constant 1 : i32
    %38 = arith.addi %9, %c1_i32_24 : i32
    %c0_25 = arith.constant 0 : index
    %39 = arith.index_cast %38 : i32 to index
    %c0_26 = arith.constant 0 : index
    %c0_27 = arith.constant 0 : index
    %40 = vector.load %arg2[%c0_25, %39, %c0_26, %c0_27] : memref<1x18x18x128xbf16, #tpu.memory_space<vmem>>, vector<1x16x16x128xbf16>
    %41 = vector.shape_cast %40 : vector<1x16x16x128xbf16> to vector<16x16x128xbf16>
    %42 = vector.shape_cast %41 : vector<16x16x128xbf16> to vector<256x128xbf16>
    %c3 = arith.constant 3 : index
    %c0_28 = arith.constant 0 : index
    %c0_29 = arith.constant 0 : index
    %43 = vector.load %arg3[%c3, %c0_28, %c0_29] : memref<9x128x128xbf16, #tpu.memory_space<vmem>>, vector<1x128x128xbf16>
    %44 = vector.shape_cast %43 : vector<1x128x128xbf16> to vector<128x128xbf16>
    %cst_30 = arith.constant dense<0.000000e+00> : vector<256x128xf32>
    %45 = tpu.matmul %42, %44, %cst_30 {dimension_numbers = #tpu.dot_dimension_numbers<[1], [0], [0], [1], [0, 0, 1, 1], [], []>} : vector<256x128xbf16>, vector<128x128xbf16>, vector<256x128xf32> -> vector<256x128xf32>
    %46 = arith.addf %37, %45 : vector<256x128xf32>
    %c1_i32_31 = arith.constant 1 : i32
    %47 = arith.addi %9, %c1_i32_31 : i32
    %c0_32 = arith.constant 0 : index
    %48 = arith.index_cast %47 : i32 to index
    %c1_33 = arith.constant 1 : index
    %c0_34 = arith.constant 0 : index
    %49 = vector.load %arg2[%c0_32, %48, %c1_33, %c0_34] : memref<1x18x18x128xbf16, #tpu.memory_space<vmem>>, vector<1x16x16x128xbf16>
    %50 = vector.shape_cast %49 : vector<1x16x16x128xbf16> to vector<16x16x128xbf16>
    %51 = vector.shape_cast %50 : vector<16x16x128xbf16> to vector<256x128xbf16>
    %c4 = arith.constant 4 : index
    %c0_35 = arith.constant 0 : index
    %c0_36 = arith.constant 0 : index
    %52 = vector.load %arg3[%c4, %c0_35, %c0_36] : memref<9x128x128xbf16, #tpu.memory_space<vmem>>, vector<1x128x128xbf16>
    %53 = vector.shape_cast %52 : vector<1x128x128xbf16> to vector<128x128xbf16>
    %cst_37 = arith.constant dense<0.000000e+00> : vector<256x128xf32>
    %54 = tpu.matmul %51, %53, %cst_37 {dimension_numbers = #tpu.dot_dimension_numbers<[1], [0], [0], [1], [0, 0, 1, 1], [], []>} : vector<256x128xbf16>, vector<128x128xbf16>, vector<256x128xf32> -> vector<256x128xf32>
    %55 = arith.addf %46, %54 : vector<256x128xf32>
    %c1_i32_38 = arith.constant 1 : i32
    %56 = arith.addi %9, %c1_i32_38 : i32
    %c0_39 = arith.constant 0 : index
    %57 = arith.index_cast %56 : i32 to index
    %c2_40 = arith.constant 2 : index
    %c0_41 = arith.constant 0 : index
    %58 = vector.load %arg2[%c0_39, %57, %c2_40, %c0_41] : memref<1x18x18x128xbf16, #tpu.memory_space<vmem>>, vector<1x16x16x128xbf16>
    %59 = vector.shape_cast %58 : vector<1x16x16x128xbf16> to vector<16x16x128xbf16>
    %60 = vector.shape_cast %59 : vector<16x16x128xbf16> to vector<256x128xbf16>
    %c5 = arith.constant 5 : index
    %c0_42 = arith.constant 0 : index
    %c0_43 = arith.constant 0 : index
    %61 = vector.load %arg3[%c5, %c0_42, %c0_43] : memref<9x128x128xbf16, #tpu.memory_space<vmem>>, vector<1x128x128xbf16>
    %62 = vector.shape_cast %61 : vector<1x128x128xbf16> to vector<128x128xbf16>
    %cst_44 = arith.constant dense<0.000000e+00> : vector<256x128xf32>
    %63 = tpu.matmul %60, %62, %cst_44 {dimension_numbers = #tpu.dot_dimension_numbers<[1], [0], [0], [1], [0, 0, 1, 1], [], []>} : vector<256x128xbf16>, vector<128x128xbf16>, vector<256x128xf32> -> vector<256x128xf32>
    %64 = arith.addf %55, %63 : vector<256x128xf32>
    %c2_i32 = arith.constant 2 : i32
    %65 = arith.addi %9, %c2_i32 : i32
    %c0_45 = arith.constant 0 : index
    %66 = arith.index_cast %65 : i32 to index
    %c0_46 = arith.constant 0 : index
    %c0_47 = arith.constant 0 : index
    %67 = vector.load %arg2[%c0_45, %66, %c0_46, %c0_47] : memref<1x18x18x128xbf16, #tpu.memory_space<vmem>>, vector<1x16x16x128xbf16>
    %68 = vector.shape_cast %67 : vector<1x16x16x128xbf16> to vector<16x16x128xbf16>
    %69 = vector.shape_cast %68 : vector<16x16x128xbf16> to vector<256x128xbf16>
    %c6 = arith.constant 6 : index
    %c0_48 = arith.constant 0 : index
    %c0_49 = arith.constant 0 : index
    %70 = vector.load %arg3[%c6, %c0_48, %c0_49] : memref<9x128x128xbf16, #tpu.memory_space<vmem>>, vector<1x128x128xbf16>
    %71 = vector.shape_cast %70 : vector<1x128x128xbf16> to vector<128x128xbf16>
    %cst_50 = arith.constant dense<0.000000e+00> : vector<256x128xf32>
    %72 = tpu.matmul %69, %71, %cst_50 {dimension_numbers = #tpu.dot_dimension_numbers<[1], [0], [0], [1], [0, 0, 1, 1], [], []>} : vector<256x128xbf16>, vector<128x128xbf16>, vector<256x128xf32> -> vector<256x128xf32>
    %73 = arith.addf %64, %72 : vector<256x128xf32>
    %c2_i32_51 = arith.constant 2 : i32
    %74 = arith.addi %9, %c2_i32_51 : i32
    %c0_52 = arith.constant 0 : index
    %75 = arith.index_cast %74 : i32 to index
    %c1_53 = arith.constant 1 : index
    %c0_54 = arith.constant 0 : index
    %76 = vector.load %arg2[%c0_52, %75, %c1_53, %c0_54] : memref<1x18x18x128xbf16, #tpu.memory_space<vmem>>, vector<1x16x16x128xbf16>
    %77 = vector.shape_cast %76 : vector<1x16x16x128xbf16> to vector<16x16x128xbf16>
    %78 = vector.shape_cast %77 : vector<16x16x128xbf16> to vector<256x128xbf16>
    %c7 = arith.constant 7 : index
    %c0_55 = arith.constant 0 : index
    %c0_56 = arith.constant 0 : index
    %79 = vector.load %arg3[%c7, %c0_55, %c0_56] : memref<9x128x128xbf16, #tpu.memory_space<vmem>>, vector<1x128x128xbf16>
    %80 = vector.shape_cast %79 : vector<1x128x128xbf16> to vector<128x128xbf16>
    %cst_57 = arith.constant dense<0.000000e+00> : vector<256x128xf32>
    %81 = tpu.matmul %78, %80, %cst_57 {dimension_numbers = #tpu.dot_dimension_numbers<[1], [0], [0], [1], [0, 0, 1, 1], [], []>} : vector<256x128xbf16>, vector<128x128xbf16>, vector<256x128xf32> -> vector<256x128xf32>
    %82 = arith.addf %73, %81 : vector<256x128xf32>
    %c2_i32_58 = arith.constant 2 : i32
    %83 = arith.addi %9, %c2_i32_58 : i32
    %c0_59 = arith.constant 0 : index
    %84 = arith.index_cast %83 : i32 to index
    %c2_60 = arith.constant 2 : index
    %c0_61 = arith.constant 0 : index
    %85 = vector.load %arg2[%c0_59, %84, %c2_60, %c0_61] : memref<1x18x18x128xbf16, #tpu.memory_space<vmem>>, vector<1x16x16x128xbf16>
    %86 = vector.shape_cast %85 : vector<1x16x16x128xbf16> to vector<16x16x128xbf16>
    %87 = vector.shape_cast %86 : vector<16x16x128xbf16> to vector<256x128xbf16>
    %c8 = arith.constant 8 : index
    %c0_62 = arith.constant 0 : index
    %c0_63 = arith.constant 0 : index
    %88 = vector.load %arg3[%c8, %c0_62, %c0_63] : memref<9x128x128xbf16, #tpu.memory_space<vmem>>, vector<1x128x128xbf16>
    %89 = vector.shape_cast %88 : vector<1x128x128xbf16> to vector<128x128xbf16>
    %cst_64 = arith.constant dense<0.000000e+00> : vector<256x128xf32>
    %90 = tpu.matmul %87, %89, %cst_64 {dimension_numbers = #tpu.dot_dimension_numbers<[1], [0], [0], [1], [0, 0, 1, 1], [], []>} : vector<256x128xbf16>, vector<128x128xbf16>, vector<256x128xf32> -> vector<256x128xf32>
    %91 = arith.addf %82, %90 : vector<256x128xf32>
    %c0_65 = arith.constant 0 : index
    %c0_66 = arith.constant 0 : index
    %c0_67 = arith.constant 0 : index
    %c0_68 = arith.constant 0 : index
    %92 = vector.load %arg4[%c0_65, %c0_66, %c0_67, %c0_68] : memref<1x1x256x128xf32, #tpu.memory_space<vmem>>, vector<1x1x256x128xf32>
    %93 = vector.shape_cast %92 : vector<1x1x256x128xf32> to vector<256x128xf32>
    %94 = vector.shape_cast %91 : vector<256x128xf32> to vector<1x1x256x128xf32>
    tpu.vector_store %arg4[%c0_65, %c0_66, %c0_67, %c0_68], %94 {strides = array<i32>} : memref<1x1x256x128xf32, #tpu.memory_space<vmem>>, vector<1x1x256x128xf32>,
    %c0_69 = arith.constant 0 : index
    %c0_70 = arith.constant 0 : index
    %95 = vector.load %arg5[%c0_69, %c0_70] : memref<2x128xf32, #tpu.memory_space<vmem>>, vector<1x128xf32>
    %cst_71 = arith.constant dense<0.000000e+00> : vector<128xf32>
    %96 = vector.multi_reduction <add>, %91, %cst_71 [0] : vector<256x128xf32> to vector<128xf32>
    %97 = vector.shape_cast %96 : vector<128xf32> to vector<1x128xf32>
    %98 = arith.addf %95, %97 : vector<1x128xf32>
    %c0_72 = arith.constant 0 : index
    %c0_73 = arith.constant 0 : index
    %99 = vector.load %arg5[%c0_72, %c0_73] : memref<2x128xf32, #tpu.memory_space<vmem>>, vector<1x128xf32>
    tpu.vector_store %arg5[%c0_72, %c0_73], %98 {strides = array<i32>} : memref<2x128xf32, #tpu.memory_space<vmem>>, vector<1x128xf32>,
    %c1_74 = arith.constant 1 : index
    %c0_75 = arith.constant 0 : index
    %100 = vector.load %arg5[%c1_74, %c0_75] : memref<2x128xf32, #tpu.memory_space<vmem>>, vector<1x128xf32>
    %101 = arith.mulf %91, %91 : vector<256x128xf32>
    %cst_76 = arith.constant dense<0.000000e+00> : vector<128xf32>
    %102 = vector.multi_reduction <add>, %101, %cst_76 [0] : vector<256x128xf32> to vector<128xf32>
    %103 = vector.shape_cast %102 : vector<128xf32> to vector<1x128xf32>
    %104 = arith.addf %100, %103 : vector<1x128xf32>
    %c1_77 = arith.constant 1 : index
    %c0_78 = arith.constant 0 : index
    %105 = vector.load %arg5[%c1_77, %c0_78] : memref<2x128xf32, #tpu.memory_space<vmem>>, vector<1x128xf32>
    tpu.vector_store %arg5[%c1_77, %c0_78], %104 {strides = array<i32>} : memref<2x128xf32, #tpu.memory_space<vmem>>, vector<1x128xf32>,
    %106 = arith.extui %5 : i1 to i32
    %c0_i32_79 = arith.constant 0 : i32
    %107 = arith.cmpi ne, %106, %c0_i32_79 : i32
    scf.if %107 {
      %c0_80 = arith.constant 0 : index
      %c0_81 = arith.constant 0 : index
      %108 = vector.load %arg5[%c0_80, %c0_81] : memref<2x128xf32, #tpu.memory_space<vmem>>, vector<1x128xf32>
      %c1_82 = arith.constant 1 : index
      %c0_83 = arith.constant 0 : index
      %109 = vector.load %arg5[%c1_82, %c0_83] : memref<2x128xf32, #tpu.memory_space<vmem>>, vector<1x128xf32>
      %cst_84 = arith.constant 0.001953125 : f32
      %110 = vector.broadcast %cst_84 : f32 to vector<1x128xf32>
      %111 = arith.mulf %108, %110 : vector<1x128xf32>
      %cst_85 = arith.constant 0.001953125 : f32
      %112 = vector.broadcast %cst_85 : f32 to vector<1x128xf32>
      %113 = arith.mulf %109, %112 : vector<1x128xf32>
      %114 = arith.mulf %111, %111 : vector<1x128xf32>
      %115 = arith.subf %113, %114 : vector<1x128xf32>
      %cst_86 = arith.constant 0.000000e+00 : f32
      %116 = vector.broadcast %cst_86 : f32 to vector<1x128xf32>
      %117 = arith.maximumf %115, %116 : vector<1x128xf32>
      %c0_87 = arith.constant 0 : index
      %c0_88 = arith.constant 0 : index
      %118 = vector.load %arg5[%c0_87, %c0_88] : memref<2x128xf32, #tpu.memory_space<vmem>>, vector<1x128xf32>
      tpu.vector_store %arg5[%c0_87, %c0_88], %111 {strides = array<i32>} : memref<2x128xf32, #tpu.memory_space<vmem>>, vector<1x128xf32>,
      %cst_89 = arith.constant 9.99999974E-6 : f32
      %119 = vector.broadcast %cst_89 : f32 to vector<1x128xf32>
      %120 = arith.addf %117, %119 : vector<1x128xf32>
      %121 = math.rsqrt %120 : vector<1x128xf32>
      %c1_90 = arith.constant 1 : index
      %c0_91 = arith.constant 0 : index
      %122 = vector.load %arg5[%c1_90, %c0_91] : memref<2x128xf32, #tpu.memory_space<vmem>>, vector<1x128xf32>
      tpu.vector_store %arg5[%c1_90, %c0_91], %121 {strides = array<i32>} : memref<2x128xf32, #tpu.memory_space<vmem>>, vector<1x128xf32>,
    } else {
    }
    return
  }
  func.func @transform_0(%arg0: i32, %arg1: i32) -> (i32, i32, i32, i32) {
    %c0_i32 = arith.constant 0 : i32
    %c0_i32_0 = arith.constant 0 : i32
    %c0_i32_1 = arith.constant 0 : i32
    %c0_i32_2 = arith.constant 0 : i32
    return %arg0, %c0_i32, %c0_i32_0, %c0_i32_1 : i32, i32, i32, i32
  }
  func.func @transform_1(%arg0: i32, %arg1: i32) -> (i32, i32, i32) {
    %c0_i32 = arith.constant 0 : i32
    %c0_i32_0 = arith.constant 0 : i32
    %c0_i32_1 = arith.constant 0 : i32
    %c0_i32_2 = arith.constant 0 : i32
    return %c0_i32, %c0_i32_0, %c0_i32_1 : i32, i32, i32
  }
  func.func @transform_2(%arg0: i32, %arg1: i32) -> (i32, i32, i32, i32) {
    %c0_i32 = arith.constant 0 : i32
    %c0_i32_0 = arith.constant 0 : i32
    %c0_i32_1 = arith.constant 0 : i32
    return %arg0, %arg1, %c0_i32, %c0_i32_0 : i32, i32, i32, i32
  }
  func.func @transform_3(%arg0: i32, %arg1: i32) -> (i32, i32) {
    %c0_i32 = arith.constant 0 : i32
    %c0_i32_0 = arith.constant 0 : i32
    %c0_i32_1 = arith.constant 0 : i32
    return %c0_i32, %c0_i32_0 : i32, i32
  }
}

</mosaic_0001>

<bundles_post_ra>
// kernel: tpu_custom_call.1
= control target key start
LH: loop header
LB: loop body
LE: loop exit
PB: predicated region body
PF: predicated region fallthrough
CT: control target
= control target key end

     0   :  { %9 = vsyncpa [#allocation3], 0  ;;  %s9162_s0 = inlined_call_operand.vmem [shape: bf16[2,18,18,128], index: 0, kind: input, shape index: {}]   ;;  %s9163_s1 = inlined_call_operand.vmem [shape: bf16[9,128,128], index: 1, kind: input, shape index: {}]   ;;  %s9164_s2 = inlined_call_operand.hbm [shape: f32[2,1,256,128], index: 2, kind: output, shape index: {0}]   ;;  %s9165_s3 = inlined_call_operand.hbm [shape: f32[2,128], index: 3, kind: output, shape index: {1}]  }
   0x1   :  { %11 = vsyncpa [#allocation3 + $0x1], 0 }
   0x2   :  { %12 = vsyncpa [#allocation5], 0  ;;  %s7206_s12 = smov 0   ;;  %s7208_s13 = smov 0  }
   0x3   :  { %s7210_s14 = smov 0   ;;  %s7212_s15 = smov 0  }
   0x4   :  { %s7214_s16 = smov 0   ;;  %s7216_s17 = smov 0  }
   0x5 LB: > { %s5290_s18 = sadd.s32 4294967295, %s7179_s17   ;;  %s5291_s19 = sadd.s32 4294967294, %s7179_s17   ;;  %s7179_s17 = sphi %s7216_s17, %s18_s17   ;;  %s7175_s16 = sphi %s7214_s16, %s9239_s16   ;;  %s7171_s15 = sphi %s7212_s15, %s9238_s15   ;;  %s7167_s14 = sphi %s7210_s14, %s9237_s14   ;;  %s7163_s13 = sphi %s7208_s13, %s9236_s13   ;;  %s7159_s12 = sphi %s7206_s12, %s9235_s12  }
   0x6   : > { %s30_s20 = sadd.s32 1, %s7175_s16  ;;  %s86_s21 = sadd.s32 1, %s7167_s14 }
   0x7   : > { %p32_p0 = scmp.ge.s32.totalorder %s30_s20, 2  ;;  %p96_p1 = scmp.ne.s32.totalorder %s7167_s14, %s7163_s13 }
   0x8   : > { %p7242_p2 = scmp.eq.s32.totalorder %s5290_s18, 1  ;;  %p102_p3 = scmp.ne.s32.totalorder %s7163_s13, %s7159_s12 }
   0x9   : > { %s9241_s20 = smov (%p32_p0, %s30_s20), 0  ;;  %p103_p5 = scmp.eq.s32.totalorder %s5291_s19, 1 }
   0xa   : > { %p7252_p4 = por %p7242_p2, %p96_p1  ;;  %s81_s24 = ssub.s32 %s7175_s16, %s9241_s20 }
   0xb   : > { %p5294_p6 = scmp.ge.s32.totalorder %s7179_s17, 1  ;;  %p84_p7 = scmp.eq.s32.totalorder %s81_s24, 0 }
   0xc   : > { %p7259_p8 = por %p103_p5, %p102_p3  ;;  %p153_p9 = scmp.lt.s32.totalorder %s7179_s17, 3 }
   0xd   : > { %s7265_s26 = scalar_select %p84_p7, %s7167_s14, %s86_s21  }
   0xe   : > { %p154_p10 = pnand %p5294_p6, %p153_p9 }
  0x10   : > { %157 = sbr.rel (%p154_p10) target bundleno = 702 (0x2be), region = 28 }
  0x17   : > { %s172_s27 = sand.u32 1, %s7163_s13   ;;  %p177_p11 = scmp.lt.s32.totalorder %s7171_s15, 1 }
  0x18   : > { %s5295_s28 = sshll.u32 %s172_s27, 8  ;;  %p183_p12 = scmp.eq.s32.totalorder %s7171_s15, 0 }
  0x19   : > { %p187_p13 = scmp.eq.s32.totalorder %s7171_s15, 1  ;;  %s7279_s7 = scalar_lea.vmem [#allocation2], %s5295_s28  ;;  %v7181_v0 = vmov (%p183_p12), 0.0  }
  0x1a   : > { %s178_s29 = scalar_select %p177_p11, %s7171_s15, 1 }
  0x1b   : > { %191 = sbr.rel (!%p183_p12) target bundleno = 34 (0x22), region = 32  ;;  %192 = vst [vmem:[#allocation4] sm:$0x3] (%p183_p12), %v7181_v0 }
  0x1c   : > { %s6813_s30 = smul.u32 216, %s178_s29 }
  0x1e   : > { %s7277_s6 = scalar_lea.vmem %s9162_s0, %s6813_s30 }
  0x22 PF: > { %v6879_v1 = vld [vmem:[%s9163_s1 + $0x40] sm:$0xff]   ;;  %v6881_v3 = vld [vmem:[%s9163_s1 + $0x48] sm:$0xff]   ;;  %v6883_v5 = vld [vmem:[%s9163_s1 + $0x50] sm:$0xff]   ;;  %vm261_vm0 = vsmask.f32 3328  ;;  %vm1291_vm3 = vcmask 1042432  }
  0x23   : > { %v6880_v2 = vld [vmem:[%s9163_s1 + $0x100] sm:$0xff]   ;;  %6109 = vmatprep.subr.bf16.mxu1 %v6879_v1  ;;  %v6882_v4 = vld [vmem:[%s9163_s1 + $0x108] sm:$0xff]   ;;  %v6884_v6 = vld [vmem:[%s9163_s1 + $0x110] sm:$0xff]   ;;  %vm262_vm1 = vsmask.f32 7440  ;;  %vm1292_vm4 = vcmask 1046532  }
  0x24   : > { %6301 = vmatprep.subr.bf16.mxu0 %v6880_v2  ;;  %6110 = vmatpush3.bf16.msra.mxu1 %v6879_v1  ;;  %v6885_v7 = vld [vmem:[%s9163_s1 + $0x58] sm:$0xff]   ;;  %v6887_v9 = vld [vmem:[%s9163_s1 + $0x60] sm:$0xff]   ;;  %v6889_v11 = vld [vmem:[%s9163_s1 + $0x68] sm:$0xff]  }
  0x25   : > { %6302 = vmatpush3.bf16.msra.mxu0 %v6880_v2  ;;  %6111 = vmatprep.subr.bf16.mxu1 %v6881_v3  ;;  %v6886_v8 = vld [vmem:[%s9163_s1 + $0x118] sm:$0xff]   ;;  %v6888_v10 = vld [vmem:[%s9163_s1 + $0x120] sm:$0xff]   ;;  %v6890_v12 = vld [vmem:[%s9163_s1 + $0x128] sm:$0xff]  }
  0x26   : > { %6303 = vmatprep.subr.bf16.mxu0 %v6882_v4  ;;  %v197_v13 = vld [vmem:[%s7277_s6] sm:$0xf]  ;;  %v198_v14 = vld [vmem:[%s7277_s6 + $0x4] sm:$0xf]  ;;  %v245_v15 = vld [vmem:[%s7277_s6 + $0x8] sm:$0x1] }
  0x27   : > { %v265_v16 = vshrl.u32 %v197_v13, 16  ;;  %v268_v17 = vshll.u32 %v197_v13, 16  ;;  %v274_v18 = vshll.u32 %v198_v14, 16  ;;  %v278_v19 = vshrl.u32 %v198_v14, 16  ;;  %v5491_v21 = vld [vmem:[%s7277_s6 + $0xc] sm:$0xf]  ;;  %vm7341_vm2 = vmor %vm261_vm0, %vm262_vm1 }
  0x28   : > { %6112 = vmatpush3.bf16.msra.mxu1 %v6881_v3  ;;  %v284_v20 = vshll.u32 %v245_v15, 16  ;;  %v7322_v24 = vld [vmem:[%s7277_s6 + $0x10] sm:$0xf]  ;;  %v7325_v25 = vld [vmem:[%s7277_s6 + $0x14] sm:$0x1]  ;;  %v2167_v30 = vshrl.u32 %v5491_v21, 16  ;;  %vm7587_vm5 = vmor %vm1291_vm3, %vm1292_vm4 }
  0x29   : > { %6304 = vmatpush3.bf16.msra.mxu0 %v6882_v4  ;;  %6113 = vmatprep.subr.bf16.mxu1 %v6883_v5  ;;  %v267_v22 = vrot.slane %v265_v16, 4  ;;  %v270_v23 = vrot.slane %v268_v17, 5  ;;  %v6891_v26 = vld [vmem:[%s9163_s1 + $0x70] sm:$0xff]   ;;  %v276_v27 = vrot.slane %v274_v18, 5  ;;  %v280_v28 = vrot.slane %v278_v19, 4  ;;  %v6893_v37 = vld [vmem:[%s9163_s1 + $0x78] sm:$0xff]  }
  0x2a   : > { %6305 = vmatprep.subr.bf16.mxu0 %v6884_v6  ;;  %v286_v29 = vrot.slane %v284_v20, 5  ;;  %v6892_v31 = vld [vmem:[%s9163_s1 + $0x130] sm:$0xff]   ;;  %v2170_v33 = vshll.u32 %v5491_v21, 16  ;;  %v2176_v34 = vshll.u32 %v7322_v24, 16  ;;  %v2180_v35 = vshrl.u32 %v7322_v24, 16  ;;  %v6894_v52 = vld [vmem:[%s9163_s1 + $0x138] sm:$0xff]  }
  0x2b   : > { %v271_v32 = vor.u32 %v270_v23, %v267_v22  ;;  %v199_v36 = vld [vmem:[%s7277_s6 + $0xc] sm:$0xf]  ;;  %v281_v39 = vor.u32 %v280_v28, %v276_v27  ;;  %v2169_v40 = vrot.slane %v2167_v30, 4  ;;  %v2186_v41 = vshll.u32 %v7325_v25, 16  ;;  %v200_v43 = vld [vmem:[%s7277_s6 + $0x10] sm:$0xf] }
  0x2c   : > { %6114 = vmatpush3.bf16.msra.mxu1 %v6883_v5  ;;  %v2941_v42 = vrot.slane %v7325_v25, 5  ;;  %v2172_v45 = vrot.slane %v2170_v33, 5  ;;  %v2178_v46 = vrot.slane %v2176_v34, 5  ;;  %v2182_v47 = vrot.slane %v2180_v35, 4  ;;  %v246_v56 = vld [vmem:[%s7277_s6 + $0x14] sm:$0x1] }
  0x2d   : > { %6306 = vmatpush3.bf16.msra.mxu0 %v6884_v6  ;;  %6115 = vmatprep.subr.bf16.mxu1 %v6885_v7  ;;  %v272_v44 = vrot.slane %v271_v32, 4  ;;  %v282_v48 = vrot.slane %v281_v39, 4  ;;  %v2188_v49 = vrot.slane %v2186_v41, 5  ;;  %v289_v50 = vshrl.u32 %v199_v36, 16  ;;  %v5494_v58 = vld [vmem:[%s7277_s6 + $0x18] sm:$0xf] }
  0x2e   : > { %6307 = vmatprep.subr.bf16.mxu0 %v6886_v8  ;;  %v292_v51 = vshll.u32 %v199_v36, 16  ;;  %v2173_v54 = vor.u32 %v2172_v45, %v2169_v40  ;;  %v2183_v55 = vor.u32 %v2182_v47, %v2178_v46  ;;  %v298_v57 = vshll.u32 %v200_v43, 16  ;;  %v7358_v63 = vld [vmem:[%s7277_s6 + $0x1c] sm:$0xf]  ;;  %v6895_v4 = vld [vmem:[%s9163_s1] sm:$0xff]   ;;  %v6898_v47 = vld [vmem:[%s9163_s1 + $0x8] sm:$0xff]  }
  0x2f   : > { %v277_v53 = vsel %vm7341_vm2, %v272_v44, %v276_v27  ;;  %v287_v59 = vsel %vm7341_vm2, %v282_v48, %v286_v29  ;;  %v291_v60 = vrot.slane %v289_v50, 4  ;;  %v302_v62 = vshrl.u32 %v200_v43, 16  ;;  %v7366_v5 = vld [vmem:[%s9163_s1 + $0x140] sm:$0xff]   ;;  %v201_v22 = vld [vmem:[%s7277_s6 + $0x18] sm:$0xf] }
  0x30   : > { %6116 = vmatpush3.bf16.msra.mxu1 %v6885_v7  ;;  %v294_v61 = vrot.slane %v292_v51, 5  ;;  %v5315_v0 = vcombine.low %v277_v53, %v287_v59  ;;  %v2174_v1 = vrot.slane %v2173_v54, 4  ;;  %v2184_v2 = vrot.slane %v2183_v55, 4  ;;  %v202_v29 = vld [vmem:[%s7277_s6 + $0x1c] sm:$0xf] }
  0x31   : > { %6308 = vmatpush3.bf16.msra.mxu0 %v6886_v8  ;;  %6117 = vmatprep.subr.bf16.mxu1 %v6887_v9  ;;  %v300_v3 = vrot.slane %v298_v57, 5  ;;  %v304_v7 = vrot.slane %v302_v62, 4  ;;  %v308_v8 = vshll.u32 %v246_v56, 16  ;;  %v2194_v13 = vshll.u32 %v5494_v58, 16  ;;  %v247_v34 = vld [vmem:[%s7277_s6 + $0x20] sm:$0x1] }
  0x32   : > { %6309 = vmatprep.subr.bf16.mxu0 %v6888_v10  ;;  %v295_v6 = vor.u32 %v294_v61, %v291_v60  ;;  %6125 = vmatprep.mubr.bf16.mxu1 %v5315_v0  ;;  %v2200_v20 = vshll.u32 %v7358_v63, 16  ;;  %v2204_v21 = vshrl.u32 %v7358_v63, 16  ;;  %v2945_v28 = vrot.slane %v7358_v63, 5  ;;  %v5497_v40 = vld [vmem:[%s7277_s6 + $0x24] sm:$0xf]  ;;  %v6897_v0 = vld [vmem:[%s9163_s1 + $0x148] sm:$0xff]  }
  0x33   : > { %v305_v16 = vor.u32 %v304_v7, %v300_v3  ;;  %v310_v17 = vrot.slane %v308_v8, 5  ;;  %v2196_v19 = vrot.slane %v2194_v13, 5  ;;  %v313_v39 = vshrl.u32 %v201_v22, 16  ;;  %v203_v53 = vld [vmem:[%s7277_s6 + $0x24] sm:$0xf] }
  0x34   : > { %6118 = vmatpush3.bf16.msra.mxu1 %v6887_v9  ;;  %v7369_v9 = vld [vmem:[%s7277_s6 + $0x20] sm:$0x1]  ;;  %v296_v15 = vrot.slane %v295_v6, 4  ;;  %v2206_v32 = vrot.slane %v2204_v21, 4  ;;  %v316_v45 = vshll.u32 %v201_v22, 16  ;;  %v326_v50 = vshrl.u32 %v202_v29, 16 }
  0x35   : > { %6310 = vmatpush3.bf16.msra.mxu0 %v6888_v10  ;;  %6119 = vmatprep.subr.bf16.mxu1 %v6889_v11  ;;  %v2179_v10 = vsel %vm7341_vm2, %v2174_v1, %v2178_v46  ;;  %v2210_v27 = vshll.u32 %v7369_v9, 16  ;;  %v2948_v33 = vrot.slane %v7369_v9, 5  ;;  %v7394_v46 = vld [vmem:[%s7277_s6 + $0x28] sm:$0xf]  ;;  %v315_v48 = vrot.slane %v313_v39, 4 }
  0x36   : > { %6311 = vmatprep.subr.bf16.mxu0 %v6890_v12  ;;  %v301_v23 = vsel %vm7341_vm2, %v296_v15, %v300_v3  ;;  %v332_v51 = vshll.u32 %v247_v34, 16  ;;  %v318_v56 = vrot.slane %v316_v45, 5  ;;  %v2215_v57 = vshrl.u32 %v5497_v40, 16  ;;  %v204_v6 = vld [vmem:[%s7277_s6 + $0x28] sm:$0xf] }
  0x37   : > { %v2212_v36 = vrot.slane %v2210_v27, 5  ;;  %v328_v59 = vrot.slane %v326_v50, 4  ;;  %v2218_v61 = vshll.u32 %v5497_v40, 16  ;;  %v2224_v3 = vshll.u32 %v7394_v46, 16  ;;  %v7425_v34 = vld [vmem:[%s7277_s6 + $0x34] sm:$0xf] }
  0x38   : > { %6120 = vmatpush3.bf16.msra.mxu1 %v6889_v11  ;;  %v2189_v11 = vsel %vm7341_vm2, %v2184_v2, %v2188_v49  ;;  %v322_v49 = vshll.u32 %v202_v29, 16  ;;  %v334_v60 = vrot.slane %v332_v51, 5  ;;  %v319_v1 = vor.u32 %v318_v56, %v315_v48 }
  0x39   : > { %6312 = vmatpush3.bf16.msra.mxu0 %v6890_v12  ;;  %6121 = vmatprep.subr.bf16.mxu1 %v6891_v26  ;;  %v2191_v12 = vshrl.u32 %v5494_v58, 16  ;;  %v5555_v14 = vcombine.low %v2179_v10, %v2189_v11  ;;  %v2217_v2 = vrot.slane %v2215_v57, 4  ;;  %v2220_v10 = vrot.slane %v2218_v61, 5  ;;  %v6907_v61 = vld [vmem:[%s9163_s1 + $0x20] sm:$0xff]  }
  0x3a   : > { %6313 = vmatprep.subr.bf16.mxu0 %v6892_v31  ;;  %v324_v58 = vrot.slane %v322_v49, 5  ;;  %v2228_v11 = vshrl.u32 %v7394_v46, 16  ;;  %v320_v13 = vrot.slane %v319_v1, 4  ;;  %v340_v21 = vshll.u32 %v203_v53, 16  ;;  %v6900_v49 = vld [vmem:[%s9163_s1 + $0x158] sm:$0xff]  }
  0x3b   : > { %v2193_v18 = vrot.slane %v2191_v12, 4  ;;  %6317 = vmatprep.mubr.bf16.mxu0 %v5555_v14  ;;  %v248_v12 = vld [vmem:[%s7277_s6 + $0x2c] sm:$0x1]  ;;  %v2226_v14 = vrot.slane %v2224_v3, 5  ;;  %v346_v27 = vshll.u32 %v204_v6, 16  ;;  %v350_v40 = vshrl.u32 %v204_v6, 16 }
  0x3c   : > { %6122 = vmatpush3.bf16.msra.mxu1 %v6891_v26  ;;  %v306_v26 = vrot.slane %v305_v16, 4  ;;  %v329_v8 = vor.u32 %v328_v59, %v324_v58  ;;  %v337_v16 = vshrl.u32 %v203_v53, 16  ;;  %v325_v22 = vsel %vm7341_vm2, %v320_v13, %v324_v58  ;;  %v249_v3 = vld [vmem:[%s7277_s6 + $0x38] sm:$0x1] }
  0x3d   : > { %6314 = vmatpush3.bf16.msra.mxu0 %v6892_v31  ;;  %6123 = vmatprep.subr.bf16.mxu1 %v6893_v37  ;;  %v2197_v30 = vor.u32 %v2196_v19, %v2193_v18  ;;  %v2202_v31 = vrot.slane %v2200_v20, 5  ;;  %v2221_v19 = vor.u32 %v2220_v10, %v2217_v2  ;;  %v2230_v20 = vrot.slane %v2228_v11, 4  ;;  %v5503_v10 = vld [vmem:[%s7277_s6 + $0x3c] sm:$0xf] }
  0x3e   : > { %6315 = vmatprep.subr.bf16.mxu0 %v6894_v52  ;;  %v311_v35 = vsel %vm7341_vm2, %v306_v26, %v310_v17  ;;  %v5500_v17 = vld [vmem:[%s7277_s6 + $0x30] sm:$0xf]  ;;  %v330_v18 = vrot.slane %v329_v8, 4  ;;  %v339_v26 = vrot.slane %v337_v16, 4  ;;  %v348_v39 = vrot.slane %v346_v27, 5 }
  0x3f   : > { %v5316_v41 = vcombine.low %v301_v23, %v311_v35  ;;  %v2198_v43 = vrot.slane %v2197_v30, 4  ;;  %v2207_v44 = vor.u32 %v2206_v32, %v2202_v31  ;;  %v2222_v30 = vrot.slane %v2221_v19, 4  ;;  %v6904_v35 = vld [vmem:[%s9163_s1 + $0x18] sm:$0xff]  }
  0x40   : > { %6124 = vmatpush3.bf16.msra.mxu1 %v6893_v37  ;;  %v7390_v37 = vrot.slane %v2945_v28, 4  ;;  %v335_v29 = vsel %vm7341_vm2, %v330_v18, %v334_v60  ;;  %v342_v32 = vrot.slane %v340_v21, 5  ;;  %v2239_v48 = vshrl.u32 %v5500_v17, 16  ;;  %v206_v60 = vld [vmem:[%s7277_s6 + $0x34] sm:$0xf]  ;;  %v6902_v21 = vld [vmem:[%s9163_s1 + $0x160] sm:$0xff]  }
  0x41   : > { %6316 = vmatpush3.bf16.msra.mxu0 %v6894_v52  ;;  %6157 = vmatprep.subr.bf16.mxu1 %v6895_v4  ;;  %v7400_v52 = vld [vmem:[%s7277_s6 + $0x2c] sm:$0x1]  ;;  %v2203_v54 = vsel %vm7341_vm2, %v2198_v43, %v2202_v31  ;;  %v2208_v55 = vrot.slane %v2207_v44, 4  ;;  %v2231_v31 = vor.u32 %v2230_v20, %v2226_v14  ;;  %v2227_v43 = vsel %vm7341_vm2, %v2222_v30, %v2226_v14  ;;  %v7459_v20 = vld [vmem:[%s7277_s6 + $0x40] sm:$0xf] }
  0x42   : > { %6349 = vmatprep.subr.bf16.mxu0 %v7366_v5  ;;  %v2234_v15 = vshll.u32 %v7400_v52, 16  ;;  %v343_v45 = vor.u32 %v342_v32, %v339_v26  ;;  %v352_v50 = vrot.slane %v350_v40, 4  ;;  %v2242_v53 = vshll.u32 %v5500_v17, 16 }
  0x43   : > { %6126 = vmatmul.mubr.bf16.vlgmr.msra.gmra.mrb[0].mxu1 %v5316_v41  ;;  %v2213_v62 = vsel %vm7341_vm2, %v2208_v55, %v2212_v36  ;;  %v5317_v36 = vcombine.low %v325_v22, %v335_v29  ;;  %v356_v41 = vshll.u32 %v248_v12, 16  ;;  %v2232_v44 = vrot.slane %v2231_v31, 4  ;;  %v205_v55 = vld [vmem:[%s7277_s6 + $0x30] sm:$0xf]  ;;  %v7467_v29 = vld [vmem:[%s7277_s6 + $0x44] sm:$0x1] }
  0x44   : > { %6158 = vmatpush3.bf16.msra.mxu1 %v6895_v4  ;;  %v6901_v4 = vld [vmem:[%s9163_s1 + $0x10] sm:$0xff]   ;;  %v5556_v7 = vcombine.low %v2203_v54, %v2213_v62  ;;  %v2236_v23 = vrot.slane %v2234_v15, 5  ;;  %v2248_v54 = vshll.u32 %v7425_v34, 16  ;;  %v344_v57 = vrot.slane %v343_v45, 4  ;;  %v6909_v15 = vld [vmem:[%s9163_s1 + $0x28] sm:$0xff]  }
  0x45   : > { %6159 = vmatprep.subr.bf16.mxu1 %v6898_v47  ;;  %6129 = vmatprep.mubr.bf16.mxu1 %v5317_v36  ;;  %v358_v51 = vrot.slane %v356_v41, 5  ;;  %v2241_v58 = vrot.slane %v2239_v48, 4  ;;  %v2252_v59 = vshrl.u32 %v7425_v34, 16  ;;  %v2244_v1 = vrot.slane %v2242_v53, 5  ;;  %v6911_v36 = vld [vmem:[%s9163_s1 + $0x30] sm:$0xff]  }
  0x46   : > { %6318 = vmatmul.mubr.bf16.vlgmr.msra.gmra.mrb[0].mxu0 %v5556_v7  ;;  %v2237_v56 = vsel %vm7341_vm2, %v2232_v44, %v2236_v23  ;;  %v2250_v2 = vrot.slane %v2248_v54, 5  ;;  %v349_v6 = vsel %vm7341_vm2, %v344_v57, %v348_v39  ;;  %v361_v8 = vshrl.u32 %v205_v55, 16 }
  0x47   : > { %6350 = vmatpush3.bf16.msra.mxu0 %v7366_v5  ;;  %v6899_v5 = vld [vmem:[%s9163_s1 + $0x150] sm:$0xff]   ;;  %v5557_v62 = vcombine.low %v2227_v43, %v2237_v56  ;;  %v2245_v12 = vor.u32 %v2244_v1, %v2241_v58  ;;  %v364_v13 = vshll.u32 %v205_v55, 16  ;;  %v370_v14 = vshll.u32 %v206_v60, 16  ;;  %v208_v56 = vld [vmem:[%s7277_s6 + $0x40] sm:$0xf] }
  0x48   : > { %6160 = vmatpush3.bf16.msra.mxu1 %v6898_v47  ;;  %6351 = vmatprep.subr.bf16.mxu0 %v6897_v0  ;;  %v7436_v47 = vld [vmem:[%s7277_s6 + $0x38] sm:$0x1]  ;;  %v363_v18 = vrot.slane %v361_v8, 4  ;;  %v374_v19 = vshrl.u32 %v206_v60, 16  ;;  %v2263_v41 = vshrl.u32 %v5503_v10, 16  ;;  %v2266_v43 = vshll.u32 %v5503_v10, 16 }
  0x49   : > { %6161 = vmatprep.subr.bf16.mxu1 %v6901_v4  ;;  %v2258_v7 = vshll.u32 %v7436_v47, 16  ;;  %6321 = vmatprep.mubr.bf16.mxu0 %v5557_v62  ;;  %v2246_v23 = vrot.slane %v2245_v12, 4  ;;  %v366_v26 = vrot.slane %v364_v13, 5  ;;  %v372_v27 = vrot.slane %v370_v14, 5  ;;  %v5506_v10 = vld [vmem:[%s7277_s6 + $0x48] sm:$0xf] }
  0x4a   : > { %v376_v32 = vrot.slane %v374_v19, 4  ;;  %v2265_v54 = vrot.slane %v2263_v41, 4  ;;  %v2268_v55 = vrot.slane %v2266_v43, 5  ;;  %v2282_v60 = vshll.u32 %v7467_v29, 16 }
  0x4b   : > { %6352 = vmatpush3.bf16.msra.mxu0 %v6897_v0  ;;  %v353_v0 = vor.u32 %v352_v50, %v348_v39  ;;  %v2260_v17 = vrot.slane %v2258_v7, 5  ;;  %v2251_v39 = vsel %vm7341_vm2, %v2246_v23, %v2250_v2  ;;  %v367_v40 = vor.u32 %v366_v26, %v363_v18  ;;  %v7500_v23 = vld [vmem:[%s7277_s6 + $0x50] sm:$0x1] }
  0x4c   : > { %6162 = vmatpush3.bf16.msra.mxu1 %v6901_v4  ;;  %6353 = vmatprep.subr.bf16.mxu0 %v6899_v5  ;;  %v2254_v4 = vrot.slane %v2252_v59, 4  ;;  %v377_v45 = vor.u32 %v376_v32, %v372_v27  ;;  %v2272_v50 = vshll.u32 %v7459_v20, 16  ;;  %v2276_v59 = vshrl.u32 %v7459_v20, 16  ;;  %v6906_v32 = vld [vmem:[%s9163_s1 + $0x178] sm:$0xff]  }
  0x4d   : > { %6163 = vmatprep.subr.bf16.mxu1 %v6904_v35  ;;  %v354_v11 = vrot.slane %v353_v0, 4  ;;  %v368_v53 = vrot.slane %v367_v40, 4  ;;  %v2269_v62 = vor.u32 %v2268_v55, %v2265_v54  ;;  %v250_v0 = vld [vmem:[%s7277_s6 + $0x44] sm:$0x1]  ;;  %v2284_v7 = vrot.slane %v2282_v60, 5 }
  0x4e   : > { %v2255_v16 = vor.u32 %v2254_v4, %v2250_v2  ;;  %v378_v57 = vrot.slane %v377_v45, 4  ;;  %v2274_v58 = vrot.slane %v2272_v50, 5  ;;  %v2278_v4 = vrot.slane %v2276_v59, 4  ;;  %v210_v54 = vld [vmem:[%s7277_s6 + $0x4c] sm:$0xf] }
  0x4f   : > { %6354 = vmatpush3.bf16.msra.mxu0 %v6899_v5  ;;  %v359_v22 = vsel %vm7341_vm2, %v354_v11, %v358_v51  ;;  %v380_v5 = vshll.u32 %v249_v3, 16  ;;  %v6913_v3 = vld [vmem:[%s9163_s1 + $0x38] sm:$0xff]   ;;  %v394_v8 = vshll.u32 %v208_v56, 16  ;;  %v2270_v12 = vrot.slane %v2269_v62, 4  ;;  %v251_v55 = vld [vmem:[%s7277_s6 + $0x50] sm:$0x1] }
  0x50   : > { %6164 = vmatpush3.bf16.msra.mxu1 %v6904_v35  ;;  %6355 = vmatprep.subr.bf16.mxu0 %v6900_v49  ;;  %v5318_v30 = vcombine.low %v349_v6, %v359_v22  ;;  %v2256_v31 = vrot.slane %v2255_v16, 4  ;;  %v207_v35 = vld [vmem:[%s7277_s6 + $0x3c] sm:$0xf]  ;;  %v6905_v16 = vld [vmem:[%s9163_s1 + $0x170] sm:$0xff]   ;;  %v398_v19 = vshrl.u32 %v208_v56, 16  ;;  %v404_v22 = vshll.u32 %v250_v0, 16 }
  0x51   : > { %6165 = vmatprep.subr.bf16.mxu1 %v6907_v61  ;;  %v382_v48 = vrot.slane %v380_v5, 5  ;;  %v385_v1 = vshrl.u32 %v207_v35, 16  ;;  %v388_v2 = vshll.u32 %v207_v35, 16  ;;  %v396_v18 = vrot.slane %v394_v8, 5  ;;  %v7511_v5 = vld [vmem:[%s9163_s1 + $0x80] sm:$0xff]  }
  0x52   : > { %6130 = vmatmul.mubr.bf16.gmra.mrb[4].mxu1 %v5318_v30  ;;  %v2261_v44 = vsel %vm7341_vm2, %v2256_v31, %v2260_v17  ;;  %v2279_v17 = vor.u32 %v2278_v4, %v2274_v58  ;;  %v2290_v30 = vshll.u32 %v5506_v10, 16  ;;  %v209_v31 = vld [vmem:[%s7277_s6 + $0x48] sm:$0xf]  ;;  %v5509_v59 = vld [vmem:[%s7277_s6 + $0x54] sm:$0xf]  ;;  %v422_v4 = vshrl.u32 %v210_v54, 16 }
  0x53   : > { %6356 = vmatpush3.bf16.msra.mxu0 %v6900_v49  ;;  %v5558_v51 = vcombine.low %v2251_v39, %v2261_v44  ;;  %v6903_v49 = vld [vmem:[%s9163_s1 + $0x168] sm:$0xff]   ;;  %v383_v6 = vsel %vm7341_vm2, %v378_v57, %v382_v48  ;;  %v387_v13 = vrot.slane %v385_v1, 4  ;;  %v390_v14 = vrot.slane %v388_v2, 5  ;;  %v7525_v1 = vld [vmem:[%s7277_s6 + $0x58] sm:$0xf] }
  0x54   : > { %6166 = vmatpush3.bf16.msra.mxu1 %v6907_v61  ;;  %6357 = vmatprep.subr.bf16.mxu0 %v6902_v21  ;;  %v373_v61 = vsel %vm7341_vm2, %v368_v53, %v372_v27  ;;  %v2287_v27 = vshrl.u32 %v5506_v10, 16  ;;  %v2280_v35 = vrot.slane %v2279_v17, 4  ;;  %v406_v39 = vrot.slane %v404_v22, 5 }
  0x55   : > { %6167 = vmatprep.subr.bf16.mxu1 %v6909_v15  ;;  %6322 = vmatmul.mubr.bf16.gmra.mrb[4].mxu0 %v5558_v51  ;;  %v5319_v11 = vcombine.low %v373_v61, %v383_v6  ;;  %v391_v26 = vor.u32 %v390_v14, %v387_v13  ;;  %v2292_v44 = vrot.slane %v2290_v30, 5  ;;  %v2306_v53 = vshll.u32 %v7500_v23, 16 }
  0x56   : > { %v2289_v43 = vrot.slane %v2287_v27, 4  ;;  %v2285_v48 = vsel %vm7341_vm2, %v2280_v35, %v2284_v7  ;;  %v409_v62 = vshrl.u32 %v209_v31, 16  ;;  %v412_v0 = vshll.u32 %v209_v31, 16  ;;  %v7530_v7 = vld [vmem:[%s9163_s1 + $0x180] sm:$0xff]  }
  0x57   : > { %6358 = vmatpush3.bf16.msra.mxu0 %v6902_v21  ;;  %6133 = vmatprep.mubr.bf16.mxu1 %v5319_v11  ;;  %v2275_v21 = vsel %vm7341_vm2, %v2270_v12, %v2274_v58  ;;  %v392_v41 = vrot.slane %v391_v26, 4  ;;  %v2308_v61 = vrot.slane %v2306_v53, 5  ;;  %v428_v12 = vshll.u32 %v251_v55, 16  ;;  %v5512_v53 = vld [vmem:[%s7277_s6 + $0x60] sm:$0xf] }
  0x58   : > { %6168 = vmatpush3.bf16.msra.mxu1 %v6909_v15  ;;  %v7494_v15 = vld [vmem:[%s7277_s6 + $0x4c] sm:$0xf]  ;;  %6359 = vmatprep.subr.bf16.mxu0 %v6903_v49  ;;  %v5559_v56 = vcombine.low %v2275_v21, %v2285_v48  ;;  %v2293_v57 = vor.u32 %v2292_v44, %v2289_v43  ;;  %v411_v10 = vrot.slane %v409_v62, 4  ;;  %v414_v11 = vrot.slane %v412_v0, 5  ;;  %v7537_v21 = vld [vmem:[%s7277_s6 + $0x5c] sm:$0x1] }
  0x59   : > { %6169 = vmatprep.subr.bf16.mxu1 %v6911_v36  ;;  %v2296_v40 = vshll.u32 %v7494_v15, 16  ;;  %v2300_v45 = vshrl.u32 %v7494_v15, 16  ;;  %v430_v22 = vrot.slane %v428_v12, 5  ;;  %v2311_v26 = vshrl.u32 %v5509_v59, 16  ;;  %v212_v44 = vld [vmem:[%s7277_s6 + $0x58] sm:$0xf] }
  0x5a   : > { %6325 = vmatprep.mubr.bf16.mxu0 %v5559_v56  ;;  %v2294_v2 = vrot.slane %v2293_v57, 4  ;;  %v2314_v30 = vshll.u32 %v5509_v59, 16  ;;  %v2320_v31 = vshll.u32 %v7525_v1, 16  ;;  %v2324_v35 = vshrl.u32 %v7525_v1, 16 }
  0x5b   : > { %6360 = vmatpush3.bf16.msra.mxu0 %v6903_v49  ;;  %v2298_v51 = vrot.slane %v2296_v40, 5  ;;  %v397_v49 = vsel %vm7341_vm2, %v392_v41, %v396_v18  ;;  %v2302_v58 = vrot.slane %v2300_v45, 4  ;;  %v2313_v43 = vrot.slane %v2311_v26, 4  ;;  %v7565_v26 = vld [vmem:[%s7277_s6 + $0x60] sm:$0xf] }
  0x5c   : > { %6170 = vmatpush3.bf16.msra.mxu1 %v6911_v36  ;;  %v400_v36 = vrot.slane %v398_v19, 4  ;;  %6361 = vmatprep.subr.bf16.mxu0 %v6905_v16  ;;  %v424_v19 = vrot.slane %v422_v4, 4  ;;  %v2322_v45 = vrot.slane %v2320_v31, 5  ;;  %v2326_v48 = vrot.slane %v2324_v35, 4 }
  0x5d   : > { %6171 = vmatprep.subr.bf16.mxu1 %v6913_v3  ;;  %v2303_v6 = vor.u32 %v2302_v58, %v2298_v51  ;;  %v2299_v14 = vsel %vm7341_vm2, %v2294_v2, %v2298_v51  ;;  %v252_v51 = vld [vmem:[%s7277_s6 + $0x5c] sm:$0x1] }
  0x5e   : > { %v401_v50 = vor.u32 %v400_v36, %v396_v18  ;;  %v415_v18 = vor.u32 %v414_v11, %v411_v10  ;;  %v211_v36 = vld [vmem:[%s7277_s6 + $0x54] sm:$0xf]  ;;  %v2327_v58 = vor.u32 %v2326_v48, %v2322_v45 }
  0x5f   : > { %6362 = vmatpush3.bf16.msra.mxu0 %v6905_v16  ;;  %v2304_v16 = vrot.slane %v2303_v6, 4  ;;  %v433_v56 = vshrl.u32 %v211_v36, 16  ;;  %v446_v6 = vshrl.u32 %v212_v44, 16 }
  0x60   : > { %6172 = vmatpush3.bf16.msra.mxu1 %v6913_v3  ;;  %v402_v60 = vrot.slane %v401_v50, 4  ;;  %v418_v3 = vshll.u32 %v210_v54, 16  ;;  %6363 = vmatprep.subr.bf16.mxu0 %v6906_v32  ;;  %v416_v40 = vrot.slane %v415_v18, 4  ;;  %v2330_v50 = vshll.u32 %v7537_v21, 16  ;;  %v7561_v18 = vld [vmem:[%s7277_s6 + $0x68] sm:$0x1] }
  0x61   : > { %6205 = vmatprep.subr.bf16.mxu1 %v7511_v5  ;;  %v2309_v27 = vsel %vm7341_vm2, %v2304_v16, %v2308_v61  ;;  %v7552_v61 = vld [vmem:[%s7277_s6 + $0x64] sm:$0xf]  ;;  %v435_v0 = vrot.slane %v433_v56, 4  ;;  %v448_v12 = vrot.slane %v446_v6, 4  ;;  %v2354_v48 = vshll.u32 %v7561_v18, 16 }
  0x62   : > { %v407_v8 = vsel %vm7341_vm2, %v402_v60, %v406_v39  ;;  %v420_v17 = vrot.slane %v418_v3, 5  ;;  %v5560_v39 = vcombine.low %v2299_v14, %v2309_v27  ;;  %v2332_v59 = vrot.slane %v2330_v50, 5  ;;  %v7583_v6 = vld [vmem:[%s7277_s6 + $0x6c] sm:$0xf] }
  0x63   : > { %v5320_v13 = vcombine.low %v397_v49, %v407_v8  ;;  %6364 = vmatpush3.bf16.msra.mxu0 %v6906_v32  ;;  %v2316_v32 = vrot.slane %v2314_v30, 5  ;;  %v436_v49 = vshll.u32 %v211_v36, 16  ;;  %v442_v60 = vshll.u32 %v212_v44, 16  ;;  %v7568_v36 = vld [vmem:[%s7277_s6 + $0x64] sm:$0xf] }
  0x64   : > { %6397 = vmatprep.subr.bf16.mxu0 %v7530_v7  ;;  %v425_v41 = vor.u32 %v424_v19, %v420_v17  ;;  %6326 = vmatmul.mubr.bf16.gmra.mrb[8].mxu0 %v5560_v39  ;;  %v421_v54 = vsel %vm7341_vm2, %v416_v40, %v420_v17  ;;  %v2328_v8 = vrot.slane %v2327_v58, 4  ;;  %v2335_v14 = vshrl.u32 %v5512_v53, 16  ;;  %v253_v44 = vld [vmem:[%s7277_s6 + $0x68] sm:$0x1] }
  0x65   : > { %6134 = vmatmul.mubr.bf16.gmra.mrb[8].mxu1 %v5320_v13  ;;  %v2317_v57 = vor.u32 %v2316_v32, %v2313_v43  ;;  %v438_v2 = vrot.slane %v436_v49, 5  ;;  %v444_v10 = vrot.slane %v442_v60, 5  ;;  %v452_v13 = vshll.u32 %v252_v51, 16  ;;  %v5579_v51 = vld [vmem:[%s7277_s6 + $0xc] sm:$0xe] }
  0x66   : > { %v426_v55 = vrot.slane %v425_v41, 4  ;;  %v2333_v17 = vsel %vm7341_vm2, %v2328_v8, %v2332_v59  ;;  %v2338_v19 = vshll.u32 %v5512_v53, 16  ;;  %v2337_v39 = vrot.slane %v2335_v14, 4 }
  0x67   : > { %v2318_v4 = vrot.slane %v2317_v57, 4  ;;  %v439_v11 = vor.u32 %v438_v2, %v435_v0  ;;  %v449_v31 = vor.u32 %v448_v12, %v444_v10  ;;  %v454_v35 = vrot.slane %v452_v13, 5 }
  0x68   : > { %v431_v62 = vsel %vm7341_vm2, %v426_v55, %v430_v22  ;;  %v2344_v22 = vshll.u32 %v7552_v61, 16  ;;  %v2340_v40 = vrot.slane %v2338_v19, 5  ;;  %v2348_v43 = vshrl.u32 %v7552_v61, 16 }
  0x69   : > { %v5321_v3 = vcombine.low %v421_v54, %v431_v62  ;;  %v2323_v16 = vsel %vm7341_vm2, %v2318_v4, %v2322_v45  ;;  %v440_v30 = vrot.slane %v439_v11, 4  ;;  %v450_v45 = vrot.slane %v449_v31, 4 }
  0x6a   : > { %v5561_v27 = vcombine.low %v2323_v16, %v2333_v17  ;;  %v2346_v41 = vrot.slane %v2344_v22, 5  ;;  %v457_v50 = vshrl.u32 %v7565_v26, 16  ;;  %v2341_v53 = vor.u32 %v2340_v40, %v2337_v39  ;;  %v7595_v22 = vld [vmem:[%s7277_s6 + $0x70] sm:$0xf] }
  0x6b   : > { %6137 = vmatprep.mubr.bf16.mxu1 %v5321_v3  ;;  %v445_v32 = vsel %vm7341_vm2, %v440_v30, %v444_v10  ;;  %v2350_v54 = vrot.slane %v2348_v43, 4  ;;  %v460_v55 = vshll.u32 %v7565_v26, 16  ;;  %v466_v56 = vshll.u32 %v7568_v36, 16  ;;  %v6997_v10 = vld [vmem:[%s7277_s6 + $0xb4] sm:$0xff]  }
  0x6c   : > { %6329 = vmatprep.mubr.bf16.mxu0 %v5561_v27  ;;  %v455_v49 = vsel %vm7341_vm2, %v450_v45, %v454_v35  ;;  %v2356_v57 = vrot.slane %v2354_v48, 5  ;;  %v459_v58 = vrot.slane %v457_v50, 4  ;;  %v470_v59 = vshrl.u32 %v7568_v36, 16  ;;  %v7606_v48 = vld [vmem:[%s7277_s6 + $0x78] sm:$0xf] }
  0x6d   : > { %v5322_v60 = vcombine.low %v445_v32, %v455_v49  ;;  %v2342_v62 = vrot.slane %v2341_v53, 4  ;;  %v2351_v0 = vor.u32 %v2350_v54, %v2346_v41  ;;  %v462_v2 = vrot.slane %v460_v55, 5  ;;  %v7617_v55 = vld [vmem:[%s7277_s6 + $0x7c] sm:$0xf] }
  0x6e   : > { %v468_v3 = vrot.slane %v466_v56, 5  ;;  %v472_v4 = vrot.slane %v470_v59, 4  ;;  %v476_v8 = vshll.u32 %v253_v44, 16  ;;  %v5595_v11 = vrot.slane %v5579_v51, 9  ;;  %v255_v59 = vld [vmem:[%s7277_s6 + $0x80] sm:$0x1] }
  0x6f   : > { %6138 = vmatmul.mubr.bf16.gmra.mrb[12].mxu1 %v5322_v60  ;;  %v2347_v12 = vsel %vm7341_vm2, %v2342_v62, %v2346_v41  ;;  %v2352_v13 = vrot.slane %v2351_v0, 4  ;;  %v463_v14 = vor.u32 %v462_v2, %v459_v58  ;;  %v2938_v16 = vrot.slane %v7322_v24, 5  ;;  %v254_v41 = vld [vmem:[%s7277_s6 + $0x74] sm:$0x1]  ;;  %v5580_v24 = vld [vmem:[%s7277_s6 + $0x18] sm:$0xe] }
  0x70   : > { %v473_v17 = vor.u32 %v472_v4, %v468_v3  ;;  %v478_v19 = vrot.slane %v476_v8, 5  ;;  %v481_v27 = vshrl.u32 %v7583_v6, 16  ;;  %v484_v30 = vshll.u32 %v7583_v6, 16 }
  0x71   : > { %v2357_v31 = vsel %vm7341_vm2, %v2352_v13, %v2356_v57  ;;  %v464_v35 = vrot.slane %v463_v14, 4  ;;  %v2939_v39 = vsel %vm7587_vm5, %v5595_v11, %v2938_v16  ;;  %v2940_v40 = vrot.slane %v2938_v16, 4  ;;  %v5581_v14 = vld [vmem:[%s7277_s6 + $0x24] sm:$0xe] }
  0x72   : > { %v5562_v43 = vcombine.low %v2347_v12, %v2357_v31  ;;  %v474_v44 = vrot.slane %v473_v17, 4  ;;  %v483_v32 = vrot.slane %v481_v27, 4  ;;  %v486_v45 = vrot.slane %v484_v30, 5  ;;  %v7639_v17 = vld [vmem:[%s7277_s6 + $0x84] sm:$0xf]  ;;  %v6910_v30 = vld [vmem:[%s9163_s1 + $0x188] sm:$0xff]  }
  0x73   : > { %v469_v50 = vsel %vm7341_vm2, %v464_v35, %v468_v3  ;;  %v2942_v51 = vsel %vm7587_vm5, %v2940_v40, %v2941_v42  ;;  %v490_v53 = vshll.u32 %v7595_v22, 16  ;;  %v494_v54 = vshrl.u32 %v7595_v22, 16 }
  0x74   : > { %6330 = vmatmul.mubr.bf16.gmra.mrb[12].mxu0 %v5562_v43  ;;  %v479_v56 = vsel %vm7341_vm2, %v474_v44, %v478_v19  ;;  %v5627_v49 = vcombine.low %v2939_v39, %v2942_v51  ;;  %v487_v57 = vor.u32 %v486_v45, %v483_v32  ;;  %v500_v58 = vshll.u32 %v254_v41, 16  ;;  %v7647_v41 = vld [vmem:[%s7277_s6 + $0x88] sm:$0xf]  ;;  %v256_v32 = vld [vmem:[%s7277_s6 + $0x8c] sm:$0x1] }
  0x75   : > { %v5323_v60 = vcombine.low %v469_v50, %v479_v56  ;;  %v492_v25 = vrot.slane %v490_v53, 5  ;;  %v496_v62 = vrot.slane %v494_v54, 4  ;;  %v5596_v0 = vrot.slane %v5580_v24, 9 }
  0x76   : > { %6365 = vmatprep.mubr.bf16.mxu0 %v5627_v49  ;;  %v488_v42 = vrot.slane %v487_v57, 4  ;;  %v502_v2 = vrot.slane %v500_v58, 5  ;;  %v2949_v3 = vsel %vm7587_vm5, %v7390_v37, %v2948_v33  ;;  %v505_v4 = vshrl.u32 %v7606_v48, 16 }
  0x77   : > { %6141 = vmatprep.mubr.bf16.mxu1 %v5323_v60  ;;  %v497_v8 = vor.u32 %v496_v62, %v492_v25  ;;  %v2946_v11 = vsel %vm7587_vm5, %v5596_v0, %v2945_v28  ;;  %v508_v12 = vshll.u32 %v7606_v48, 16  ;;  %v514_v13 = vshll.u32 %v7617_v55, 16 }
  0x78   : > { %v493_v9 = vsel %vm7341_vm2, %v488_v42, %v492_v25  ;;  %v5628_v16 = vcombine.low %v2946_v11, %v2949_v3  ;;  %v507_v33 = vrot.slane %v505_v4, 4  ;;  %v518_v37 = vshrl.u32 %v7617_v55, 16  ;;  %v7668_v3 = vld [vmem:[%s7277_s6 + $0x90] sm:$0xf]  ;;  %v7671_v4 = vld [vmem:[%s7277_s6 + $0x94] sm:$0xf] }
  0x79   : > { %v498_v63 = vrot.slane %v497_v8, 4  ;;  %v510_v19 = vrot.slane %v508_v12, 5  ;;  %v516_v27 = vrot.slane %v514_v13, 5  ;;  %v524_v28 = vshll.u32 %v255_v59, 16 }
  0x7a   : > { %v520_v31 = vrot.slane %v518_v37, 4  ;;  %v5597_v35 = vrot.slane %v5581_v14, 9  ;;  %v2952_v39 = vrot.slane %v7394_v46, 5  ;;  %v2955_v40 = vrot.slane %v7400_v52, 5  ;;  %v5582_v46 = vld [vmem:[%s7277_s6 + $0x30] sm:$0xe] }
  0x7b   : > { %v503_v24 = vsel %vm7341_vm2, %v498_v63, %v502_v2  ;;  %v511_v43 = vor.u32 %v510_v19, %v507_v33  ;;  %v526_v44 = vrot.slane %v524_v28, 5  ;;  %v529_v45 = vshrl.u32 %v7639_v17, 16  ;;  %v257_v63 = vld [vmem:[%s7277_s6 + $0x98] sm:$0x1] }
  0x7c   : > { %v5324_v50 = vcombine.low %v493_v9, %v503_v24  ;;  %6366 = vmatmul.mubr.bf16.vlgmr.msra.gmra.mrb[0].mxu0 %v5628_v16  ;;  %v521_v51 = vor.u32 %v520_v31, %v516_v27  ;;  %v2953_v53 = vsel %vm7587_vm5, %v5597_v35, %v2952_v39  ;;  %v2954_v54 = vrot.slane %v2952_v39, 4  ;;  %v6914_v31 = vld [vmem:[%s9163_s1 + $0x198] sm:$0xff]  }
  0x7d   : > { %6398 = vmatpush3.bf16.msra.mxu0 %v7530_v7  ;;  %v512_v52 = vrot.slane %v511_v43, 4  ;;  %v531_v56 = vrot.slane %v529_v45, 4  ;;  %v532_v49 = vshll.u32 %v7639_v17, 16  ;;  %v538_v57 = vshll.u32 %v7647_v41, 16  ;;  %v6912_v7 = vld [vmem:[%s9163_s1 + $0x190] sm:$0xff]  }
  0x7e   : > { %6142 = vmatmul.mubr.bf16.gmra.mrb[16].mxu1 %v5324_v50  ;;  %v522_v58 = vrot.slane %v521_v51, 4  ;;  %v2956_v59 = vsel %vm7587_vm5, %v2954_v54, %v2955_v40  ;;  %v542_v60 = vshrl.u32 %v7647_v41, 16  ;;  %v548_v25 = vshll.u32 %v256_v32, 16  ;;  %6399 = vmatprep.subr.bf16.mxu0 %v6910_v30  ;;  %v5583_v39 = vld [vmem:[%s7277_s6 + $0x3c] sm:$0xe] }
  0x7f   : > { %v517_v62 = vsel %vm7341_vm2, %v512_v52, %v516_v27  ;;  %v5629_v0 = vcombine.low %v2953_v53, %v2956_v59  ;;  %v534_v42 = vrot.slane %v532_v49, 5  ;;  %v540_v2 = vrot.slane %v538_v57, 5  ;;  %v7689_v32 = vld [vmem:[%s7277_s6 + $0x9c] sm:$0xf]  ;;  %v7698_v49 = vld [vmem:[%s7277_s6 + $0xa0] sm:$0xf] }
  0x80   : > { %v527_v8 = vsel %vm7341_vm2, %v522_v58, %v526_v44  ;;  %v544_v11 = vrot.slane %v542_v60, 4  ;;  %v550_v12 = vrot.slane %v548_v25, 5  ;;  %v5598_v13 = vrot.slane %v5582_v46, 9  ;;  %v6918_v57 = vld [vmem:[%s9163_s1 + $0x1a0] sm:$0xff]  }
  0x81   : > { %v5325_v14 = vcombine.low %v517_v62, %v527_v8  ;;  %6369 = vmatprep.mubr.bf16.mxu0 %v5629_v0  ;;  %v535_v9 = vor.u32 %v534_v42, %v531_v56  ;;  %v2959_v16 = vrot.slane %v7425_v34, 5  ;;  %v2962_v33 = vrot.slane %v7436_v47, 5  ;;  %6400 = vmatpush3.bf16.msra.mxu0 %v6910_v30  ;;  %v258_v62 = vld [vmem:[%s7277_s6 + $0xa4] sm:$0x1] }
  0x82   : > { %v545_v37 = vor.u32 %v544_v11, %v540_v2  ;;  %v553_v19 = vshrl.u32 %v7668_v3, 16  ;;  %v556_v27 = vshll.u32 %v7668_v3, 16  ;;  %v562_v28 = vshll.u32 %v7671_v4, 16  ;;  %6401 = vmatprep.subr.bf16.mxu0 %v6912_v7 }
  0x83   : > { %6145 = vmatprep.mubr.bf16.mxu1 %v5325_v14  ;;  %v536_v35 = vrot.slane %v535_v9, 4  ;;  %v2960_v34 = vsel %vm7587_vm5, %v5598_v13, %v2959_v16  ;;  %v2961_v47 = vrot.slane %v2959_v16, 4  ;;  %v566_v30 = vshrl.u32 %v7671_v4, 16  ;;  %v5584_v16 = vld [vmem:[%s7277_s6 + $0x48] sm:$0xe] }
  0x84   : > { %v546_v40 = vrot.slane %v545_v37, 4  ;;  %v555_v24 = vrot.slane %v553_v19, 4  ;;  %v558_v43 = vrot.slane %v556_v27, 5  ;;  %v564_v44 = vrot.slane %v562_v28, 5  ;;  %v7723_v28 = vld [vmem:[%s7277_s6 + $0xa8] sm:$0xf] }
  0x85   : > { %v541_v45 = vsel %vm7341_vm2, %v536_v35, %v540_v2  ;;  %v2963_v50 = vsel %vm7587_vm5, %v2961_v47, %v2962_v33  ;;  %v568_v51 = vrot.slane %v566_v30, 4  ;;  %v572_v53 = vshll.u32 %v257_v63, 16  ;;  %6402 = vmatpush3.bf16.msra.mxu0 %v6912_v7  ;;  %v6922_v33 = vld [vmem:[%s9163_s1 + $0x1a8] sm:$0xff]  }
  0x86   : > { %v551_v54 = vsel %vm7341_vm2, %v546_v40, %v550_v12  ;;  %v5630_v46 = vcombine.low %v2960_v34, %v2963_v50  ;;  %v559_v52 = vor.u32 %v558_v43, %v555_v24  ;;  %v5599_v56 = vrot.slane %v5583_v39, 9  ;;  %6403 = vmatprep.subr.bf16.mxu0 %v6914_v31  ;;  %v7726_v30 = vld [vmem:[%s7277_s6 + $0xac] sm:$0xf] }
  0x87   : > { %v5326_v58 = vcombine.low %v541_v45, %v551_v54  ;;  %v569_v59 = vor.u32 %v568_v51, %v564_v44  ;;  %v574_v60 = vrot.slane %v572_v53, 5  ;;  %v2966_v25 = vrot.slane %v7459_v20, 5  ;;  %v5585_v54 = vld [vmem:[%s7277_s6 + $0x54] sm:$0xe] }
  0x88   : > { %6370 = vmatmul.mubr.bf16.gmra.mrb[4].mxu0 %v5630_v46  ;;  %v560_v7 = vrot.slane %v559_v52, 4  ;;  %v2969_v0 = vrot.slane %v7467_v29, 5  ;;  %v577_v42 = vshrl.u32 %v7689_v32, 16  ;;  %v580_v2 = vshll.u32 %v7689_v32, 16  ;;  %v6926_v46 = vld [vmem:[%s9163_s1 + $0x1b0] sm:$0xff]  }
  0x89   : > { %6146 = vmatmul.mubr.bf16.gmra.mrb[20].mxu1 %v5326_v58  ;;  %v570_v8 = vrot.slane %v569_v59, 4  ;;  %v2967_v11 = vsel %vm7587_vm5, %v5599_v56, %v2966_v25  ;;  %v2968_v12 = vrot.slane %v2966_v25, 4  ;;  %v586_v13 = vshll.u32 %v7698_v49, 16  ;;  %6404 = vmatpush3.bf16.msra.mxu0 %v6914_v31 }
  0x8a   : > { %v565_v20 = vsel %vm7341_vm2, %v560_v7, %v564_v44  ;;  %v579_v14 = vrot.slane %v577_v42, 4  ;;  %v582_v29 = vrot.slane %v580_v2, 5  ;;  %v590_v9 = vshrl.u32 %v7698_v49, 16  ;;  %6405 = vmatprep.subr.bf16.mxu0 %v6918_v57  ;;  %v259_v44 = vld [vmem:[%s7277_s6 + $0xb0] sm:$0x1] }
  0x8b   : > { %v575_v37 = vsel %vm7341_vm2, %v570_v8, %v574_v60  ;;  %v2970_v63 = vsel %vm7587_vm5, %v2968_v12, %v2969_v0  ;;  %v588_v19 = vrot.slane %v586_v13, 5  ;;  %v596_v27 = vshll.u32 %v258_v62, 16  ;;  %v7746_v42 = vld [vmem:[%s7277_s6 + $0xb4] sm:$0xf]  ;;  %v7751_v13 = vld [vmem:[%s7277_s6 + $0xb8] sm:$0xf] }
  0x8c   : > { %v5327_v31 = vcombine.low %v565_v20, %v575_v37  ;;  %v5631_v35 = vcombine.low %v2967_v11, %v2970_v63  ;;  %v583_v34 = vor.u32 %v582_v29, %v579_v14  ;;  %v592_v47 = vrot.slane %v590_v9, 4  ;;  %v260_v20 = vld [vmem:[%s7277_s6 + $0xbc] sm:$0x1] }
  0x8d   : > { %v598_v39 = vrot.slane %v596_v27, 5  ;;  %v5600_v40 = vrot.slane %v5584_v16, 9  ;;  %v2973_v24 = vrot.slane %v7494_v15, 5  ;;  %v2976_v43 = vrot.slane %v7500_v23, 5  ;;  %6406 = vmatpush3.bf16.msra.mxu0 %v6918_v57  ;;  %v6930_v14 = vld [vmem:[%s9163_s1 + $0x1b8] sm:$0xff]  }
  0x8e   : > { %6149 = vmatprep.mubr.bf16.mxu1 %v5327_v31  ;;  %6373 = vmatprep.mubr.bf16.mxu0 %v5631_v35  ;;  %v584_v45 = vrot.slane %v583_v34, 4  ;;  %v593_v50 = vor.u32 %v592_v47, %v588_v19  ;;  %v601_v51 = vshrl.u32 %v7723_v28, 16  ;;  %v604_v53 = vshll.u32 %v7723_v28, 16  ;;  %v5586_v31 = vld [vmem:[%s7277_s6 + $0x60] sm:$0xe] }
  0x8f   : > { %v2974_v15 = vsel %vm7587_vm5, %v5600_v40, %v2973_v24  ;;  %v2975_v23 = vrot.slane %v2973_v24, 4  ;;  %v610_v52 = vshll.u32 %v7726_v30, 16  ;;  %v614_v56 = vshrl.u32 %v7726_v30, 16  ;;  %6407 = vmatprep.subr.bf16.mxu0 %v6922_v33  ;;  %v5516_v40 = vld [vmem:[%s7277_s6 + $0x70] sm:$0xf] }
  0x90   : > { %v589_v57 = vsel %vm7341_vm2, %v584_v45, %v588_v19  ;;  %v594_v58 = vrot.slane %v593_v50, 4  ;;  %v603_v59 = vrot.slane %v601_v51, 4  ;;  %v606_v60 = vrot.slane %v604_v53, 5  ;;  %v7773_v45 = vld [vmem:[%s9163_s1 + $0x1c0] sm:$0xff]  }
  0x91   : > { %v2977_v25 = vsel %vm7587_vm5, %v2975_v23, %v2976_v43  ;;  %v612_v62 = vrot.slane %v610_v52, 5  ;;  %v616_v7 = vrot.slane %v614_v56, 4  ;;  %v620_v0 = vshll.u32 %v259_v44, 16  ;;  %6408 = vmatpush3.bf16.msra.mxu0 %v6922_v33  ;;  %v5587_v44 = vld [vmem:[%s7277_s6 + $0x6c] sm:$0xe] }
  0x92   : > { %v599_v2 = vsel %vm7341_vm2, %v594_v58, %v598_v39  ;;  %v5632_v8 = vcombine.low %v2974_v15, %v2977_v25  ;;  %v607_v11 = vor.u32 %v606_v60, %v603_v59  ;;  %v5601_v12 = vrot.slane %v5585_v54, 9  ;;  %6409 = vmatprep.subr.bf16.mxu0 %v6926_v46  ;;  %v5517_v56 = vld [vmem:[%s7277_s6 + $0x74] sm:$0x1]  ;;  %v5588_v25 = vld [vmem:[%s7277_s6 + $0x78] sm:$0xe] }
  0x93   : > { %v5328_v29 = vcombine.low %v589_v57, %v599_v2  ;;  %v617_v9 = vor.u32 %v616_v7, %v612_v62  ;;  %v622_v16 = vrot.slane %v620_v0, 5  ;;  %v2980_v33 = vrot.slane %v7525_v1, 5 }
  0x94   : > { %6374 = vmatmul.mubr.bf16.gmra.mrb[8].mxu0 %v5632_v8  ;;  %v608_v37 = vrot.slane %v607_v11, 4  ;;  %v2983_v63 = vrot.slane %v7537_v21, 5  ;;  %v625_v19 = vshrl.u32 %v7746_v42, 16  ;;  %v628_v27 = vshll.u32 %v7746_v42, 16 }
  0x95   : > { %6150 = vmatmul.mubr.bf16.gmra.mrb[24].mxu1 %v5328_v29  ;;  %v618_v35 = vrot.slane %v617_v9, 4  ;;  %v2981_v34 = vsel %vm7587_vm5, %v5601_v12, %v2980_v33  ;;  %v2982_v47 = vrot.slane %v2980_v33, 4  ;;  %v634_v39 = vshll.u32 %v7751_v13, 16  ;;  %6410 = vmatpush3.bf16.msra.mxu0 %v6926_v46  ;;  %v7786_v12 = vld [vmem:[%s7277_s6 + $0x7c] sm:$0xf] }
  0x96   : > { %v613_v1 = vsel %vm7341_vm2, %v608_v37, %v612_v62  ;;  %v627_v21 = vrot.slane %v625_v19, 4  ;;  %v630_v24 = vrot.slane %v628_v27, 5  ;;  %v638_v43 = vshrl.u32 %v7751_v13, 16  ;;  %6411 = vmatprep.subr.bf16.mxu0 %v6930_v14  ;;  %v6999_v37 = vld [vmem:[%s7277_s6] sm:$0xf] }
  0x97   : > { %v623_v50 = vsel %vm7341_vm2, %v618_v35, %v622_v16  ;;  %v2984_v51 = vsel %vm7587_vm5, %v2982_v47, %v2983_v63  ;;  %v636_v53 = vrot.slane %v634_v39, 5  ;;  %v644_v54 = vshll.u32 %v260_v20, 16  ;;  %v5522_v16 = vld [vmem:[%s7277_s6 + $0x88] sm:$0xf]  ;;  %v7801_v63 = vld [vmem:[%s7277_s6 + $0x4] sm:$0xf] }
  0x98   : > { %v5329_v46 = vcombine.low %v613_v1, %v623_v50  ;;  %v5633_v15 = vcombine.low %v2981_v34, %v2984_v51  ;;  %v631_v23 = vor.u32 %v630_v24, %v627_v21  ;;  %v640_v52 = vrot.slane %v638_v43, 4  ;;  %v5523_v27 = vld [vmem:[%s7277_s6 + $0x8c] sm:$0x1]  ;;  %v5526_v24 = vld [vmem:[%s7277_s6 + $0x98] sm:$0x1] }
  0x99   : > { %v646_v57 = vrot.slane %v644_v54, 5  ;;  %v5602_v58 = vrot.slane %v5586_v31, 9  ;;  %v2987_v59 = vrot.slane %v7552_v61, 5  ;;  %v2990_v60 = vrot.slane %v7561_v18, 5  ;;  %6412 = vmatpush3.bf16.msra.mxu0 %v6930_v14  ;;  %v7789_v18 = vld [vmem:[%s7277_s6 + $0x80] sm:$0x1] }
  0x9a   : > { %6153 = vmatprep.mubr.bf16.mxu1 %v5329_v46  ;;  %6377 = vmatprep.mubr.bf16.mxu0 %v5633_v15  ;;  %v632_v62 = vrot.slane %v631_v23, 4  ;;  %v641_v7 = vor.u32 %v640_v52, %v636_v53  ;;  %v5603_v0 = vrot.slane %v5587_v44, 9  ;;  %v2994_v2 = vrot.slane %v5516_v40, 5  ;;  %v5589_v31 = vld [vmem:[%s7277_s6 + $0x84] sm:$0xe] }
  0x9b   : > { %v2988_v8 = vsel %vm7587_vm5, %v5602_v58, %v2987_v59  ;;  %v2989_v11 = vrot.slane %v2987_v59, 4  ;;  %v2997_v61 = vrot.slane %v5517_v56, 5  ;;  %6445 = vmatprep.subr.bf16.mxu0 %v7773_v45  ;;  %v5339_v19 = vcombine.low %v6999_v37, %v7801_v63  ;;  %v5525_v40 = vld [vmem:[%s7277_s6 + $0x94] sm:$0xf]  ;;  %v5590_v43 = vld [vmem:[%s7277_s6 + $0x90] sm:$0xe] }
  0x9c   : > { %v637_v20 = vsel %vm7341_vm2, %v632_v62, %v636_v53  ;;  %v642_v14 = vrot.slane %v641_v7, 4  ;;  %v2995_v29 = vsel %vm7587_vm5, %v5603_v0, %v2994_v2  ;;  %v2996_v9 = vrot.slane %v2994_v2, 4  ;;  %v5591_v51 = vld [vmem:[%s7277_s6 + $0x9c] sm:$0xe]  ;;  %v5528_v15 = vld [vmem:[%s7277_s6 + $0xa0] sm:$0xf] }
  0x9d   : > { %v2991_v33 = vsel %vm7587_vm5, %v2989_v11, %v2990_v60  ;;  %v5604_v39 = vrot.slane %v5588_v25, 9  ;;  %v3001_v44 = vrot.slane %v7786_v12, 5  ;;  %v3004_v50 = vrot.slane %v7789_v18, 5  ;;  %v5529_v23 = vld [vmem:[%s7277_s6 + $0xa4] sm:$0x1] }
  0x9e   : > { %v647_v35 = vsel %vm7341_vm2, %v642_v14, %v646_v57  ;;  %v5634_v34 = vcombine.low %v2988_v8, %v2991_v33  ;;  %v2998_v47 = vsel %vm7587_vm5, %v2996_v9, %v2997_v61  ;;  %v5605_v53 = vrot.slane %v5589_v31, 9  ;;  %v5531_v60 = vld [vmem:[%s7277_s6 + $0xac] sm:$0xf]  ;;  %v7825_v62 = vld [vmem:[%s7277_s6 + $0x10] sm:$0xf] }
  0x9f   : > { %v5330_v1 = vcombine.low %v637_v20, %v647_v35  ;;  %v5635_v21 = vcombine.low %v2995_v29, %v2998_v47  ;;  %v3008_v54 = vrot.slane %v5522_v16, 5  ;;  %v3011_v46 = vrot.slane %v5523_v27, 5  ;;  %v7001_v25 = vld [vmem:[%s7277_s6 + $0xc] sm:$0xf]  ;;  %v7003_v9 = vld [vmem:[%s7277_s6 + $0x18] sm:$0xf] }
  0xa0   : > { %6378 = vmatmul.mubr.bf16.gmra.mrb[12].mxu0 %v5634_v34  ;;  %v3002_v52 = vsel %vm7587_vm5, %v5604_v39, %v3001_v44  ;;  %v3003_v56 = vrot.slane %v3001_v44, 4  ;;  %v3015_v59 = vrot.slane %v5525_v40, 5  ;;  %v5340_v7 = vcombine.low %v7001_v25, %v7825_v62  ;;  %v6921_v20 = vld [vmem:[%s9163_s1 + $0x88] sm:$0xff]   ;;  %v7837_v16 = vld [vmem:[%s7277_s6 + $0x1c] sm:$0xf] }
  0xa1   : > { %6154 = vmatmul.mubr.bf16.gmra.mrb[28].mxu1 %v5330_v1  ;;  %6381 = vmatprep.mubr.bf16.mxu0 %v5635_v21  ;;  %v3009_v57 = vsel %vm7587_vm5, %v5605_v53, %v3008_v54  ;;  %v3010_v58 = vrot.slane %v3008_v54, 4  ;;  %v5606_v2 = vrot.slane %v5590_v43, 9  ;;  %v3018_v8 = vrot.slane %v5526_v24, 5  ;;  %v5532_v31 = vld [vmem:[%s7277_s6 + $0xb0] sm:$0x1] }
  0xa2   : > { %6173 = vmatprep.mubr.bf16.mxu1 %v5339_v19  ;;  %v3005_v0 = vsel %vm7587_vm5, %v3003_v56, %v3004_v50  ;;  %v3017_v14 = vrot.slane %v3015_v59, 4  ;;  %v5607_v29 = vrot.slane %v5591_v51, 9  ;;  %v5341_v33 = vcombine.low %v7003_v9, %v7837_v16  ;;  %v5592_v35 = vld [vmem:[%s7277_s6 + $0xa8] sm:$0xe]  ;;  %v5534_v34 = vld [vmem:[%s7277_s6 + $0xb8] sm:$0xf] }
  0xa3   : > { %v5636_v11 = vcombine.low %v3002_v52, %v3005_v0  ;;  %v3012_v61 = vsel %vm7587_vm5, %v3010_v58, %v3011_v46  ;;  %v3022_v19 = vrot.slane %v5528_v15, 5  ;;  %v3025_v27 = vrot.slane %v5529_v23, 5  ;;  %v5535_v21 = vld [vmem:[%s7277_s6 + $0xbc] sm:$0x1]  ;;  %v5593_v24 = vld [vmem:[%s7277_s6 + $0xb4] sm:$0xe] }
  0xa4   : > { %v5637_v37 = vcombine.low %v3009_v57, %v3012_v61  ;;  %v3029_v39 = vrot.slane %v5531_v60, 5  ;;  %v3016_v40 = vsel %vm7587_vm5, %v5606_v2, %v3015_v59  ;;  %v3019_v1 = vsel %vm7587_vm5, %v3017_v14, %v3018_v8  ;;  %v6925_v51 = vld [vmem:[%s9163_s1 + $0x90] sm:$0xff]   ;;  %v5537_v54 = vld [vmem:[%s7277_s6 + $0xc4] sm:$0xf]  ;;  %v7860_v52 = vld [vmem:[%s7277_s6 + $0x28] sm:$0xf] }
  0xa5   : > { %v3024_v47 = vrot.slane %v3022_v19, 4  ;;  %v3023_v43 = vsel %vm7587_vm5, %v5607_v29, %v3022_v19  ;;  %v3036_v50 = vrot.slane %v5534_v34, 5  ;;  %v5608_v53 = vrot.slane %v5592_v35, 9  ;;  %v7005_v23 = vld [vmem:[%s7277_s6 + $0x24] sm:$0xf]  ;;  %v6929_v2 = vld [vmem:[%s9163_s1 + $0x98] sm:$0xff]  }
  0xa6   : > { %v5638_v46 = vcombine.low %v3016_v40, %v3019_v1  ;;  %v3031_v15 = vrot.slane %v3029_v39, 4  ;;  %v5342_v56 = vcombine.low %v7005_v23, %v7860_v52  ;;  %v7007_v58 = vld [vmem:[%s7277_s6 + $0x30] sm:$0xf]  ;;  %v7865_v59 = vld [vmem:[%s7277_s6 + $0x34] sm:$0xf]  ;;  %v5609_v25 = vrot.slane %v5593_v24, 9 }
  0xa7   : > { %v3026_v44 = vsel %vm7587_vm5, %v3024_v47, %v3025_v27  ;;  %v5343_v60 = vcombine.low %v7007_v58, %v7865_v59  ;;  %v3039_v0 = vrot.slane %v5535_v21, 5  ;;  %v5594_v8 = vld [vmem:[%s7277_s6 + $0xc0] sm:$0xe]  ;;  %v3030_v61 = vsel %vm7587_vm5, %v5608_v53, %v3029_v39  ;;  %v5538_v9 = vld [vmem:[%s7277_s6 + $0xc8] sm:$0x1]  ;;  %v6932_v23 = vld [vmem:[%s7277_s6 + $0x18] sm:$0xff]  }
  0xa8   : > { %6382 = vmatmul.mubr.bf16.gmra.mrb[16].mxu0 %v5636_v11  ;;  %v5639_v57 = vcombine.low %v3023_v43, %v3026_v44  ;;  %v3043_v11 = vrot.slane %v5537_v54, 5  ;;  %v3037_v14 = vsel %vm7587_vm5, %v5609_v25, %v3036_v50  ;;  %v5610_v19 = vrot.slane %v5594_v8, 9  ;;  %v7009_v27 = vld [vmem:[%s7277_s6 + $0x3c] sm:$0xf]  ;;  %v7011_v40 = vld [vmem:[%s7277_s6 + $0x48] sm:$0xf] }
  0xa9   : > { %6174 = vmatmul.mubr.bf16.vlgmr.msra.gmra.mrb[0].mxu1 %v5340_v7  ;;  %6385 = vmatprep.mubr.bf16.mxu0 %v5637_v37  ;;  %v3038_v7 = vrot.slane %v3036_v50, 4  ;;  %v3046_v39 = vrot.slane %v5538_v9, 5  ;;  %v7891_v1 = vld [vmem:[%s7277_s6 + $0x4c] sm:$0xf]  ;;  %v6946_v50 = vld [vmem:[%s9163_s1 + $0xb0] sm:$0xff]   ;;  %v2396_v53 = vshrl.u32 %v7786_v12, 16 }
  0xaa   : > { %6206 = vmatpush3.bf16.msra.mxu1 %v7511_v5  ;;  %6177 = vmatprep.mubr.bf16.mxu1 %v5341_v33  ;;  %v3032_v5 = vrot.slane %v5532_v31, 5  ;;  %v6934_v33 = vld [vmem:[%s9163_s1 + $0xa0] sm:$0xff]   ;;  %v3045_v47 = vrot.slane %v3043_v11, 4  ;;  %v5345_v21 = vcombine.low %v7011_v40, %v7891_v1  ;;  %v6940_v24 = vld [vmem:[%s9163_s1 + $0xa8] sm:$0xff]   ;;  %v3044_v43 = vsel %vm7587_vm5, %v5610_v19, %v3043_v11  ;;  %v6938_v19 = vld [vmem:[%s7277_s6 + $0x30] sm:$0xff]  }
  0xab   : > { %6207 = vmatprep.subr.bf16.mxu1 %v6921_v20  ;;  %v3040_v29 = vsel %vm7587_vm5, %v3038_v7, %v3039_v0  ;;  %v7886_v31 = vld [vmem:[%s7277_s6 + $0x40] sm:$0xf]  ;;  %v7919_v58 = vrot.slane %v2396_v53, 4  ;;  %v6935_v7 = vld [vmem:[%s7277_s6 + $0x24] sm:$0xff]   ;;  %v1303_v8 = vrot.slane %v7825_v62, 5  ;;  %v2402_v9 = vshll.u32 %v7789_v18, 16 }
  0xac   : > { %v5344_v35 = vcombine.low %v7009_v27, %v7886_v31  ;;  %v5641_v34 = vcombine.low %v3037_v14, %v3040_v29  ;;  %v3047_v44 = vsel %vm7587_vm5, %v3045_v47, %v3046_v39  ;;  %v1243_v0 = vld [vmem:[%s7277_s6] sm:$0xe]  ;;  %v1244_v11 = vld [vmem:[%s7277_s6 + $0xc] sm:$0xe]  ;;  %v1310_v14 = vrot.slane %v7837_v16, 5 }
  0xad   : > { %v5642_v54 = vcombine.low %v3044_v43, %v3047_v44  ;;  %v1246_v62 = vld [vmem:[%s7277_s6 + $0x24] sm:$0xe]  ;;  %v5350_v16 = vcombine.low %v7639_v17, %v7647_v41  ;;  %v5351_v27 = vcombine.low %v7668_v3, %v7671_v4  ;;  %v5363_v18 = vrot.slane %v1243_v0, 9  ;;  %v7017_v39 = vld [vmem:[%s7277_s6 + $0x20] sm:$0x1]  ;;  %v6947_v3 = vld [vmem:[%s7277_s6 + $0x54] sm:$0xff]  }
  0xae   : > { %6208 = vmatpush3.bf16.msra.mxu1 %v6921_v20  ;;  %v3033_v20 = vsel %vm7587_vm5, %v3031_v15, %v3032_v5  ;;  %v7908_v15 = vld [vmem:[%s7277_s6 + $0x58] sm:$0xf]  ;;  %v1312_v47 = vrot.slane %v1310_v14, 4  ;;  %v1313_v40 = vrot.slane %v7017_v39, 5  ;;  %v7018_v44 = vld [vmem:[%s7277_s6 + $0x2c] sm:$0x1] }
  0xaf   : > { %6209 = vmatprep.subr.bf16.mxu1 %v6925_v51  ;;  %v5640_v37 = vcombine.low %v3030_v61, %v3033_v20  ;;  %v7934_v61 = vld [vmem:[%s9163_s1 + $0xc0] sm:$0xff]   ;;  %v1245_v20 = vld [vmem:[%s7277_s6 + $0x18] sm:$0xe]  ;;  %v7021_v39 = vld [vmem:[%s7277_s6 + $0x50] sm:$0x1]  ;;  %v1345_v17 = vrot.slane %v7908_v15, 5 }
  0xb0   : > { %6386 = vmatmul.mubr.bf16.gmra.mrb[20].mxu0 %v5638_v46  ;;  %v7013_v46 = vld [vmem:[%s7277_s6 + $0x54] sm:$0xf]  ;;  %v8057_v41 = vld [vmem:[%s7277_s6 + $0x64] sm:$0xf] }
  0xb1   : > { %6178 = vmatmul.mubr.bf16.gmra.mrb[4].mxu1 %v5342_v56  ;;  %6389 = vmatprep.mubr.bf16.mxu0 %v5639_v57  ;;  %v5346_v5 = vcombine.low %v7013_v46, %v7908_v15  ;;  %v5347_v56 = vcombine.low %v7565_v26, %v7568_v36  ;;  %v6952_v57 = vld [vmem:[%s9163_s1 + $0xb8] sm:$0xff]   ;;  %v7016_v26 = vld [vmem:[%s7277_s6 + $0x14] sm:$0x1]  ;;  %v6950_v4 = vld [vmem:[%s7277_s6 + $0x60] sm:$0xff]  }
  0xb2   : > { %6181 = vmatprep.mubr.bf16.mxu1 %v5343_v60  ;;  %6210 = vmatpush3.bf16.msra.mxu1 %v6925_v51  ;;  %v2392_v51 = vshll.u32 %v7786_v12, 16  ;;  %v7922_v60 = vld [vmem:[%s7277_s6 + $0x8] sm:$0x1]  ;;  %v1306_v36 = vrot.slane %v7016_v26, 5 }
  0xb3   : > { %6211 = vmatprep.subr.bf16.mxu1 %v6929_v2  ;;  %v1299_v25 = vrot.slane %v7922_v60, 5 }
  0xb4   : > { %v7917_v12 = vrot.slane %v2392_v51, 5 }
  0xb6   : > { %6212 = vmatpush3.bf16.msra.mxu1 %v6929_v2  ;;  %v1296_v2 = vrot.slane %v7801_v63, 5  ;;  %v5348_v63 = vcombine.low %v7583_v6, %v7595_v22  ;;  %v5364_v22 = vrot.slane %v1244_v11, 9  ;;  %v5723_v11 = vld [vmem:[%s7277_s6 + $0x18] sm:$0xf] }
  0xb7   : > { %6213 = vmatprep.subr.bf16.mxu1 %v6934_v33 }
  0xb8   : > { %6390 = vmatmul.mubr.bf16.gmra.mrb[24].mxu0 %v5640_v37  ;;  %v5349_v37 = vcombine.low %v7606_v48, %v7617_v55  ;;  %v1298_v6 = vrot.slane %v1296_v2, 4  ;;  %v6942_v48 = vld [vmem:[%s9163_s1 + $0x1c8] sm:$0xff]   ;;  %v5365_v55 = vrot.slane %v1245_v20, 9  ;;  %v7977_v60 = vsel %vm7587_vm5, %v5363_v18, %v1296_v2  ;;  %v5724_v20 = vld [vmem:[%s7277_s6 + $0x1c] sm:$0xf] }
  0xb9   : > { %6182 = vmatmul.mubr.bf16.gmra.mrb[8].mxu1 %v5344_v35  ;;  %6393 = vmatprep.mubr.bf16.mxu0 %v5641_v34  ;;  %v1324_v35 = vrot.slane %v7865_v59, 5  ;;  %v1305_v34 = vrot.slane %v1303_v8, 4  ;;  %v5366_v59 = vrot.slane %v1246_v62, 9  ;;  %v1338_v2 = vrot.slane %v7891_v1, 5  ;;  %v6944_v1 = vld [vmem:[%s7277_s6 + $0x48] sm:$0xff]  }
  0xba   : > { %6185 = vmatprep.mubr.bf16.mxu1 %v5345_v21  ;;  %6214 = vmatpush3.bf16.msra.mxu1 %v6934_v33  ;;  %v1317_v33 = vrot.slane %v7860_v52, 5  ;;  %v1247_v52 = vld [vmem:[%s7277_s6 + $0x30] sm:$0xe]  ;;  %v5352_v21 = vcombine.low %v7689_v32, %v7698_v49  ;;  %v7985_v26 = vsel %vm7587_vm5, %v1298_v6, %v1299_v25  ;;  %v7993_v0 = vsel %vm7587_vm5, %v5365_v55, %v1310_v14  ;;  %v1249_v14 = vld [vmem:[%s7277_s6 + $0x48] sm:$0xe] }
  0xbb   : > { %6215 = vmatprep.subr.bf16.mxu1 %v6940_v24  ;;  %v5367_v51 = vrot.slane %v1247_v52, 9  ;;  %v1326_v53 = vrot.slane %v1324_v35, 4  ;;  %v3809_v6 = vshrl.u32 %v5723_v11, 16  ;;  %v3822_v52 = vshrl.u32 %v5724_v20, 16  ;;  %v6953_v49 = vld [vmem:[%s7277_s6 + $0x6c] sm:$0xff]  }
  0xbc   : > { %v1319_v43 = vrot.slane %v1317_v33, 4  ;;  %v8005_v25 = vsel %vm7587_vm5, %v5366_v59, %v1317_v33  ;;  %v7020_v33 = vld [vmem:[%s7277_s6 + $0x44] sm:$0x1]  ;;  %v5369_v55 = vrot.slane %v1249_v14, 9  ;;  %v5727_v14 = vld [vmem:[%s7277_s6 + $0x28] sm:$0xf] }
  0xbd   : > { %v8015_v62 = vsel %vm7587_vm5, %v5367_v51, %v1324_v35  ;;  %v1334_v18 = vrot.slane %v7020_v33, 5  ;;  %v5725_v51 = vld [vmem:[%s7277_s6 + $0x20] sm:$0x1]  ;;  %v1251_v33 = vld [vmem:[%s7277_s6 + $0x60] sm:$0xe] }
  0xbe   : > { %6216 = vmatpush3.bf16.msra.mxu1 %v6940_v24  ;;  %v5353_v24 = vcombine.low %v7723_v28, %v7726_v30 }
  0xbf   : > { %6217 = vmatprep.subr.bf16.mxu1 %v6946_v50 }
  0xc0   : > { %6394 = vmatmul.mubr.bf16.gmra.mrb[28].mxu0 %v5642_v54  ;;  %v7019_v54 = vld [vmem:[%s7277_s6 + $0x38] sm:$0x1] }
  0xc1   : > { %6186 = vmatmul.mubr.bf16.gmra.mrb[12].mxu1 %v5346_v5  ;;  %6413 = vmatprep.mubr.bf16.mxu0 %v6932_v23  ;;  %v1327_v46 = vrot.slane %v7019_v54, 5  ;;  %v1248_v5 = vld [vmem:[%s7277_s6 + $0x3c] sm:$0xe]  ;;  %v1331_v23 = vrot.slane %v7886_v31, 5  ;;  %v7981_v31 = vsel %vm7587_vm5, %v5364_v22, %v1303_v8  ;;  %v3812_v22 = vshll.u32 %v5723_v11, 16  ;;  %v6958_v54 = vld [vmem:[%s9163_s1 + $0x1e0] sm:$0xff]  }
  0xc2   : > { %6189 = vmatprep.mubr.bf16.mxu1 %v5347_v56  ;;  %6218 = vmatpush3.bf16.msra.mxu1 %v6946_v50  ;;  %v1320_v50 = vrot.slane %v7018_v44, 5  ;;  %v7968_v56 = vrot.slane %v2402_v9, 5  ;;  %v6941_v8 = vld [vmem:[%s7277_s6 + $0x3c] sm:$0xff]   ;;  %v8001_v9 = vsel %vm7587_vm5, %v1312_v47, %v1313_v40  ;;  %v1340_v47 = vrot.slane %v1338_v2, 4  ;;  %v5729_v44 = vld [vmem:[%s7277_s6 + $0x30] sm:$0xf] }
  0xc3   : > { %6219 = vmatprep.subr.bf16.mxu1 %v6952_v57  ;;  %v1341_v40 = vrot.slane %v7021_v39, 5  ;;  %v3811_v11 = vrot.slane %v3809_v6, 4 }
  0xc4   : > { %9187 = vst [vmem:[#allocation8_spill] sm:$0xff] %v7968_v56 }
  0xc6   : > { %6220 = vmatpush3.bf16.msra.mxu1 %v6952_v57  ;;  %v6948_v57 = vld [vmem:[%s9163_s1 + $0x1d0] sm:$0xff]  }
  0xc7   : > { %6253 = vmatprep.subr.bf16.mxu1 %v7934_v61 }
  0xc8   : > { %6414 = vmatmul.mubr.bf16.vlgmr.msra.gmra.mrb[0].mxu0 %v6935_v7  ;;  %v7989_v7 = vsel %vm7587_vm5, %v1305_v34, %v1306_v36  ;;  %v8009_v36 = vsel %vm7587_vm5, %v1319_v43, %v1320_v50  ;;  %v3818_v34 = vshll.u32 %v5724_v20, 16  ;;  %v3814_v20 = vrot.slane %v3812_v22, 5  ;;  %v1252_v22 = vld [vmem:[%s7277_s6 + $0x6c] sm:$0xe] }
  0xc9   : > { %6190 = vmatmul.mubr.bf16.gmra.mrb[16].mxu1 %v5348_v63  ;;  %6446 = vmatpush3.bf16.msra.mxu0 %v7773_v45  ;;  %v5368_v63 = vrot.slane %v1248_v5, 9  ;;  %v5372_v59 = vrot.slane %v1252_v22, 9 }
  0xca   : > { %6193 = vmatprep.mubr.bf16.mxu1 %v5349_v37  ;;  %6417 = vmatprep.mubr.bf16.mxu0 %v6938_v19  ;;  %v8019_v37 = vsel %vm7587_vm5, %v1326_v53, %v1327_v46  ;;  %v1333_v19 = vrot.slane %v1331_v23, 4  ;;  %v5726_v53 = vld [vmem:[%s7277_s6 + $0x24] sm:$0xf]  ;;  %v3846_v46 = vshrl.u32 %v5727_v14, 16 }
  0xcb   : > { %6447 = vmatprep.subr.bf16.mxu0 %v6942_v48  ;;  %v8036_v50 = vsel %vm7587_vm5, %v5368_v63, %v1331_v23  ;;  %v8053_v23 = vld [vmem:[%s7277_s6 + $0x54] sm:$0xe]  ;;  %v3824_v63 = vrot.slane %v3822_v52, 4  ;;  %v3833_v39 = vshrl.u32 %v5726_v53, 16  ;;  %v3836_v29 = vshll.u32 %v5726_v53, 16 }
  0xcc   : > { %v8050_v5 = vsel %vm7587_vm5, %v1333_v19, %v1334_v18  ;;  %v3828_v18 = vshll.u32 %v5725_v51, 16  ;;  %v5370_v6 = vrot.slane %v8053_v23, 9  ;;  %v6962_v51 = vld [vmem:[%s9163_s1 + $0x1e8] sm:$0xff]   ;;  %v1347_v53 = vrot.slane %v1345_v17, 4 }
  0xcd   : > { %6448 = vmatpush3.bf16.msra.mxu0 %v6942_v48  ;;  %v6954_v48 = vld [vmem:[%s9163_s1 + $0x1d8] sm:$0xff]   ;;  %v3815_v23 = vor.u32 %v3814_v20, %v3811_v11  ;;  %v3835_v35 = vrot.slane %v3833_v39, 4  ;;  %v3838_v45 = vrot.slane %v3836_v29, 5  ;;  %v7026_v11 = vld [vmem:[%s7277_s6 + $0x74] sm:$0x1]  ;;  %v3848_v29 = vrot.slane %v3846_v46, 4 }
  0xce   : > { %6449 = vmatprep.subr.bf16.mxu0 %v6948_v57  ;;  %v8091_v43 = vrot.slane %v3828_v18, 5  ;;  %v1362_v20 = vrot.slane %v7026_v11, 5  ;;  %v3857_v39 = vshrl.u32 %v5729_v44, 16  ;;  %v8116_v28 = vsel %vm7587_vm5, %v5370_v6, %v1345_v17 }
  0xcf   : > { %v3816_v22 = vrot.slane %v3815_v23, 4 }
  0xd0   : > { %6418 = vmatmul.mubr.bf16.gmra.mrb[4].mxu0 %v6941_v8  ;;  %v8063_v8 = vrot.slane %v3818_v34, 5  ;;  %v7024_v34 = vld [vmem:[%s7277_s6 + $0x70] sm:$0xf] }
  0xd1   : > { %6194 = vmatmul.mubr.bf16.gmra.mrb[20].mxu1 %v5350_v16  ;;  %6421 = vmatprep.mubr.bf16.mxu0 %v6944_v1  ;;  %v1352_v16 = vrot.slane %v8057_v41, 5  ;;  %v7023_v1 = vld [vmem:[%s7277_s6 + $0x5c] sm:$0x1]  ;;  %v1359_v52 = vrot.slane %v7024_v34, 5 }
  0xd2   : > { %6197 = vmatprep.mubr.bf16.mxu1 %v5351_v27  ;;  %6450 = vmatpush3.bf16.msra.mxu0 %v6948_v57  ;;  %v1348_v19 = vrot.slane %v7023_v1, 5  ;;  %v8072_v27 = vsel %vm7587_vm5, %v5369_v55, %v1338_v2  ;;  %v8076_v57 = vsel %vm7587_vm5, %v1340_v47, %v1341_v40  ;;  %v7025_v2 = vld [vmem:[%s7277_s6 + $0x68] sm:$0x1]  ;;  %v3842_v1 = vshll.u32 %v5727_v14, 16  ;;  %v6970_v41 = vld [vmem:[%s9163_s1 + $0x1f8] sm:$0xff]  }
  0xd3   : > { %6451 = vmatprep.subr.bf16.mxu0 %v6954_v48  ;;  %v1355_v55 = vrot.slane %v7025_v2, 5  ;;  %v5371_v47 = vrot.slane %v1251_v33, 9  ;;  %v1354_v40 = vrot.slane %v1352_v16, 4  ;;  %v3825_v34 = vor.u32 %v3824_v63, %v8063_v8  ;;  %v5730_v2 = vld [vmem:[%s7277_s6 + $0x34] sm:$0xf] }
  0xd4   : > { %v1361_v33 = vrot.slane %v1359_v52, 4  ;;  %v5728_v63 = vld [vmem:[%s7277_s6 + $0x2c] sm:$0x1]  ;;  %v8103_v18 = vrot.slane %v3842_v1, 5  ;;  %v3866_v14 = vshll.u32 %v5730_v2, 16  ;;  %v3870_v32 = vshrl.u32 %v5730_v2, 16 }
  0xd5   : > { %v3826_v11 = vrot.slane %v3825_v34, 4  ;;  %v8120_v30 = vsel %vm7587_vm5, %v1347_v53, %v1348_v19  ;;  %v8127_v46 = vsel %vm7587_vm5, %v5371_v47, %v1352_v16  ;;  %v8131_v15 = vsel %vm7587_vm5, %v1354_v40, %v1355_v55  ;;  %v1253_v19 = vld [vmem:[%s7277_s6 + $0x78] sm:$0xe] }
  0xd6   : > { %6452 = vmatpush3.bf16.msra.mxu0 %v6954_v48  ;;  %v8135_v17 = vsel %vm7587_vm5, %v5372_v59, %v1359_v52  ;;  %v8145_v16 = vsel %vm7587_vm5, %v1361_v33, %v1362_v20  ;;  %v3849_v6 = vor.u32 %v3848_v29, %v8103_v18  ;;  %v3859_v53 = vrot.slane %v3857_v39, 4  ;;  %v5732_v59 = vld [vmem:[%s7277_s6 + $0x3c] sm:$0xf]  ;;  %v5733_v52 = vld [vmem:[%s7277_s6 + $0x40] sm:$0xf] }
  0xd7   : > { %6453 = vmatprep.subr.bf16.mxu0 %v6958_v54  ;;  %v3821_v1 = vsel %vm7341_vm2, %v3816_v22, %v8063_v8  ;;  %v3831_v47 = vsel %vm7341_vm2, %v3826_v11, %v8091_v43  ;;  %v8156_v40 = vrot.slane %v3866_v14, 5  ;;  %v3872_v23 = vrot.slane %v3870_v32, 4  ;;  %v7028_v20 = vld [vmem:[%s7277_s6 + $0x80] sm:$0x1]  ;;  %v8315_v48 = vld [vmem:[%s7277_s6 + $0x68] sm:$0x1] }
  0xd8   : > { %6422 = vmatmul.mubr.bf16.gmra.mrb[8].mxu0 %v6947_v3  ;;  %v3860_v3 = vshll.u32 %v5729_v44, 16  ;;  %v3852_v44 = vshll.u32 %v5728_v63, 16  ;;  %v5373_v33 = vrot.slane %v1253_v19, 9  ;;  %v1254_v63 = vld [vmem:[%s7277_s6 + $0x84] sm:$0xe]  ;;  %v3881_v29 = vshrl.u32 %v5732_v59, 16 }
  0xd9   : > { %6198 = vmatmul.mubr.bf16.gmra.mrb[24].mxu1 %v5352_v21  ;;  %6425 = vmatprep.mubr.bf16.mxu0 %v6950_v4  ;;  %v6966_v21 = vld [vmem:[%s9163_s1 + $0x1f0] sm:$0xff]   ;;  %v7027_v4 = vld [vmem:[%s7277_s6 + $0x7c] sm:$0xf]  ;;  %v3884_v8 = vshll.u32 %v5732_v59, 16  ;;  %v3890_v39 = vshll.u32 %v5733_v52, 16  ;;  %v9188_v43 = vcombine.low %v7746_v42, %v7751_v13  ;;  %v8167_v14 = vrot.slane %v3849_v6, 4 }
  0xda   : > { %6201 = vmatprep.mubr.bf16.mxu1 %v5353_v24  ;;  %6454 = vmatpush3.bf16.msra.mxu0 %v6958_v54  ;;  %v3839_v24 = vor.u32 %v3838_v45, %v3835_v35  ;;  %v6955_v54 = vld [vmem:[%s7277_s6 + $0x78] sm:$0xff]   ;;  %v1366_v45 = vrot.slane %v7027_v4, 5  ;;  %v3862_v55 = vrot.slane %v3860_v3, 5  ;;  %v8160_v2 = vrot.slane %v3852_v44, 5  ;;  %v8172_v22 = vld [vmem:[%s9163_s1 + $0x200] sm:$0xff]   ;;  %9196 = vst [vmem:[#allocation11_spill] sm:$0xff] %v8315_v48 }
  0xdb   : > { %6455 = vmatprep.subr.bf16.mxu0 %v6962_v51  ;;  %v5731_v35 = vld [vmem:[%s7277_s6 + $0x38] sm:$0x1]  ;;  %v3894_v3 = vshrl.u32 %v5733_v52, 16  ;;  %v6957_v44 = vld [vmem:[%s7277_s6 + $0x84] sm:$0xff]   ;;  %v3873_v13 = vor.u32 %v3872_v23, %v8156_v40  ;;  %v3886_v59 = vrot.slane %v3884_v8, 5  ;;  %v8194_v52 = vrot.slane %v3890_v39, 5 }
  0xdc   : > { %v8158_v34 = vrot.slane %v3839_v24, 4  ;;  %v1368_v11 = vrot.slane %v1366_v45, 4  ;;  %v3863_v32 = vor.u32 %v3862_v55, %v3859_v53  ;;  %v9189_v24 = vcombine.low %v7977_v60, %v7985_v26  ;;  %v7029_v19 = vld [vmem:[%s7277_s6 + $0x88] sm:$0xf]  ;;  %v5734_v6 = vld [vmem:[%s7277_s6 + $0x44] sm:$0x1] }
  0xdd   : > { %v1373_v4 = vrot.slane %v7029_v19, 5  ;;  %v8185_v60 = vcombine.low %v3821_v1, %v3831_v47  ;;  %v5735_v53 = vld [vmem:[%s7277_s6 + $0x48] sm:$0xf]  ;;  %v3883_v55 = vrot.slane %v3881_v29, 4  ;;  %v3896_v23 = vrot.slane %v3894_v3, 4 }
  0xde   : > { %6456 = vmatpush3.bf16.msra.mxu0 %v6962_v51  ;;  %v1369_v51 = vrot.slane %v7028_v20, 5  ;;  %v6959_v20 = vld [vmem:[%s7277_s6 + $0x90] sm:$0xff]   ;;  %v3845_v1 = vsel %vm7341_vm2, %v8158_v34, %v8103_v18  ;;  %v3864_v47 = vrot.slane %v3863_v32, 4  ;;  %v3855_v29 = vsel %vm7341_vm2, %v8167_v14, %v8160_v2  ;;  %v8216_v34 = vld [vmem:[%s7277_s6 + $0x58] sm:$0xf]  ;;  %v6960_v32 = vld [vmem:[%s9163_s1 + $0xc8] sm:$0xff]  }
  0xdf   : > { %6457 = vmatprep.subr.bf16.mxu0 %v6966_v21  ;;  %v3874_v39 = vrot.slane %v3873_v13, 4  ;;  %v1375_v3 = vrot.slane %v1373_v4, 4  ;;  %v5738_v18 = vld [vmem:[%s7277_s6 + $0x54] sm:$0xf]  ;;  %v3900_v2 = vshll.u32 %v5734_v6, 16  ;;  %v3905_v14 = vshrl.u32 %v5735_v53, 16 }
  0xe0   : > { %6426 = vmatmul.mubr.bf16.gmra.mrb[12].mxu0 %v6953_v49  ;;  %v3876_v49 = vshll.u32 %v5731_v35, 16  ;;  %v8212_v8 = vsel %vm7587_vm5, %v1368_v11, %v1369_v51  ;;  %v3908_v51 = vshll.u32 %v5735_v53, 16  ;;  %v3887_v11 = vor.u32 %v3886_v59, %v3883_v55  ;;  %v6961_v55 = vld [vmem:[%s7277_s6 + $0x9c] sm:$0xff]   ;;  %v7035_v42 = vld [vmem:[%s7277_s6 + $0xac] sm:$0xf] }
  0xe1   : > { %6202 = vmatmul.mubr.bf16.gmra.mrb[28].mxu1 %v9188_v43  ;;  %6429 = vmatprep.mubr.bf16.mxu0 %v6955_v54  ;;  %v5374_v54 = vrot.slane %v1254_v63, 9  ;;  %v7030_v43 = vld [vmem:[%s7277_s6 + $0x8c] sm:$0x1]  ;;  %v3938_v6 = vshll.u32 %v8216_v34, 16  ;;  %v9191_v53 = vcombine.low %v7993_v0, %v8001_v9  ;;  %v8252_v0 = vld [vmem:[%s7277_s6 + $0x50] sm:$0x1] }
  0xe2   : > { %6221 = vmatprep.mubr.bf16.mxu1 %v9189_v24  ;;  %6458 = vmatpush3.bf16.msra.mxu0 %v6966_v21  ;;  %v8191_v21 = vsel %vm7587_vm5, %v5373_v33, %v1366_v45  ;;  %v3878_v63 = vrot.slane %v3876_v49, 5  ;;  %v1376_v24 = vrot.slane %v7030_v43, 5  ;;  %v1255_v45 = vld [vmem:[%s7277_s6 + $0x90] sm:$0xe]  ;;  %v8204_v33 = vld [vmem:[%s7277_s6 + $0x4c] sm:$0xf]  ;;  %v3897_v49 = vor.u32 %v3896_v23, %v8194_v52 }
  0xe3   : > { %6459 = vmatprep.subr.bf16.mxu0 %v6970_v41  ;;  %v3914_v13 = vshll.u32 %v8204_v33, 16  ;;  %v3918_v19 = vshrl.u32 %v8204_v33, 16  ;;  %v9190_v43 = vcombine.low %v7981_v31, %v7989_v7  ;;  %v6964_v31 = vld [vmem:[%s9163_s1 + $0xd0] sm:$0xff]   ;;  %v3869_v7 = vsel %vm7341_vm2, %v3864_v47, %v8156_v40  ;;  %v6963_v9 = vld [vmem:[%s7277_s6 + $0xa8] sm:$0xff]   ;;  %v8259_v40 = vld [vmem:[%s7277_s6 + $0x5c] sm:$0x1] }
  0xe4   : > { %v3879_v59 = vsel %vm7341_vm2, %v3874_v39, %v3878_v63  ;;  %v5375_v23 = vrot.slane %v1255_v45, 9  ;;  %v3910_v26 = vrot.slane %v3908_v51, 5  ;;  %9192 = vst [vmem:[#allocation9_spill] sm:$0xff] %v8259_v40  ;;  %v3888_v47 = vrot.slane %v3887_v11, 4 }
  0xe5   : > { %v3898_v63 = vrot.slane %v3897_v49, 4  ;;  %v8261_v39 = vrot.slane %v3914_v13, 5  ;;  %v8263_v35 = vrot.slane %v3938_v6, 5  ;;  %v8268_v51 = vcombine.low %v3845_v1, %v3855_v29  ;;  %v5741_v29 = vld [vmem:[%s7277_s6 + $0x60] sm:$0xf] }
  0xe6   : > { %6460 = vmatpush3.bf16.msra.mxu0 %v6970_v41  ;;  %v8224_v41 = vsel %vm7587_vm5, %v5374_v54, %v1373_v4  ;;  %v3929_v54 = vshrl.u32 %v5738_v18, 16  ;;  %v3932_v4 = vshll.u32 %v5738_v18, 16  ;;  %v7031_v18 = vld [vmem:[%s7277_s6 + $0x94] sm:$0xf]  ;;  %v8272_v49 = vcombine.low %v3869_v7, %v3879_v59 }
  0xe7   : > { %6493 = vmatprep.subr.bf16.mxu0 %v8172_v22  ;;  %v3924_v1 = vshll.u32 %v8252_v0, 16  ;;  %v3893_v7 = vsel %vm7341_vm2, %v3888_v47, %v8194_v52  ;;  %v9195_v47 = vcombine.low %v8015_v62, %v8019_v37 }
  0xe8   : > { %6430 = vmatmul.mubr.bf16.gmra.mrb[16].mxu0 %v6957_v44  ;;  %v3942_v44 = vshrl.u32 %v8216_v34, 16  ;;  %v3931_v45 = vrot.slane %v3929_v54, 4  ;;  %v7032_v54 = vld [vmem:[%s7277_s6 + $0x98] sm:$0x1] }
  0xe9   : > { %6222 = vmatmul.mubr.bf16.vlgmr.msra.gmra.mrb[0].mxu1 %v9190_v43  ;;  %6433 = vmatprep.mubr.bf16.mxu0 %v6959_v20  ;;  %v8255_v20 = vrot.slane %v3900_v2, 5  ;;  %v1380_v43 = vrot.slane %v7031_v18, 5  ;;  %v7033_v18 = vld [vmem:[%s7277_s6 + $0xa0] sm:$0xf]  ;;  %v3926_v37 = vrot.slane %v3924_v1, 5 }
  0xea   : > { %6254 = vmatpush3.bf16.msra.mxu1 %v7934_v61  ;;  %6225 = vmatprep.mubr.bf16.mxu1 %v9191_v53  ;;  %v8249_v61 = vsel %vm7587_vm5, %v1375_v3, %v1376_v24  ;;  %v3907_v53 = vrot.slane %v3905_v14, 4  ;;  %v3920_v24 = vrot.slane %v3918_v19, 4  ;;  %v3934_v3 = vrot.slane %v3932_v4, 5  ;;  %v6968_v14 = vld [vmem:[%s9163_s1 + $0xd8] sm:$0xff]  }
  0xeb   : > { %6255 = vmatprep.subr.bf16.mxu1 %v6960_v32  ;;  %v3944_v2 = vrot.slane %v3942_v44, 4  ;;  %v1256_v19 = vld [vmem:[%s7277_s6 + $0x9c] sm:$0xe]  ;;  %v1383_v4 = vrot.slane %v7032_v54, 5  ;;  %v8285_v44 = vld [vmem:[%s7277_s6 + $0x64] sm:$0xf] }
  0xec   : > { %v3911_v6 = vor.u32 %v3910_v26, %v3907_v53  ;;  %9193 = vst [vmem:[#allocation10_spill] sm:$0xff] %v8285_v44  ;;  %v3921_v59 = vor.u32 %v3920_v24, %v8261_v39  ;;  %v1387_v13 = vrot.slane %v7033_v18, 5  ;;  %v9194_v26 = vcombine.low %v8005_v25, %v8009_v36  ;;  %v6965_v24 = vld [vmem:[%s7277_s6 + $0xb4] sm:$0xff]   ;;  %v6971_v25 = vld [vmem:[%s9163_s1 + $0xe0] sm:$0xff]   ;;  %v5744_v18 = vld [vmem:[%s7277_s6 + $0x6c] sm:$0xf] }
  0xed   : > { %v1382_v53 = vrot.slane %v1380_v43, 4  ;;  %v3935_v54 = vor.u32 %v3934_v3, %v3931_v45  ;;  %v3945_v52 = vor.u32 %v3944_v2, %v8263_v35  ;;  %v3953_v36 = vshrl.u32 %v5741_v29, 16  ;;  %v7034_v3 = vld [vmem:[%s7277_s6 + $0xa4] sm:$0x1] }
  0xee   : > { %6256 = vmatpush3.bf16.msra.mxu1 %v6960_v32  ;;  %v8279_v32 = vsel %vm7587_vm5, %v5375_v23, %v1380_v43  ;;  %v3948_v23 = vshll.u32 %v8259_v40, 16  ;;  %v3966_v43 = vshrl.u32 %v8285_v44, 16  ;;  %v3912_v62 = vrot.slane %v3911_v6, 4  ;;  %v8454_v40 = vld [vmem:[%s7277_s6 + $0x98] sm:$0x1] }
  0xef   : > { %6257 = vmatprep.subr.bf16.mxu1 %v6964_v31  ;;  %v5376_v45 = vrot.slane %v1256_v19, 9  ;;  %v1390_v2 = vrot.slane %v7034_v3, 5  ;;  %v3936_v6 = vrot.slane %v3935_v54, 4  ;;  %v3946_v19 = vrot.slane %v3945_v52, 4  ;;  %9209 = vst [vmem:[#allocation20_spill] sm:$0xff] %v8454_v40 }
  0xf0   : > { %6434 = vmatmul.mubr.bf16.gmra.mrb[20].mxu0 %v6961_v55  ;;  %v3903_v55 = vsel %vm7341_vm2, %v3898_v63, %v8255_v20  ;;  %v3962_v20 = vshll.u32 %v8285_v44, 16  ;;  %v6967_v63 = vld [vmem:[%s7277_s6 + $0xc0] sm:$0xff]   ;;  %v3950_v11 = vrot.slane %v3948_v23, 5  ;;  %v8321_v44 = vsel %vm7587_vm5, %v1382_v53, %v1383_v4 }
  0xf1   : > { %6226 = vmatmul.mubr.bf16.gmra.mrb[4].mxu1 %v9194_v26  ;;  %6437 = vmatprep.mubr.bf16.mxu0 %v6963_v9  ;;  %v3956_v9 = vshll.u32 %v5741_v29, 16  ;;  %v3922_v26 = vrot.slane %v3921_v59, 4  ;;  %v1394_v29 = vrot.slane %v7035_v42, 5  ;;  %v8317_v56 = vcombine.low %v3893_v7, %v3903_v55  ;;  %v6973_v42 = vld [vmem:[%s9163_s1 + $0xe8] sm:$0xff]  }
  0xf2   : > { %6229 = vmatprep.mubr.bf16.mxu1 %v9195_v47  ;;  %6258 = vmatpush3.bf16.msra.mxu1 %v6964_v31  ;;  %v1257_v31 = vld [vmem:[%s7277_s6 + $0xa8] sm:$0xe]  ;;  %v1389_v47 = vrot.slane %v1387_v13, 4  ;;  %v3955_v1 = vrot.slane %v3953_v36, 4  ;;  %v8323_v59 = vrot.slane %v3962_v20, 5  ;;  %v3968_v23 = vrot.slane %v3966_v43, 4 }
  0xf3   : > { %6259 = vmatprep.subr.bf16.mxu1 %v6968_v14  ;;  %v3958_v3 = vrot.slane %v3956_v9, 5  ;;  %v3917_v4 = vsel %vm7341_vm2, %v3912_v62, %v8261_v39  ;;  %v8333_v7 = vsel %vm7587_vm5, %v5376_v45, %v1387_v13  ;;  %v3977_v55 = vshrl.u32 %v5744_v18, 16  ;;  %v7036_v39 = vld [vmem:[%s7277_s6 + $0xb0] sm:$0x1]  ;;  %v1258_v20 = vld [vmem:[%s7277_s6 + $0xb4] sm:$0xe] }
  0xf4   : > { %v3980_v53 = vshll.u32 %v5744_v18, 16  ;;  %v3927_v54 = vsel %vm7341_vm2, %v3922_v26, %v3926_v37  ;;  %v8342_v52 = vsel %vm7587_vm5, %v1389_v47, %v1390_v2  ;;  %v5377_v36 = vrot.slane %v1257_v31, 9  ;;  %v8364_v31 = vld [vmem:[%s7277_s6 + $0x74] sm:$0x1]  ;;  %v7037_v26 = vld [vmem:[%s7277_s6 + $0xb8] sm:$0xf] }
  0xf5   : > { %v1397_v9 = vrot.slane %v7036_v39, 5  ;;  %v9198_v13 = vcombine.low %v8036_v50, %v8050_v5  ;;  %v3941_v43 = vsel %vm7341_vm2, %v3936_v6, %v8263_v35  ;;  %v3951_v62 = vsel %vm7341_vm2, %v3946_v19, %v3950_v11  ;;  %v6969_v5 = vld [vmem:[%s7277_s6 + $0xcc] sm:$0xff]   ;;  %9200 = vst [vmem:[#allocation13_spill] sm:$0xff] %v8364_v31  ;;  %v5750_v39 = vld [vmem:[%s7277_s6 + $0x84] sm:$0xf] }
  0xf6   : > { %6260 = vmatpush3.bf16.msra.mxu1 %v6968_v14  ;;  %v8336_v14 = vld [vmem:[%s7277_s6 + $0x70] sm:$0xf]  ;;  %v1396_v37 = vrot.slane %v1394_v29, 4  ;;  %v3972_v45 = vshll.u32 %v8315_v48, 16  ;;  %v9199_v50 = vcombine.low %v8072_v27, %v8076_v57  ;;  %v3969_v2 = vor.u32 %v3968_v23, %v8323_v59  ;;  %v8381_v23 = vld [vmem:[%s7277_s6 + $0x7c] sm:$0xf] }
  0xf7   : > { %6261 = vmatprep.subr.bf16.mxu1 %v6971_v25  ;;  %9197 = vst [vmem:[#allocation12_spill] sm:$0xff] %v8336_v14  ;;  %v3986_v35 = vshll.u32 %v8336_v14, 16  ;;  %v3990_v11 = vshrl.u32 %v8336_v14, 16  ;;  %v5378_v18 = vrot.slane %v1258_v20, 9  ;;  %v1401_v47 = vrot.slane %v7037_v26, 5  ;;  %9201 = vst [vmem:[#allocation14_spill] sm:$0xff] %v8381_v23 }
  0xf8   : > { %6438 = vmatmul.mubr.bf16.gmra.mrb[24].mxu0 %v6965_v24  ;;  %v6975_v24 = vld [vmem:[%s9163_s1 + $0xf0] sm:$0xff]   ;;  %v3979_v27 = vrot.slane %v3977_v55, 4  ;;  %v3982_v57 = vrot.slane %v3980_v53, 5  ;;  %v8372_v19 = vcombine.low %v3917_v4, %v3927_v54  ;;  %v8384_v20 = vcombine.low %v3941_v43, %v3951_v62  ;;  %v7038_v4 = vld [vmem:[%s7277_s6 + $0xbc] sm:$0x1] }
  0xf9   : > { %6230 = vmatmul.mubr.bf16.gmra.mrb[8].mxu1 %v9198_v13  ;;  %6441 = vmatprep.mubr.bf16.mxu0 %v6967_v63  ;;  %v3959_v63 = vor.u32 %v3958_v3, %v3955_v1  ;;  %v8378_v3 = vsel %vm7587_vm5, %v5377_v36, %v1394_v29  ;;  %v8388_v55 = vsel %vm7587_vm5, %v1396_v37, %v1397_v9  ;;  %v8390_v53 = vrot.slane %v3972_v45, 5  ;;  %v6977_v13 = vld [vmem:[%s9163_s1 + $0xf8] sm:$0xff]   ;;  %v8397_v29 = vld [vmem:[%s7277_s6 + $0x88] sm:$0xf] }
  0xfa   : > { %6233 = vmatprep.mubr.bf16.mxu1 %v9199_v50  ;;  %6262 = vmatpush3.bf16.msra.mxu1 %v6971_v25  ;;  %v5747_v25 = vld [vmem:[%s7277_s6 + $0x78] sm:$0xf]  ;;  %v1404_v54 = vrot.slane %v7038_v4, 5  ;;  %9202 = vst [vmem:[#allocation15_spill] sm:$0xff] %v8397_v29  ;;  %v8401_v43 = vrot.slane %v3969_v2, 4  ;;  %v8403_v62 = vrot.slane %v3986_v35, 5  ;;  %v8407_v37 = vsel %vm7587_vm5, %v5378_v18, %v1401_v47 }
  0xfb   : > { %6263 = vmatprep.subr.bf16.mxu1 %v6973_v42  ;;  %v8399_v36 = vrot.slane %v3959_v63, 4  ;;  %v3992_v9 = vrot.slane %v3990_v11, 4  ;;  %v1403_v45 = vrot.slane %v1401_v47, 4  ;;  %v3983_v50 = vor.u32 %v3982_v57, %v3979_v27  ;;  %v5753_v4 = vld [vmem:[%s7277_s6 + $0x90] sm:$0xf] }
  0xfc   : > { %v3996_v26 = vshll.u32 %v8364_v31, 16  ;;  %v4004_v1 = vshll.u32 %v5747_v25, 16  ;;  %v4010_v63 = vshll.u32 %v8381_v23, 16  ;;  %v4014_v2 = vshrl.u32 %v8381_v23, 16  ;;  %v8414_v35 = vld [vmem:[%s7277_s6 + $0x94] sm:$0xf] }
  0xfd   : > { %9203 = vst [vmem:[#allocation16_spill] sm:$0xff] %v8414_v35  ;;  %v9204_v11 = vcombine.low %v8116_v28, %v8120_v30  ;;  %v4025_v18 = vshrl.u32 %v5750_v39, 16  ;;  %v4028_v47 = vshll.u32 %v5750_v39, 16  ;;  %v4038_v27 = vshrl.u32 %v8397_v29, 16  ;;  %v5756_v39 = vld [vmem:[%s7277_s6 + $0x9c] sm:$0xf] }
  0xfe   : > { %6264 = vmatpush3.bf16.msra.mxu1 %v6973_v42  ;;  %v4001_v42 = vshrl.u32 %v5747_v25, 16  ;;  %v9205_v57 = vcombine.low %v8127_v46, %v8131_v15  ;;  %v3993_v30 = vor.u32 %v3992_v9, %v8403_v62  ;;  %v4052_v25 = vshll.u32 %v5753_v4, 16  ;;  %v8436_v46 = vld [vmem:[%s7277_s6 + $0x80] sm:$0x1] }
  0xff   : > { %6265 = vmatprep.subr.bf16.mxu1 %v6975_v24  ;;  %v8433_v6 = vrot.slane %v3996_v26, 5  ;;  %9206 = vst [vmem:[#allocation17_spill] sm:$0xff] %v8436_v46  ;;  %v4058_v15 = vshll.u32 %v8414_v35, 16  ;;  %v4006_v28 = vrot.slane %v4004_v1, 5  ;;  %v4016_v9 = vrot.slane %v4014_v2, 4 }
 0x100   : > { %6442 = vmatmul.mubr.bf16.gmra.mrb[28].mxu0 %v6969_v5  ;;  %v4034_v5 = vshll.u32 %v8397_v29, 16  ;;  %v8440_v29 = vrot.slane %v4010_v63, 5  ;;  %v8446_v23 = vld [vmem:[%s7277_s6 + $0xa0] sm:$0xf]  ;;  %v4027_v26 = vrot.slane %v4025_v18, 4  ;;  %v4030_v31 = vrot.slane %v4028_v47, 5 }
 0x101   : > { %6234 = vmatmul.mubr.bf16.gmra.mrb[12].mxu1 %v9204_v11  ;;  %6461 = vmatprep.mubr.bf16.mxu0 %v8185_v60  ;;  %v4049_v60 = vshrl.u32 %v5753_v4, 16  ;;  %v8431_v11 = vrot.slane %v3983_v50, 4  ;;  %v8443_v4 = vld [vmem:[%s7277_s6 + $0x8c] sm:$0x1]  ;;  %9208 = vst [vmem:[#allocation19_spill] sm:$0xff] %v8446_v23  ;;  %v4040_v48 = vrot.slane %v4038_v27, 4  ;;  %v8463_v63 = vsel %vm7587_vm5, %v1403_v45, %v1404_v54 }
 0x102   : > { %6237 = vmatprep.mubr.bf16.mxu1 %v9205_v57  ;;  %6266 = vmatpush3.bf16.msra.mxu1 %v6975_v24  ;;  %v4062_v24 = vshrl.u32 %v8414_v35, 16  ;;  %v4003_v57 = vrot.slane %v4001_v42, 4  ;;  %9207 = vst [vmem:[#allocation18_spill] sm:$0xff] %v8443_v4  ;;  %v6974_v50 = vld [vmem:[%s9163_s1 + $0x208] sm:$0xff]   ;;  %v8451_v14 = vrot.slane %v4034_v5, 5  ;;  %v4054_v35 = vrot.slane %v4052_v25, 5 }
 0x103   : > { %6267 = vmatprep.subr.bf16.mxu1 %v6977_v13  ;;  %v5759_v42 = vld [vmem:[%s7277_s6 + $0xa8] sm:$0xf]  ;;  %v4051_v2 = vrot.slane %v4049_v60, 4  ;;  %v8468_v18 = vld [vmem:[%s9163_s1 + $0x100] sm:$0xff]   ;;  %v8471_v47 = vrot.slane %v4058_v15, 5  ;;  %v4073_v27 = vshrl.u32 %v5756_v39, 16  ;;  %v9211_v25 = vcombine.low %v8135_v17, %v8145_v16 }
 0x104   : > { %9210 = vst [vmem:[#allocation21_spill] sm:$0xff] %v8468_v18  ;;  %v4064_v5 = vrot.slane %v4062_v24, 4  ;;  %v4076_v1 = vshll.u32 %v5756_v39, 16  ;;  %v8474_v54 = vrot.slane %v3993_v30, 4  ;;  %v4082_v45 = vshll.u32 %v8446_v23, 16  ;;  %v6976_v17 = vld [vmem:[%s9163_s1 + $0x210] sm:$0xff]  }
 0x105   : > { %v4086_v60 = vshrl.u32 %v8446_v23, 16  ;;  %v4007_v15 = vor.u32 %v4006_v28, %v4003_v57  ;;  %v4017_v39 = vor.u32 %v4016_v9, %v8440_v29  ;;  %v4031_v24 = vor.u32 %v4030_v31, %v4027_v26  ;;  %v8486_v30 = vld [vmem:[%s7277_s6 + $0xac] sm:$0xf]  ;;  %v8499_v26 = vld [vmem:[%s7277_s6 + $0xa4] sm:$0x1] }
 0x106   : > { %6268 = vmatpush3.bf16.msra.mxu1 %v6977_v13  ;;  %v4020_v13 = vshll.u32 %v8436_v46, 16  ;;  %9212 = vst [vmem:[#allocation22_spill] sm:$0xff] %v8486_v30  ;;  %v4041_v16 = vor.u32 %v4040_v48, %v8451_v14  ;;  %v4097_v28 = vshrl.u32 %v5759_v42, 16  ;;  %v4100_v31 = vshll.u32 %v5759_v42, 16 }
 0x107   : > { %6541 = vmatprep.subr.bf16.mxu1 %v8468_v18  ;;  %v9213_v18 = vcombine.low %v8191_v21, %v8212_v8  ;;  %v4055_v57 = vor.u32 %v4054_v35, %v4051_v2  ;;  %v4065_v9 = vor.u32 %v4064_v5, %v8471_v47  ;;  %v4075_v21 = vrot.slane %v4073_v27, 4 }
 0x108   : > { %6462 = vmatmul.mubr.bf16.vlgmr.msra.gmra.mrb[0].mxu0 %v8268_v51  ;;  %v4044_v51 = vshll.u32 %v8443_v4, 16  ;;  %v4078_v8 = vrot.slane %v4076_v1, 5  ;;  %v4110_v23 = vshrl.u32 %v8486_v30, 16  ;;  %v4008_v48 = vrot.slane %v4007_v15, 4  ;;  %v6978_v1 = vld [vmem:[%s9163_s1 + $0x218] sm:$0xff]  }
 0x109   : > { %6238 = vmatmul.mubr.bf16.gmra.mrb[16].mxu1 %v9211_v25  ;;  %6494 = vmatpush3.bf16.msra.mxu0 %v8172_v22  ;;  %v4068_v22 = vshll.u32 %v8454_v40, 16  ;;  %v4106_v25 = vshll.u32 %v8486_v30, 16  ;;  %v4018_v40 = vrot.slane %v4017_v39, 4  ;;  %v4022_v4 = vrot.slane %v4020_v13, 5 }
 0x10a   : > { %6241 = vmatprep.mubr.bf16.mxu1 %v9213_v18  ;;  %6465 = vmatprep.mubr.bf16.mxu0 %v8272_v49  ;;  %v8501_v18 = vrot.slane %v4082_v45, 5  ;;  %v4088_v49 = vrot.slane %v4086_v60, 4  ;;  %v4046_v42 = vrot.slane %v4044_v51, 5  ;;  %v4032_v35 = vrot.slane %v4031_v24, 4 }
 0x10b   : > { %6495 = vmatprep.subr.bf16.mxu0 %v6974_v50  ;;  %v4042_v2 = vrot.slane %v4041_v16, 4  ;;  %v4099_v5 = vrot.slane %v4097_v28, 4  ;;  %v4102_v46 = vrot.slane %v4100_v31, 5  ;;  %v4056_v27 = vrot.slane %v4055_v57, 4  ;;  %v8567_v28 = vld [vmem:[%s7277_s6 + $0xbc] sm:$0x1] }
 0x10c   : > { %v4070_v45 = vrot.slane %v4068_v22, 5  ;;  %v4079_v60 = vor.u32 %v4078_v8, %v4075_v21  ;;  %v4092_v30 = vshll.u32 %v8499_v26, 16  ;;  %v4089_v13 = vor.u32 %v4088_v49, %v8501_v18  ;;  %v8534_v22 = vld [vmem:[%s7277_s6 + $0xb0] sm:$0x1] }
 0x10d   : > { %6496 = vmatpush3.bf16.msra.mxu0 %v6974_v50  ;;  %v4066_v50 = vrot.slane %v4065_v9, 4  ;;  %v8511_v15 = vrot.slane %v4106_v25, 5  ;;  %v4112_v39 = vrot.slane %v4110_v23, 4  ;;  %v9214_v24 = vor.u32 %v7919_v58, %v7917_v12 }
 0x10e   : > { %6497 = vmatprep.subr.bf16.mxu0 %v6976_v17  ;;  %v9215_v16 = vcombine.low %v8224_v41, %v8249_v61  ;;  %v3999_v23 = vsel %vm7341_vm2, %v8474_v54, %v8433_v6  ;;  %v4013_v58 = vsel %vm7341_vm2, %v4008_v48, %v8440_v29  ;;  %v9216_v41 = vcombine.low %v8279_v32, %v8321_v44  ;;  %v6981_v32 = vld [vmem:[%s9163_s1 + $0x220] sm:$0xff]  }
 0x10f   : > { %v8516_v51 = vrot.slane %v9214_v24, 4  ;;  %v4023_v61 = vsel %vm7341_vm2, %v4018_v40, %v4022_v4  ;;  %v4103_v6 = vor.u32 %v4102_v46, %v4099_v5  ;;  %v4047_v29 = vsel %vm7341_vm2, %v4042_v2, %v4046_v42  ;;  %v5815_v42 = vld [vmem:[%s7277_s6 + $0x48] sm:$0xe] }
 0x110   : > { %6466 = vmatmul.mubr.bf16.gmra.mrb[4].mxu0 %v8317_v56  ;;  %v3989_v56 = vsel %vm7341_vm2, %v8431_v11, %v8403_v62  ;;  %v5762_v62 = vld [vmem:[%s7277_s6 + $0xb4] sm:$0xf]  ;;  %v8546_v11 = vld [vmem:[%s7277_s6 + $0xb8] sm:$0xf]  ;;  %v4061_v40 = vsel %vm7341_vm2, %v4056_v27, %v8471_v47  ;;  %v8556_v44 = vrot.slane %v4079_v60, 4  ;;  %v8558_v4 = vrot.slane %v4092_v30, 5 }
 0x111   : > { %6242 = vmatmul.mubr.bf16.gmra.mrb[20].mxu1 %v9215_v16  ;;  %6469 = vmatprep.mubr.bf16.mxu0 %v8372_v19  ;;  %v4037_v19 = vsel %vm7341_vm2, %v4032_v35, %v8451_v14  ;;  %v4071_v14 = vsel %vm7341_vm2, %v4066_v50, %v4070_v45  ;;  %v8562_v46 = vrot.slane %v4089_v13, 4  ;;  %v4113_v54 = vor.u32 %v4112_v39, %v8511_v15  ;;  %v5816_v27 = vld [vmem:[%s7277_s6 + $0x54] sm:$0xe] }
 0x112   : > { %6245 = vmatprep.mubr.bf16.mxu1 %v9216_v41  ;;  %6498 = vmatpush3.bf16.msra.mxu0 %v6976_v17  ;;  %v4116_v17 = vshll.u32 %v8534_v22, 16  ;;  %v9217_v47 = vsel %vm7341_vm2, %v8401_v43, %v8390_v53  ;;  %v9218_v30 = vsel %vm7341_vm2, %v8399_v36, %v8323_v59  ;;  %v4121_v57 = vshrl.u32 %v5762_v62, 16 }
 0x113   : > { %6499 = vmatprep.subr.bf16.mxu0 %v6978_v1  ;;  %v5793_v31 = vcombine.low %v9218_v30, %v9217_v47  ;;  %v4124_v9 = vshll.u32 %v5762_v62, 16  ;;  %v4130_v21 = vshll.u32 %v8546_v11, 16  ;;  %v5409_v8 = vcombine.low %v8378_v3, %v8388_v55  ;;  %v6984_v3 = vld [vmem:[%s9163_s1 + $0x228] sm:$0xff]   ;;  %v5765_v55 = vld [vmem:[%s7277_s6 + $0xc0] sm:$0xf] }
 0x114   : > { %v5410_v49 = vcombine.low %v8407_v37, %v8463_v63  ;;  %v5794_v25 = vcombine.low %v3989_v56, %v3999_v23  ;;  %v8584_v53 = vrot.slane %v4103_v6, 4  ;;  %v5795_v43 = vcombine.low %v4013_v58, %v4023_v61  ;;  %v9222_v30 = vld [vmem:[#allocation11_spill] sm:$0xff] }
 0x115   : > { %v8586_v59 = vcombine.low %v4037_v19, %v4047_v29  ;;  %v8588_v36 = vcombine.low %v4061_v40, %v4071_v14  ;;  %v4085_v48 = vsel %vm7341_vm2, %v8556_v44, %v8501_v18  ;;  %v4095_v35 = vsel %vm7341_vm2, %v8562_v46, %v8558_v4  ;;  %v5818_v29 = vld [vmem:[%s7277_s6 + $0x6c] sm:$0xe] }
 0x116   : > { %6500 = vmatpush3.bf16.msra.mxu0 %v6978_v1  ;;  %v8604_v2 = vrot.slane %v4113_v54, 4  ;;  %v8606_v5 = vrot.slane %v4116_v17, 5  ;;  %v4134_v1 = vshrl.u32 %v8546_v11, 16  ;;  %v9219_v45 = vcombine.low %v8333_v7, %v8342_v52  ;;  %v6987_v7 = vld [vmem:[%s9163_s1 + $0x230] sm:$0xff]   ;;  %v8628_v52 = vld [vmem:[%s7277_s6 + $0xc4] sm:$0xf] }
 0x117   : > { %6501 = vmatprep.subr.bf16.mxu0 %v6981_v32  ;;  %v8613_v60 = vrot.slane %v4121_v57, 4  ;;  %v8617_v50 = vrot.slane %v4130_v21, 5  ;;  %v4140_v13 = vshll.u32 %v8567_v28, 16  ;;  %v4109_v39 = vsel %vm7341_vm2, %v8584_v53, %v8511_v15  ;;  %v5817_v15 = vld [vmem:[%s7277_s6 + $0x60] sm:$0xe]  ;;  %v9220_v40 = vld [vmem:[#allocation9_spill] sm:$0xff] }
 0x118   : > { %6470 = vmatmul.mubr.bf16.gmra.mrb[8].mxu0 %v8384_v20  ;;  %v8615_v20 = vrot.slane %v4124_v9, 5  ;;  %v4145_v24 = vshrl.u32 %v5765_v55, 16  ;;  %v5831_v16 = vrot.slane %v5815_v42, 9  ;;  %v4608_v56 = vrot.slane %v8204_v33, 5  ;;  %v6979_v14 = vld [vmem:[%s7277_s6 + $0xc] sm:$0xff]   ;;  %v6990_v57 = vld [vmem:[%s9163_s1 + $0x238] sm:$0xff]  }
 0x119   : > { %6246 = vmatmul.mubr.bf16.gmra.mrb[24].mxu1 %v9219_v45  ;;  %6473 = vmatprep.mubr.bf16.mxu0 %v5793_v31  ;;  %v4148_v23 = vshll.u32 %v5765_v55, 16  ;;  %v4611_v58 = vrot.slane %v8252_v0, 5  ;;  %v5832_v41 = vrot.slane %v5816_v27, 9  ;;  %v4615_v61 = vrot.slane %v8216_v34, 5  ;;  %v9221_v17 = vld [vmem:[#allocation10_spill] sm:$0xff]  ;;  %v9223_v53 = vld [vmem:[#allocation12_spill] sm:$0xff] }
 0x11a   : > { %6249 = vmatprep.mubr.bf16.mxu1 %v5409_v8  ;;  %6502 = vmatpush3.bf16.msra.mxu0 %v6981_v32  ;;  %v4119_v19 = vsel %vm7341_vm2, %v8604_v2, %v8606_v5  ;;  %v8638_v6 = vrot.slane %v4134_v1, 4  ;;  %v8642_v62 = vsel %vm7587_vm5, %v5831_v16, %v4608_v56  ;;  %v4610_v33 = vrot.slane %v4608_v56, 4  ;;  %v9224_v5 = vld [vmem:[#allocation13_spill] sm:$0xff]  ;;  %v8679_v27 = vld [vmem:[%s7277_s6 + $0xc8] sm:$0x1] }
 0x11b   : > { %6503 = vmatprep.subr.bf16.mxu0 %v6984_v3  ;;  %v4154_v32 = vshll.u32 %v8628_v52, 16  ;;  %v8648_v0 = vsel %vm7587_vm5, %v5832_v41, %v4615_v61  ;;  %v4617_v34 = vrot.slane %v4615_v61, 4  ;;  %v4618_v4 = vrot.slane %v9220_v40, 5  ;;  %v6980_v41 = vld [vmem:[%s7277_s6 + $0x18] sm:$0xff]   ;;  %v6982_v40 = vld [vmem:[%s7277_s6 + $0x24] sm:$0xff]  }
 0x11c   : > { %v8654_v46 = vsel %vm7587_vm5, %v4610_v33, %v4611_v58  ;;  %v5833_v54 = vrot.slane %v5817_v15, 9  ;;  %v4622_v47 = vrot.slane %v9221_v17, 5  ;;  %v4625_v31 = vrot.slane %v9222_v30, 5 }
 0x11d   : > { %v5863_v9 = vcombine.low %v8642_v62, %v8654_v46  ;;  %v8665_v21 = vsel %vm7587_vm5, %v4617_v34, %v4618_v4  ;;  %v5834_v8 = vrot.slane %v5818_v29, 9  ;;  %v4632_v1 = vrot.slane %v9224_v5, 5  ;;  %v9226_v29 = vld [vmem:[#allocation17_spill] sm:$0xff] }
 0x11e   : > { %6504 = vmatpush3.bf16.msra.mxu0 %v6984_v3  ;;  %v4629_v3 = vrot.slane %v9223_v53, 5  ;;  %v5864_v55 = vcombine.low %v8648_v0, %v8665_v21  ;;  %v8672_v42 = vsel %vm7587_vm5, %v5833_v54, %v4622_v47  ;;  %v4624_v2 = vrot.slane %v4622_v47, 4  ;;  %v9227_v54 = vld [vmem:[#allocation8_spill] sm:$0xff]  ;;  %v5524_v62 = vld [vmem:[%s7277_s6 + $0x90] sm:$0xf] }
 0x11f   : > { %6505 = vmatprep.subr.bf16.mxu0 %v6987_v7  ;;  %v8681_v45 = vrot.slane %v4145_v24, 4  ;;  %v8694_v37 = vcombine.low %v4085_v48, %v4095_v35  ;;  %v4127_v63 = vor.u32 %v8615_v20, %v8613_v60  ;;  %v5819_v24 = vld [vmem:[%s7277_s6 + $0x78] sm:$0xe]  ;;  %v8706_v58 = vrot.slane %v4140_v13, 5  ;;  %v5768_v13 = vld [vmem:[%s7277_s6 + $0xcc] sm:$0xf] }
 0x120   : > { %6474 = vmatmul.mubr.bf16.gmra.mrb[12].mxu0 %v5794_v25  ;;  %v8683_v25 = vrot.slane %v4148_v23, 5  ;;  %v8687_v16 = vsel %vm7587_vm5, %v5834_v8, %v4629_v3  ;;  %v4631_v56 = vrot.slane %v4629_v3, 4  ;;  %v8704_v23 = vcombine.low %v4109_v39, %v4119_v19  ;;  %v5518_v48 = vld [vmem:[%s7277_s6 + $0x78] sm:$0xf]  ;;  %v6996_v46 = vld [vmem:[%s7277_s6 + $0xa8] sm:$0xff]  }
 0x121   : > { %6250 = vmatmul.mubr.bf16.gmra.mrb[28].mxu1 %v5410_v49  ;;  %6477 = vmatprep.mubr.bf16.mxu0 %v5795_v43  ;;  %v4158_v49 = vshrl.u32 %v8628_v52, 16  ;;  %v8701_v43 = vsel %vm7587_vm5, %v4624_v2, %v4625_v31  ;;  %v4137_v35 = vor.u32 %v8638_v6, %v8617_v50  ;;  %v8717_v60 = vrot.slane %v4154_v32, 5  ;;  %v9225_v19 = vld [vmem:[#allocation14_spill] sm:$0xff]  ;;  %v9228_v2 = vld [vmem:[#allocation15_spill] sm:$0xff]  ;;  %v7060_v0 = vld [vmem:[%s7277_s6 + $0x8c] sm:$0x1] }
 0x122   : > { %6269 = vmatprep.mubr.bf16.mxu1 %v6979_v14  ;;  %6506 = vmatpush3.bf16.msra.mxu0 %v6987_v7  ;;  %v5865_v18 = vcombine.low %v8672_v42, %v8701_v43  ;;  %v8712_v44 = vsel %vm7587_vm5, %v4631_v56, %v4632_v1  ;;  %v4164_v20 = vshll.u32 %v8679_v27, 16  ;;  %v5820_v7 = vld [vmem:[%s7277_s6 + $0x84] sm:$0xe]  ;;  %v4151_v61 = vor.u32 %v8683_v25, %v8681_v45  ;;  %v8731_v32 = vld [vmem:[%s7277_s6 + $0xd0] sm:$0xf] }
 0x123   : > { %6507 = vmatprep.subr.bf16.mxu0 %v6990_v57  ;;  %v5866_v39 = vcombine.low %v8687_v16, %v8712_v44  ;;  %v5835_v15 = vrot.slane %v5819_v24, 9  ;;  %v4636_v33 = vrot.slane %v9225_v19, 5  ;;  %v4639_v34 = vrot.slane %v9226_v29, 5  ;;  %v9229_v25 = vld [vmem:[#allocation18_spill] sm:$0xff] }
 0x124   : > { %v4160_v6 = vrot.slane %v4158_v49, 4  ;;  %v2383_v4 = vshrl.u32 %v5518_v48, 16  ;;  %v2386_v14 = vshll.u32 %v5518_v48, 16  ;;  %v2405_v17 = vsel %vm7341_vm2, %v8516_v51, %v9227_v54 }
 0x125   : > { %v4169_v47 = vshrl.u32 %v5768_v13, 16  ;;  %v8739_v30 = vsel %vm7587_vm5, %v5835_v15, %v4636_v33  ;;  %v4638_v31 = vrot.slane %v4636_v33, 4  ;;  %v5836_v8 = vrot.slane %v5820_v7, 9  ;;  %v7040_v7 = vld [vmem:[%s9163_s1 + $0x108] sm:$0xff]  }
 0x126   : > { %6508 = vmatpush3.bf16.msra.mxu0 %v6990_v57  ;;  %v4172_v53 = vshll.u32 %v5768_v13, 16  ;;  %v2385_v3 = vrot.slane %v2383_v4, 4  ;;  %v2388_v57 = vrot.slane %v2386_v14, 5  ;;  %v4643_v5 = vrot.slane %v9228_v2, 5  ;;  %v5821_v13 = vld [vmem:[%s7277_s6 + $0x90] sm:$0xe] }
 0x127   : > { %v4178_v51 = vshll.u32 %v8731_v32, 16  ;;  %v4182_v1 = vshrl.u32 %v8731_v32, 16  ;;  %v8748_v45 = vsel %vm7587_vm5, %v4638_v31, %v4639_v34  ;;  %v4646_v56 = vrot.slane %v9229_v25, 5  ;;  %v6983_v4 = vld [vmem:[%s7277_s6 + $0x30] sm:$0xff]  }
 0x128   : > { %6478 = vmatmul.mubr.bf16.gmra.mrb[16].mxu0 %v8586_v59  ;;  %v9230_v59 = vld [vmem:[#allocation21_spill] sm:$0xff]  ;;  %v4161_v49 = vor.u32 %v4160_v6, %v8717_v60  ;;  %v2389_v24 = vor.u32 %v2388_v57, %v2385_v3  ;;  %v4645_v48 = vrot.slane %v4643_v5, 4  ;;  %v4138_v15 = vrot.slane %v4137_v35, 4  ;;  %v8769_v14 = vld [vmem:[%s7277_s6 + $0xd4] sm:$0x1]  ;;  %v9231_v3 = vld [vmem:[#allocation16_spill] sm:$0xff] }
 0x129   : > { %6270 = vmatmul.mubr.bf16.vlgmr.msra.gmra.mrb[0].mxu1 %v6980_v41  ;;  %6481 = vmatprep.mubr.bf16.mxu0 %v8588_v36  ;;  %v5867_v36 = vcombine.low %v8739_v30, %v8748_v45  ;;  %v4128_v41 = vrot.slane %v4127_v63, 4  ;;  %v4166_v19 = vrot.slane %v4164_v20, 5  ;;  %v8761_v33 = vsel %vm7587_vm5, %v5836_v8, %v4643_v5  ;;  %v6985_v20 = vld [vmem:[%s7277_s6 + $0x3c] sm:$0xff]   ;;  %v7041_v2 = vld [vmem:[%s9163_s1 + $0x110] sm:$0xff]  }
 0x12a   : > { %6549 = vmatpush3.bf16.msra.mxu1 %v9230_v59  ;;  %6273 = vmatprep.mubr.bf16.mxu1 %v6982_v40  ;;  %v4171_v29 = vrot.slane %v4169_v47, 4  ;;  %v4174_v34 = vrot.slane %v4172_v53, 5  ;;  %v2390_v40 = vrot.slane %v2389_v24, 4  ;;  %v8765_v6 = vsel %vm7587_vm5, %v4645_v48, %v4646_v56  ;;  %v7042_v48 = vld [vmem:[%s7277_s6 + $0x1c] sm:$0xf] }
 0x12b   : > { %6542 = vmatprep.subr.bf16.mxu1 %v7040_v7  ;;  %v8771_v54 = vrot.slane %v4178_v51, 5  ;;  %v4184_v31 = vrot.slane %v4182_v1, 4  ;;  %v5868_v63 = vcombine.low %v8761_v33, %v8765_v6  ;;  %v5837_v35 = vrot.slane %v5821_v13, 9 }
 0x12c   : > { %v4152_v8 = vrot.slane %v4151_v61, 4  ;;  %v4162_v47 = vrot.slane %v4161_v49, 4  ;;  %v2395_v53 = vsel %vm7341_vm2, %v2390_v40, %v7917_v12  ;;  %v4650_v57 = vrot.slane %v9231_v3, 5  ;;  %v9232_v12 = vld [vmem:[#allocation20_spill] sm:$0xff]  ;;  %v7044_v3 = vld [vmem:[%s7277_s6 + $0x20] sm:$0x1] }
 0x12d   : > { %v4133_v5 = vsel %vm7341_vm2, %v4128_v41, %v8617_v50  ;;  %v4143_v61 = vsel %vm7341_vm2, %v4138_v15, %v8706_v58  ;;  %v8789_v51 = vcombine.low %v2395_v53, %v2405_v17  ;;  %v4653_v1 = vrot.slane %v9232_v12, 5  ;;  %v5811_v58 = vld [vmem:[%s7277_s6 + $0x18] sm:$0xe]  ;;  %v5822_v17 = vld [vmem:[%s7277_s6 + $0x9c] sm:$0xe]  ;;  %v6986_v40 = vld [vmem:[%s7277_s6 + $0x48] sm:$0xff]  }
 0x12e   : > { %6550 = vmatpush3.bf16.msra.mxu1 %v7040_v7  ;;  %v4175_v25 = vor.u32 %v4174_v34, %v4171_v29  ;;  %v4188_v56 = vshll.u32 %v8769_v14, 16  ;;  %v8796_v59 = vsel %vm7587_vm5, %v5837_v35, %v4650_v57  ;;  %v4652_v49 = vrot.slane %v4650_v57, 4  ;;  %v7043_v41 = vld [vmem:[%s9163_s1 + $0x118] sm:$0xff]   ;;  %v5823_v12 = vld [vmem:[%s7277_s6 + $0xa8] sm:$0xe] }
 0x12f   : > { %6543 = vmatprep.subr.bf16.mxu1 %v7041_v2  ;;  %v4185_v50 = vor.u32 %v4184_v31, %v8771_v54  ;;  %v4167_v24 = vsel %vm7341_vm2, %v4162_v47, %v4166_v19  ;;  %v4580_v13 = vrot.slane %v7042_v48, 5  ;;  %v5800_v7 = vcombine.low %v4133_v5, %v4143_v61  ;;  %v9233_v35 = vld [vmem:[#allocation19_spill] sm:$0xff] }
 0x130   : > { %6482 = vmatmul.mubr.bf16.gmra.mrb[20].mxu0 %v8694_v37  ;;  %v4157_v37 = vsel %vm7341_vm2, %v4152_v8, %v8717_v60  ;;  %v4176_v15 = vrot.slane %v4175_v25, 4  ;;  %v4190_v29 = vrot.slane %v4188_v56, 5  ;;  %v5827_v19 = vrot.slane %v5811_v58, 9  ;;  %v6988_v47 = vld [vmem:[%s7277_s6 + $0x54] sm:$0xff]   ;;  %v5812_v56 = vld [vmem:[%s7277_s6 + $0x24] sm:$0xe] }
 0x131   : > { %6274 = vmatmul.mubr.bf16.gmra.mrb[4].mxu1 %v6983_v4  ;;  %6485 = vmatprep.mubr.bf16.mxu0 %v8704_v23  ;;  %v8810_v23 = vsel %vm7587_vm5, %v4652_v49, %v4653_v1  ;;  %v5838_v34 = vrot.slane %v5822_v17, 9  ;;  %v5801_v4 = vcombine.low %v4157_v37, %v4167_v24  ;;  %v4186_v31 = vrot.slane %v4185_v50, 4  ;;  %v7046_v49 = vld [vmem:[%s7277_s6 + $0x28] sm:$0xf]  ;;  %v7047_v37 = vld [vmem:[%s7277_s6 + $0x34] sm:$0xf] }
 0x132   : > { %6277 = vmatprep.mubr.bf16.mxu1 %v6985_v20  ;;  %6551 = vmatpush3.bf16.msra.mxu1 %v7041_v2  ;;  %v5869_v60 = vcombine.low %v8796_v59, %v8810_v23  ;;  %v4657_v20 = vrot.slane %v9233_v35, 5  ;;  %v4660_v8 = vrot.slane %v8499_v26, 5  ;;  %v4582_v53 = vrot.slane %v4580_v13, 4  ;;  %v7045_v2 = vld [vmem:[%s9163_s1 + $0x120] sm:$0xff]  }
 0x133   : > { %6544 = vmatprep.subr.bf16.mxu1 %v7043_v41  ;;  %v4583_v57 = vrot.slane %v7044_v3, 5  ;;  %v4581_v26 = vsel %vm7587_vm5, %v5827_v19, %v4580_v13  ;;  %v4181_v1 = vsel %vm7341_vm2, %v4176_v15, %v8771_v54  ;;  %v4191_v25 = vsel %vm7341_vm2, %v4186_v31, %v4190_v29  ;;  %v5813_v13 = vld [vmem:[%s7277_s6 + $0x30] sm:$0xe]  ;;  %v6989_v31 = vld [vmem:[%s7277_s6 + $0x60] sm:$0xff]  }
 0x134   : > { %v8827_v5 = vsel %vm7587_vm5, %v5838_v34, %v4657_v20  ;;  %v4659_v61 = vrot.slane %v4657_v20, 4  ;;  %v4587_v50 = vrot.slane %v7046_v49, 5  ;;  %v4594_v24 = vrot.slane %v7047_v37, 5  ;;  %v7049_v34 = vld [vmem:[%s7277_s6 + $0x2c] sm:$0x1] }
 0x135   : > { %v4584_v17 = vsel %vm7587_vm5, %v4582_v53, %v4583_v57  ;;  %v5839_v48 = vrot.slane %v5823_v12, 9  ;;  %v5802_v29 = vcombine.low %v4181_v1, %v4191_v25  ;;  %v5828_v19 = vrot.slane %v5812_v56, 9  ;;  %v6991_v53 = vld [vmem:[%s7277_s6 + $0x6c] sm:$0xff]   ;;  %v5824_v12 = vld [vmem:[%s7277_s6 + $0xb4] sm:$0xe] }
 0x136   : > { %6552 = vmatpush3.bf16.msra.mxu1 %v7043_v41  ;;  %v8841_v58 = vsel %vm7587_vm5, %v4659_v61, %v4660_v8  ;;  %v9234_v41 = vld [vmem:[#allocation22_spill] sm:$0xff]  ;;  %v5859_v35 = vcombine.low %v4581_v26, %v4584_v17  ;;  %v4589_v20 = vrot.slane %v4587_v50, 4  ;;  %v5829_v3 = vrot.slane %v5813_v13, 9  ;;  %v5814_v1 = vld [vmem:[%s7277_s6 + $0x3c] sm:$0xe] }
 0x137   : > { %6545 = vmatprep.subr.bf16.mxu1 %v7045_v2  ;;  %v5870_v54 = vcombine.low %v8827_v5, %v8841_v58  ;;  %v4664_v15 = vrot.slane %v9234_v41, 5  ;;  %v4596_v57 = vrot.slane %v4594_v24, 4  ;;  %v7051_v25 = vld [vmem:[%s7277_s6 + $0x40] sm:$0xf]  ;;  %v4588_v49 = vsel %vm7587_vm5, %v5828_v19, %v4587_v50  ;;  %v7053_v19 = vld [vmem:[%s7277_s6 + $0x44] sm:$0x1] }
 0x138   : > { %6486 = vmatmul.mubr.bf16.gmra.mrb[24].mxu0 %v5800_v7  ;;  %v7048_v7 = vld [vmem:[%s9163_s1 + $0x128] sm:$0xff]   ;;  %v4601_v56 = vrot.slane %v7051_v25, 5  ;;  %v4671_v13 = vrot.slane %v8546_v11, 5  ;;  %v4595_v50 = vsel %vm7587_vm5, %v5829_v3, %v4594_v24  ;;  %v7054_v11 = vld [vmem:[%s9163_s1 + $0x138] sm:$0xff]   ;;  %v5825_v24 = vld [vmem:[%s7277_s6 + $0xc0] sm:$0xe] }
 0x139   : > { %6278 = vmatmul.mubr.bf16.gmra.mrb[8].mxu1 %v6986_v40  ;;  %6489 = vmatprep.mubr.bf16.mxu0 %v5801_v4  ;;  %v4590_v40 = vrot.slane %v7049_v34, 5  ;;  %v4667_v4 = vrot.slane %v8534_v22, 5  ;;  %v8858_v8 = vsel %vm7587_vm5, %v5839_v48, %v4664_v15  ;;  %v7052_v22 = vld [vmem:[%s9163_s1 + $0x130] sm:$0xff]   ;;  %v5840_v48 = vrot.slane %v5824_v12, 9 }
 0x13a   : > { %6281 = vmatprep.mubr.bf16.mxu1 %v6988_v47  ;;  %6553 = vmatpush3.bf16.msra.mxu1 %v7045_v2  ;;  %v4666_v47 = vrot.slane %v4664_v15, 4  ;;  %v7050_v2 = vld [vmem:[%s7277_s6 + $0x38] sm:$0x1]  ;;  %v5830_v15 = vrot.slane %v5814_v1, 9  ;;  %v4604_v34 = vrot.slane %v7053_v19, 5  ;;  %v4678_v12 = vrot.slane %v8628_v52, 5 }
 0x13b   : > { %6546 = vmatprep.subr.bf16.mxu1 %v7048_v7  ;;  %v4597_v61 = vrot.slane %v7050_v2, 5  ;;  %v4591_v37 = vsel %vm7587_vm5, %v4589_v20, %v4590_v40  ;;  %v4673_v40 = vrot.slane %v4671_v13, 4  ;;  %v5515_v20 = vld [vmem:[%s7277_s6 + $0x6c] sm:$0xf]  ;;  %v6994_v19 = vld [vmem:[%s7277_s6 + $0x90] sm:$0xff]   ;;  %v2426_v21 = vshll.u32 %v7060_v0, 16 }
 0x13c   : > { %v8870_v26 = vsel %vm7587_vm5, %v4666_v47, %v4667_v4  ;;  %v5860_v4 = vcombine.low %v4588_v49, %v4591_v37  ;;  %v4602_v2 = vsel %vm7587_vm5, %v5830_v15, %v4601_v56  ;;  %v2359_v1 = vshrl.u32 %v5515_v20, 16  ;;  %v5826_v52 = vld [vmem:[%s7277_s6 + $0xcc] sm:$0xe] }
 0x13d   : > { %v5871_v17 = vcombine.low %v8858_v8, %v8870_v26  ;;  %v4598_v41 = vsel %vm7587_vm5, %v4596_v57, %v4597_v61  ;;  %v5841_v57 = vrot.slane %v5825_v24, 9  ;;  %v2362_v25 = vshll.u32 %v5515_v20, 16 }
 0x13e   : > { %6554 = vmatpush3.bf16.msra.mxu1 %v7048_v7  ;;  %v4674_v7 = vrot.slane %v8567_v28, 5  ;;  %v8890_v28 = vsel %vm7587_vm5, %v5840_v48, %v4671_v13  ;;  %v4681_v37 = vrot.slane %v8679_v27, 5  ;;  %v4680_v13 = vrot.slane %v4678_v12, 4 }
 0x13f   : > { %6547 = vmatprep.subr.bf16.mxu1 %v7052_v22  ;;  %v2364_v27 = vrot.slane %v2362_v25, 5  ;;  %v4688_v24 = vrot.slane %v8769_v14, 5 }
 0x140   : > { %6490 = vmatmul.mubr.bf16.gmra.mrb[28].mxu0 %v5802_v29  ;;  %v4603_v29 = vrot.slane %v4601_v56, 4  ;;  %v8897_v47 = vsel %vm7587_vm5, %v4673_v40, %v4674_v7  ;;  %v8911_v56 = vsel %vm7587_vm5, %v5841_v57, %v4678_v12  ;;  %v4685_v40 = vrot.slane %v8731_v32, 5  ;;  %v7056_v57 = vld [vmem:[%s7277_s6 + $0x74] sm:$0x1] }
 0x141   : > { %6282 = vmatmul.mubr.bf16.gmra.mrb[12].mxu1 %v6989_v31  ;;  %6509 = vmatprep.mubr.bf16.mxu0 %v5859_v35  ;;  %v6992_v31 = vld [vmem:[%s7277_s6 + $0x78] sm:$0xff]   ;;  %v5861_v35 = vcombine.low %v4595_v50, %v4598_v41  ;;  %v5872_v3 = vcombine.low %v8890_v28, %v8897_v47  ;;  %v8916_v50 = vsel %vm7587_vm5, %v4680_v13, %v4681_v37  ;;  %v2361_v41 = vrot.slane %v2359_v1, 4  ;;  %v7057_v1 = vld [vmem:[%s7277_s6 + $0x88] sm:$0xf] }
 0x142   : > { %6285 = vmatprep.mubr.bf16.mxu1 %v6991_v53  ;;  %6555 = vmatpush3.bf16.msra.mxu1 %v7052_v22  ;;  %v6993_v53 = vld [vmem:[%s7277_s6 + $0x84] sm:$0xff]   ;;  %v4605_v61 = vsel %vm7587_vm5, %v4603_v29, %v4604_v34  ;;  %v7055_v22 = vld [vmem:[%s7277_s6 + $0x70] sm:$0xf]  ;;  %v5873_v29 = vcombine.low %v8911_v56, %v8916_v50  ;;  %v4687_v20 = vrot.slane %v4685_v40, 4  ;;  %v2416_v25 = vshll.u32 %v7057_v1, 16 }
 0x143   : > { %6548 = vmatprep.subr.bf16.mxu1 %v7054_v11  ;;  %v2368_v49 = vshll.u32 %v7055_v22, 16  ;;  %v2372_v48 = vshrl.u32 %v7055_v22, 16  ;;  %v5862_v7 = vcombine.low %v4602_v2, %v4605_v61  ;;  %v2378_v2 = vshll.u32 %v7056_v57, 16 }
 0x144   : > { %v8938_v12 = vsel %vm7587_vm5, %v4687_v20, %v4688_v24  ;;  %v2420_v22 = vshrl.u32 %v7057_v1, 16  ;;  %v7059_v20 = vld [vmem:[%s7277_s6 + $0xa0] sm:$0xf] }
 0x145   : > { %v8918_v15 = vrot.slane %v2368_v49, 5  ;;  %v2374_v34 = vrot.slane %v2372_v48, 4  ;;  %v2468_v57 = vshrl.u32 %v7059_v20, 16 }
 0x146   : > { %6556 = vmatpush3.bf16.msra.mxu1 %v7054_v11  ;;  %v5842_v11 = vrot.slane %v5826_v52, 9 }
 0x147   : > { %v2375_v32 = vor.u32 %v2374_v34, %v8918_v15  ;;  %v2434_v34 = vshll.u32 %v5524_v62, 16 }
 0x148   : > { %6510 = vmatmul.mubr.bf16.vlgmr.msra.gmra.mrb[0].mxu0 %v5860_v4  ;;  %v6995_v4 = vld [vmem:[%s7277_s6 + $0x9c] sm:$0xff]  }
 0x149   : > { %6286 = vmatmul.mubr.bf16.gmra.mrb[16].mxu1 %v6992_v31  ;;  %6513 = vmatprep.mubr.bf16.mxu0 %v5861_v35  ;;  %v5521_v31 = vld [vmem:[%s7277_s6 + $0x84] sm:$0xf]  ;;  %v8929_v35 = vsel %vm7587_vm5, %v5842_v11, %v4685_v40  ;;  %v2376_v48 = vrot.slane %v2375_v32, 4  ;;  %v7058_v11 = vld [vmem:[%s7277_s6 + $0x94] sm:$0xf]  ;;  %v2436_v1 = vrot.slane %v2434_v34, 5 }
 0x14a   : > { %6289 = vmatprep.mubr.bf16.mxu1 %v6993_v53  ;;  %v2365_v53 = vor.u32 %v2364_v27, %v2361_v41  ;;  %v2407_v14 = vshrl.u32 %v5521_v31, 16  ;;  %v2410_v61 = vshll.u32 %v5521_v31, 16  ;;  %v5874_v49 = vcombine.low %v8929_v35, %v8938_v12 }
 0x14b   : > { %v8947_v41 = vrot.slane %v2416_v25, 5  ;;  %v2422_v27 = vrot.slane %v2420_v22, 4  ;;  %v2440_v40 = vshll.u32 %v7058_v11, 16  ;;  %v2444_v24 = vshrl.u32 %v7058_v11, 16  ;;  %v7062_v11 = vld [vmem:[%s7277_s6 + $0xa4] sm:$0x1] }
 0x14c   : > { %v2366_v37 = vrot.slane %v2365_v53, 4  ;;  %v2409_v13 = vrot.slane %v2407_v14, 4  ;;  %v2412_v52 = vrot.slane %v2410_v61, 5  ;;  %v2464_v53 = vshll.u32 %v7059_v20, 16  ;;  %v7063_v20 = vld [vmem:[%s7277_s6 + $0xac] sm:$0xf] }
 0x14d   : > { %v2423_v14 = vor.u32 %v2422_v27, %v8947_v41  ;;  %v8964_v42 = vrot.slane %v2440_v40, 5  ;;  %v2446_v43 = vrot.slane %v2444_v24, 4  ;;  %v2470_v22 = vrot.slane %v2468_v57, 4  ;;  %v5533_v24 = vld [vmem:[%s7277_s6 + $0xb4] sm:$0xf] }
 0x14e   : > { %v2474_v40 = vshll.u32 %v7062_v11, 16  ;;  %v2492_v16 = vshrl.u32 %v7063_v20, 16  ;;  %v2506_v0 = vshll.u32 %v5533_v24, 16 }
 0x14f   : > { %v2447_v27 = vor.u32 %v2446_v43, %v8964_v42 }
 0x150   : > { %6514 = vmatmul.mubr.bf16.gmra.mrb[4].mxu0 %v5862_v7  ;;  %v5527_v7 = vld [vmem:[%s7277_s6 + $0x9c] sm:$0xf] }
 0x151   : > { %6290 = vmatmul.mubr.bf16.gmra.mrb[20].mxu1 %v6994_v19  ;;  %6517 = vmatprep.mubr.bf16.mxu0 %v5863_v9  ;;  %v2380_v9 = vrot.slane %v2378_v2, 5  ;;  %v2431_v19 = vshrl.u32 %v5524_v62, 16  ;;  %v2458_v31 = vshll.u32 %v5527_v7, 16  ;;  %v2371_v2 = vsel %vm7341_vm2, %v2366_v37, %v8918_v15  ;;  %v6998_v62 = vld [vmem:[%s7277_s6 + $0xc0] sm:$0xff]  }
 0x152   : > { %6293 = vmatprep.mubr.bf16.mxu1 %v6995_v4  ;;  %v2455_v4 = vshrl.u32 %v5527_v7, 16  ;;  %v8966_v15 = vrot.slane %v2464_v53, 5  ;;  %v2488_v53 = vshll.u32 %v7063_v20, 16 }
 0x153   : > { %v2381_v32 = vsel %vm7341_vm2, %v2376_v48, %v2380_v9  ;;  %v2433_v61 = vrot.slane %v2431_v19, 4  ;;  %v2460_v25 = vrot.slane %v2458_v31, 5  ;;  %v2428_v9 = vrot.slane %v2426_v21, 5  ;;  %v7064_v21 = vld [vmem:[%s7277_s6 + $0xb8] sm:$0xf] }
 0x154   : > { %v2424_v48 = vrot.slane %v2423_v14, 4  ;;  %v2471_v34 = vor.u32 %v2470_v22, %v8966_v15  ;;  %v2512_v30 = vshll.u32 %v7064_v21, 16  ;;  %v2516_v45 = vshrl.u32 %v7064_v21, 16 }
 0x156   : > { %v2472_v14 = vrot.slane %v2471_v34, 4 }
 0x158   : > { %6518 = vmatmul.mubr.bf16.gmra.mrb[8].mxu0 %v5864_v55  ;;  %v2413_v55 = vor.u32 %v2412_v52, %v2409_v13  ;;  %v2437_v13 = vor.u32 %v2436_v1, %v2433_v61  ;;  %v7061_v52 = vld [vmem:[%s7277_s6 + $0x98] sm:$0x1]  ;;  %v2476_v61 = vrot.slane %v2474_v40, 5 }
 0x159   : > { %6294 = vmatmul.mubr.bf16.gmra.mrb[24].mxu1 %v6996_v46  ;;  %6521 = vmatprep.mubr.bf16.mxu0 %v5865_v18  ;;  %v2457_v18 = vrot.slane %v2455_v4, 4  ;;  %v5563_v46 = vcombine.low %v2371_v2, %v2381_v32  ;;  %v2450_v7 = vshll.u32 %v7061_v52, 16  ;;  %v2503_v32 = vshrl.u32 %v5533_v24, 16 }
 0x15a   : > { %6297 = vmatprep.mubr.bf16.mxu1 %v6997_v10  ;;  %v2414_v37 = vrot.slane %v2413_v55, 4  ;;  %v5530_v10 = vld [vmem:[%s7277_s6 + $0xa8] sm:$0xf]  ;;  %v2438_v57 = vrot.slane %v2437_v13, 4  ;;  %v2477_v33 = vsel %vm7341_vm2, %v2472_v14, %v2476_v61 }
 0x15b   : > { %v2461_v19 = vor.u32 %v2460_v25, %v2457_v18  ;;  %v2479_v4 = vshrl.u32 %v5530_v10, 16  ;;  %v2482_v31 = vshll.u32 %v5530_v10, 16  ;;  %v2452_v2 = vrot.slane %v2450_v7, 5 }
 0x15c   : > { %v2419_v44 = vsel %vm7341_vm2, %v2414_v37, %v8947_v41  ;;  %v2490_v18 = vrot.slane %v2488_v53, 5  ;;  %v2494_v25 = vrot.slane %v2492_v16, 4  ;;  %v2505_v22 = vrot.slane %v2503_v32, 4  ;;  %v5536_v37 = vld [vmem:[%s7277_s6 + $0xc0] sm:$0xf] }
 0x15d   : > { %v2462_v55 = vrot.slane %v2461_v19, 4  ;;  %v2481_v1 = vrot.slane %v2479_v4, 4  ;;  %v2484_v43 = vrot.slane %v2482_v31, 5  ;;  %v2527_v10 = vshrl.u32 %v5536_v37, 16  ;;  %v7066_v19 = vld [vmem:[%s7277_s6 + $0xc4] sm:$0xf] }
 0x15e   : > { %v2536_v34 = vshll.u32 %v7066_v19, 16 }
 0x15f   : > { %v2467_v52 = vsel %vm7341_vm2, %v2462_v55, %v8966_v15  ;;  %v2485_v6 = vor.u32 %v2484_v43, %v2481_v1  ;;  %v2540_v15 = vshrl.u32 %v7066_v19, 16  ;;  %v2529_v20 = vrot.slane %v2527_v10, 4 }
 0x160   : > { %6522 = vmatmul.mubr.bf16.gmra.mrb[12].mxu0 %v5866_v39  ;;  %v2429_v39 = vsel %vm7341_vm2, %v2424_v48, %v2428_v9  ;;  %v2518_v9 = vrot.slane %v2516_v45, 4  ;;  %v2443_v48 = vsel %vm7341_vm2, %v2438_v57, %v8964_v42  ;;  %v7065_v42 = vld [vmem:[%s7277_s6 + $0xb0] sm:$0x1]  ;;  %v5567_v59 = vcombine.low %v2467_v52, %v2477_v33  ;;  %v7068_v45 = vld [vmem:[%s7277_s6 + $0xc8] sm:$0x1] }
 0x161   : > { %6298 = vmatmul.mubr.bf16.gmra.mrb[28].mxu1 %v6998_v62  ;;  %6525 = vmatprep.mubr.bf16.mxu0 %v5867_v36  ;;  %v2448_v36 = vrot.slane %v2447_v27, 4  ;;  %v5565_v41 = vcombine.low %v2419_v44, %v2429_v39  ;;  %v2508_v62 = vrot.slane %v2506_v0, 5  ;;  %v2498_v7 = vshll.u32 %v7065_v42, 16 }
 0x162   : > { %6333 = vmatprep.mubr.bf16.mxu1 %v5563_v46  ;;  %v2514_v46 = vrot.slane %v2512_v30, 5  ;;  %v2530_v27 = vshll.u32 %v5536_v37, 16  ;;  %v2486_v23 = vrot.slane %v2485_v6, 4  ;;  %v2538_v16 = vrot.slane %v2536_v34, 5 }
 0x163   : > { %v2453_v13 = vsel %vm7341_vm2, %v2448_v36, %v2452_v2  ;;  %v2509_v11 = vor.u32 %v2508_v62, %v2505_v22  ;;  %v2500_v31 = vrot.slane %v2498_v7, 5  ;;  %v2542_v44 = vrot.slane %v2540_v15, 4 }
 0x164   : > { %v2519_v40 = vor.u32 %v2518_v9, %v2514_v46  ;;  %v5566_v4 = vcombine.low %v2443_v48, %v2453_v13  ;;  %v2532_v53 = vrot.slane %v2530_v27, 5  ;;  %v2491_v32 = vsel %vm7341_vm2, %v2486_v23, %v2490_v18 }
 0x165   : > { %v2510_v39 = vrot.slane %v2509_v11, 4  ;;  %v2543_v30 = vor.u32 %v2542_v44, %v2538_v16  ;;  %v2546_v36 = vshll.u32 %v7068_v45, 16 }
 0x166   : > { %v2520_v57 = vrot.slane %v2519_v40, 4  ;;  %v2533_v21 = vor.u32 %v2532_v53, %v2529_v20 }
 0x167   : > { %v2515_v5 = vsel %vm7341_vm2, %v2510_v39, %v2514_v46  ;;  %v2548_v55 = vrot.slane %v2546_v36, 5 }
 0x168   : > { %6526 = vmatmul.mubr.bf16.gmra.mrb[16].mxu0 %v5868_v63  ;;  %v2495_v63 = vor.u32 %v2494_v25, %v2490_v18  ;;  %v2534_v26 = vrot.slane %v2533_v21, 4 }
 0x169   : > { %6334 = vmatmul.mubr.bf16.vlgmr.msra.gmra.mrb[16].mxu1 %v8789_v51  ;;  %6529 = vmatprep.mubr.bf16.mxu0 %v5869_v60  ;;  %v7067_v51 = vld [vmem:[%s7277_s6 + $0xbc] sm:$0x1] }
 0x16a   : > { %6337 = vmatprep.mubr.bf16.mxu1 %v5565_v41  ;;  %v2522_v24 = vshll.u32 %v7067_v51, 16  ;;  %v2496_v60 = vrot.slane %v2495_v63, 4  ;;  %v2539_v14 = vsel %vm7341_vm2, %v2534_v26, %v2538_v16 }
 0x16c   : > { %v2524_v2 = vrot.slane %v2522_v24, 5  ;;  %v2501_v0 = vsel %vm7341_vm2, %v2496_v60, %v2500_v31 }
 0x16e   : > { %v2525_v58 = vsel %vm7341_vm2, %v2520_v57, %v2524_v2 }
 0x16f   : > { %v5569_v8 = vcombine.low %v2515_v5, %v2525_v58 }
 0x170   : > { %6530 = vmatmul.mubr.bf16.gmra.mrb[20].mxu0 %v5870_v54  ;;  %v5568_v54 = vcombine.low %v2491_v32, %v2501_v0 }
 0x171   : > { %6338 = vmatmul.mubr.bf16.gmra.mrb[20].mxu1 %v5566_v4  ;;  %6533 = vmatprep.mubr.bf16.mxu0 %v5871_v17  ;;  %v2544_v17 = vrot.slane %v2543_v30, 4 }
 0x172   : > { %6341 = vmatprep.mubr.bf16.mxu1 %v5567_v59 }
 0x173   : > { %v2549_v61 = vsel %vm7341_vm2, %v2544_v17, %v2548_v55 }
 0x174   : > { %v5570_v1 = vcombine.low %v2539_v14, %v2549_v61 }
 0x178   : > { %6534 = vmatmul.mubr.bf16.gmra.mrb[24].mxu0 %v5872_v3 }
 0x179   : > { %6342 = vmatmul.mubr.bf16.gmra.mrb[24].mxu1 %v5568_v54  ;;  %6537 = vmatprep.mubr.bf16.mxu0 %v5873_v29 }
 0x17a   : > { %6345 = vmatprep.mubr.bf16.mxu1 %v5569_v8 }
 0x180   : > { %6538 = vmatmul.mubr.bf16.gmra.mrb[28].mxu0 %v5874_v49 }
 0x181   : > { %6346 = vmatmul.mubr.bf16.gmra.mrb[28].mxu1 %v5570_v1 }
 0x1fc   : > { %v6271_v28 = vpop.f32.mrb[0].mxu1 }
 0x1fd   : > { %v1959_v47 = vpop.f32.mrb[1].mxu1 }
 0x1fe   : > { %v6272_v3 = vpop.f32.mrb[2].mxu1 }
 0x1ff   : > { %v1962_v43 = vpop.f32.mrb[3].mxu1 }
 0x204   : > { %v6275_v18 = vpop.f32.mrb[4].mxu1 }
 0x205   : > { %v1975_v56 = vpop.f32.mrb[5].mxu1 }
 0x206   : > { %v6276_v50 = vpop.f32.mrb[6].mxu1 }
 0x207   : > { %v1978_v29 = vpop.f32.mrb[7].mxu1 }
 0x20c   : > { %v6279_v25 = vpop.f32.mrb[8].mxu1 }
 0x20d   : > { %v1991_v41 = vpop.f32.mrb[9].mxu1 }
 0x20e   : > { %v6280_v38 = vpop.f32.mrb[10].mxu1 }
 0x20f   : > { %v1994_v22 = vpop.f32.mrb[11].mxu1 }
 0x214   : > { %v9037_v62 = vpop.f32.mrb[12].mxu1 }
 0x215   : > { %v9039_v35 = vpop.f32.mrb[13].mxu1 }
 0x216   : > { %v9041_v12 = vpop.f32.mrb[14].mxu1 }
 0x217   : > { %v9043_v49 = vpop.f32.mrb[15].mxu1 }
 0x21b   : > { %v6511_v46 = vpop.f32.mrb[0].mxu0 }
 0x21c   : > { %v6557_v9 = vadd.f32 %v6511_v46, %v6271_v28  ;;  %v4853_v37 = vpop.f32.mrb[1].mxu0 }
 0x21d   : > { %v6558_v48 = vadd.f32 %v4853_v37, %v1959_v47  ;;  %v6512_v13 = vpop.f32.mrb[2].mxu0 }
 0x21e   : > { %5014 = vst [vmem:[%s7279_s7 + $0x10] sm:$0xff] %v6557_v9  ;;  %v6559_v52 = vadd.f32 %v6512_v13, %v6272_v3  ;;  %v4856_v33 = vpop.f32.mrb[3].mxu0  ;;  %v5087_v10 = vmul.f32 %v6557_v9, %v6557_v9 }
 0x21f   : > { %5012 = vst [vmem:[%s7279_s7] sm:$0xff] %v6558_v48  ;;  %v6560_v6 = vadd.f32 %v4856_v33, %v1962_v43  ;;  %v5085_v63 = vmul.f32 %v6558_v48, %v6558_v48 }
 0x220   : > { %5015 = vst [vmem:[%s7279_s7 + $0x18] sm:$0xff] %v6559_v52  ;;  %v5088_v40 = vmul.f32 %v6559_v52, %v6559_v52 }
 0x221   : > { %5013 = vst [vmem:[%s7279_s7 + $0x8] sm:$0xff] %v6560_v6  ;;  %v5045_v42 = vadd.f32 %v6560_v6, %v6558_v48  ;;  %v5086_v7 = vmul.f32 %v6560_v6, %v6560_v6 }
 0x223   : > { %v5046_v27 = vadd.f32 %v6557_v9, %v5045_v42  ;;  %v5117_v19 = vadd.f32 %v5086_v7, %v5085_v63  ;;  %v6515_v34 = vpop.f32.mrb[4].mxu0 }
 0x224   : > { %v6561_v15 = vadd.f32 %v6515_v34, %v6275_v18  ;;  %v4869_v11 = vpop.f32.mrb[5].mxu0 }
 0x225   : > { %v5118_v51 = vadd.f32 %v5117_v19, %v5087_v10  ;;  %v6562_v24 = vadd.f32 %v4869_v11, %v1975_v56  ;;  %v5047_v4 = vadd.f32 %v6559_v52, %v5046_v27  ;;  %v6516_v59 = vpop.f32.mrb[6].mxu0 }
 0x226   : > { %5018 = vst [vmem:[%s7279_s7 + $0x30] sm:$0xff] %v6561_v15  ;;  %v6563_v23 = vadd.f32 %v6516_v59, %v6276_v50  ;;  %v4872_v60 = vpop.f32.mrb[7].mxu0  ;;  %v5091_v2 = vmul.f32 %v6561_v15, %v6561_v15 }
 0x227   : > { %5016 = vst [vmem:[%s7279_s7 + $0x20] sm:$0xff] %v6562_v24  ;;  %v5048_v31 = vadd.f32 %v6562_v24, %v5047_v4  ;;  %v5089_v20 = vmul.f32 %v6562_v24, %v6562_v24  ;;  %v5119_v53 = vadd.f32 %v5118_v51, %v5088_v40  ;;  %v6564_v16 = vadd.f32 %v4872_v60, %v1978_v29 }
 0x228   : > { %5019 = vst [vmem:[%s7279_s7 + $0x38] sm:$0xff] %v6563_v23  ;;  %v5092_v36 = vmul.f32 %v6563_v23, %v6563_v23 }
 0x229   : > { %v5120_v44 = vadd.f32 %v5119_v53, %v5089_v20  ;;  %5017 = vst [vmem:[%s7279_s7 + $0x28] sm:$0xff] %v6564_v16  ;;  %v5049_v39 = vadd.f32 %v6564_v16, %v5048_v31  ;;  %v5090_v57 = vmul.f32 %v6564_v16, %v6564_v16 }
 0x22b   : > { %v5050_v32 = vadd.f32 %v6561_v15, %v5049_v39  ;;  %v5121_v0 = vadd.f32 %v5120_v44, %v5090_v57  ;;  %v6519_v21 = vpop.f32.mrb[8].mxu0 }
 0x22c   : > { %v6565_v30 = vadd.f32 %v6519_v21, %v6279_v25  ;;  %v4885_v45 = vpop.f32.mrb[9].mxu0 }
 0x22d   : > { %v5122_v5 = vadd.f32 %v5121_v0, %v5091_v2  ;;  %v6566_v58 = vadd.f32 %v4885_v45, %v1991_v41  ;;  %v5051_v54 = vadd.f32 %v6563_v23, %v5050_v32  ;;  %v6520_v8 = vpop.f32.mrb[10].mxu0 }
 0x22e   : > { %5022 = vst [vmem:[%s7279_s7 + $0x50] sm:$0xff] %v6565_v30  ;;  %v6567_v26 = vadd.f32 %v6520_v8, %v6280_v38  ;;  %v4888_v17 = vpop.f32.mrb[11].mxu0  ;;  %v5095_v43 = vmul.f32 %v6565_v30, %v6565_v30 }
 0x22f   : > { %5020 = vst [vmem:[%s7279_s7 + $0x40] sm:$0xff] %v6566_v58  ;;  %v5052_v55 = vadd.f32 %v6566_v58, %v5051_v54  ;;  %v5093_v14 = vmul.f32 %v6566_v58, %v6566_v58  ;;  %v5123_v61 = vadd.f32 %v5122_v5, %v5092_v36  ;;  %v6568_v1 = vadd.f32 %v4888_v17, %v1994_v22 }
 0x230   : > { %5023 = vst [vmem:[%s7279_s7 + $0x58] sm:$0xff] %v6567_v26  ;;  %v5096_v41 = vmul.f32 %v6567_v26, %v6567_v26 }
 0x231   : > { %v5124_v28 = vadd.f32 %v5123_v61, %v5093_v14  ;;  %5021 = vst [vmem:[%s7279_s7 + $0x48] sm:$0xff] %v6568_v1  ;;  %v5053_v47 = vadd.f32 %v6568_v1, %v5052_v55  ;;  %v5094_v3 = vmul.f32 %v6568_v1, %v6568_v1 }
 0x233   : > { %v5054_v18 = vadd.f32 %v6565_v30, %v5053_v47  ;;  %v5125_v56 = vadd.f32 %v5124_v28, %v5094_v3  ;;  %v6523_v50 = vpop.f32.mrb[12].mxu0 }
 0x234   : > { %v6569_v29 = vadd.f32 %v6523_v50, %v9037_v62  ;;  %v4901_v25 = vpop.f32.mrb[13].mxu0 }
 0x235   : > { %v5126_v38 = vadd.f32 %v5125_v56, %v5095_v43  ;;  %v6570_v22 = vadd.f32 %v4901_v25, %v9039_v35  ;;  %v5055_v46 = vadd.f32 %v6567_v26, %v5054_v18  ;;  %v6524_v9 = vpop.f32.mrb[14].mxu0 }
 0x236   : > { %5026 = vst [vmem:[%s7279_s7 + $0x70] sm:$0xff] %v6569_v29  ;;  %v6571_v37 = vadd.f32 %v6524_v9, %v9041_v12  ;;  %v4904_v48 = vpop.f32.mrb[15].mxu0  ;;  %v5099_v7 = vmul.f32 %v6569_v29, %v6569_v29 }
 0x237   : > { %5024 = vst [vmem:[%s7279_s7 + $0x60] sm:$0xff] %v6570_v22  ;;  %v5056_v13 = vadd.f32 %v6570_v22, %v5055_v46  ;;  %v5097_v52 = vmul.f32 %v6570_v22, %v6570_v22  ;;  %v5127_v33 = vadd.f32 %v5126_v38, %v5096_v41  ;;  %v6572_v6 = vadd.f32 %v4904_v48, %v9043_v49 }
 0x238   : > { %5027 = vst [vmem:[%s7279_s7 + $0x78] sm:$0xff] %v6571_v37  ;;  %v5100_v34 = vmul.f32 %v6571_v37, %v6571_v37 }
 0x239   : > { %v5128_v62 = vadd.f32 %v5127_v33, %v5097_v52  ;;  %5025 = vst [vmem:[%s7279_s7 + $0x68] sm:$0xff] %v6572_v6  ;;  %v5057_v63 = vadd.f32 %v6572_v6, %v5056_v13  ;;  %v5098_v42 = vmul.f32 %v6572_v6, %v6572_v6 }
 0x23b   : > { %v5058_v35 = vadd.f32 %v6569_v29, %v5057_v63  ;;  %v5129_v10 = vadd.f32 %v5128_v62, %v5098_v42  ;;  %v6527_v27 = vpop.f32.mrb[16].mxu0 }
 0x23c   : > { %v6335_v19 = vpop.f32.mrb[16].mxu1  ;;  %v4917_v12 = vpop.f32.mrb[17].mxu0 }
 0x23d   : > { %v5130_v15 = vadd.f32 %v5129_v10, %v5099_v7  ;;  %v6573_v11 = vadd.f32 %v6527_v27, %v6335_v19  ;;  %v2777_v40 = vpop.f32.mrb[17].mxu1  ;;  %v5059_v49 = vadd.f32 %v6571_v37, %v5058_v35  ;;  %v6528_v51 = vpop.f32.mrb[18].mxu0 }
 0x23e   : > { %v6574_v24 = vadd.f32 %v4917_v12, %v2777_v40  ;;  %v6336_v4 = vpop.f32.mrb[18].mxu1  ;;  %v4920_v59 = vpop.f32.mrb[19].mxu0 }
 0x23f   : > { %5030 = vst [vmem:[%s7279_s7 + $0x90] sm:$0xff] %v6573_v11  ;;  %v5131_v23 = vadd.f32 %v5130_v15, %v5100_v34  ;;  %v6575_v60 = vadd.f32 %v6528_v51, %v6336_v4  ;;  %v2780_v31 = vpop.f32.mrb[19].mxu1  ;;  %v5103_v32 = vmul.f32 %v6573_v11, %v6573_v11 }
 0x240   : > { %5028 = vst [vmem:[%s7279_s7 + $0x80] sm:$0xff] %v6574_v24  ;;  %v5060_v20 = vadd.f32 %v6574_v24, %v5059_v49  ;;  %v5101_v53 = vmul.f32 %v6574_v24, %v6574_v24  ;;  %v6576_v16 = vadd.f32 %v4920_v59, %v2780_v31 }
 0x241   : > { %5031 = vst [vmem:[%s7279_s7 + $0x98] sm:$0xff] %v6575_v60  ;;  %v5104_v54 = vmul.f32 %v6575_v60, %v6575_v60 }
 0x242   : > { %v5132_v44 = vadd.f32 %v5131_v23, %v5101_v53  ;;  %5029 = vst [vmem:[%s7279_s7 + $0x88] sm:$0xff] %v6576_v16  ;;  %v5061_v39 = vadd.f32 %v6576_v16, %v5060_v20  ;;  %v5102_v57 = vmul.f32 %v6576_v16, %v6576_v16 }
 0x243   : > { %v6531_v2 = vpop.f32.mrb[20].mxu0 }
 0x244   : > { %v5062_v0 = vadd.f32 %v6573_v11, %v5061_v39  ;;  %v5133_v21 = vadd.f32 %v5132_v44, %v5102_v57  ;;  %v6339_v30 = vpop.f32.mrb[20].mxu1  ;;  %v4933_v45 = vpop.f32.mrb[21].mxu0 }
 0x245   : > { %v6577_v36 = vadd.f32 %v6531_v2, %v6339_v30  ;;  %v2793_v5 = vpop.f32.mrb[21].mxu1  ;;  %v6532_v58 = vpop.f32.mrb[22].mxu0 }
 0x246   : > { %v5134_v8 = vadd.f32 %v5133_v21, %v5103_v32  ;;  %v6578_v26 = vadd.f32 %v4933_v45, %v2793_v5  ;;  %v5063_v17 = vadd.f32 %v6575_v60, %v5062_v0  ;;  %v6340_v55 = vpop.f32.mrb[22].mxu1  ;;  %v4936_v14 = vpop.f32.mrb[23].mxu0 }
 0x247   : > { %5034 = vst [vmem:[%s7279_s7 + $0xb0] sm:$0xff] %v6577_v36  ;;  %v6579_v61 = vadd.f32 %v6532_v58, %v6340_v55  ;;  %v2796_v1 = vpop.f32.mrb[23].mxu1  ;;  %v5107_v25 = vmul.f32 %v6577_v36, %v6577_v36 }
 0x248   : > { %5032 = vst [vmem:[%s7279_s7 + $0xa0] sm:$0xff] %v6578_v26  ;;  %v5064_v28 = vadd.f32 %v6578_v26, %v5063_v17  ;;  %v5105_v47 = vmul.f32 %v6578_v26, %v6578_v26  ;;  %v5135_v3 = vadd.f32 %v5134_v8, %v5104_v54  ;;  %v6580_v43 = vadd.f32 %v4936_v14, %v2796_v1 }
 0x249   : > { %5035 = vst [vmem:[%s7279_s7 + $0xb8] sm:$0xff] %v6579_v61  ;;  %v5108_v13 = vmul.f32 %v6579_v61, %v6579_v61 }
 0x24a   : > { %v5136_v18 = vadd.f32 %v5135_v3, %v5105_v47  ;;  %5033 = vst [vmem:[%s7279_s7 + $0xa8] sm:$0xff] %v6580_v43  ;;  %v5065_v56 = vadd.f32 %v6580_v43, %v5064_v28  ;;  %v5106_v50 = vmul.f32 %v6580_v43, %v6580_v43 }
 0x24b   : > { %v6535_v29 = vpop.f32.mrb[24].mxu0 }
 0x24c   : > { %v5066_v41 = vadd.f32 %v6577_v36, %v5065_v56  ;;  %v5137_v38 = vadd.f32 %v5136_v18, %v5106_v50  ;;  %v6343_v22 = vpop.f32.mrb[24].mxu1  ;;  %v4949_v46 = vpop.f32.mrb[25].mxu0 }
 0x24d   : > { %v6581_v9 = vadd.f32 %v6535_v29, %v6343_v22  ;;  %v2809_v37 = vpop.f32.mrb[25].mxu1  ;;  %v6536_v48 = vpop.f32.mrb[26].mxu0  ;;  %v5044_v29 = vld [vmem:[#allocation4] sm:$0x1] }
 0x24e   : > { %v5138_v52 = vadd.f32 %v5137_v38, %v5107_v25  ;;  %v6582_v33 = vadd.f32 %v4949_v46, %v2809_v37  ;;  %v5067_v6 = vadd.f32 %v6579_v61, %v5066_v41  ;;  %v6344_v62 = vpop.f32.mrb[26].mxu1  ;;  %v4952_v63 = vpop.f32.mrb[27].mxu0  ;;  %v5084_v38 = vld [vmem:[#allocation4 + $0x1] sm:$0x1] }
 0x24f   : > { %5038 = vst [vmem:[%s7279_s7 + $0xd0] sm:$0xff] %v6581_v9  ;;  %v6583_v42 = vadd.f32 %v6536_v48, %v6344_v62  ;;  %v2812_v7 = vpop.f32.mrb[27].mxu1  ;;  %v5111_v40 = vmul.f32 %v6581_v9, %v6581_v9 }
 0x250   : > { %5036 = vst [vmem:[%s7279_s7 + $0xc0] sm:$0xff] %v6582_v33  ;;  %v5068_v35 = vadd.f32 %v6582_v33, %v5067_v6  ;;  %v5109_v10 = vmul.f32 %v6582_v33, %v6582_v33  ;;  %v5139_v27 = vadd.f32 %v5138_v52, %v5108_v13  ;;  %v6584_v19 = vadd.f32 %v4952_v63, %v2812_v7 }
 0x251   : > { %5039 = vst [vmem:[%s7279_s7 + $0xd8] sm:$0xff] %v6583_v42  ;;  %v5112_v31 = vmul.f32 %v6583_v42, %v6583_v42 }
 0x252   : > { %v5140_v12 = vadd.f32 %v5139_v27, %v5109_v10  ;;  %5037 = vst [vmem:[%s7279_s7 + $0xc8] sm:$0xff] %v6584_v19  ;;  %v5069_v34 = vadd.f32 %v6584_v19, %v5068_v35  ;;  %v5110_v15 = vmul.f32 %v6584_v19, %v6584_v19 }
 0x253   : > { %v6539_v11 = vpop.f32.mrb[28].mxu0 }
 0x254   : > { %v5070_v49 = vadd.f32 %v6581_v9, %v5069_v34  ;;  %v5141_v51 = vadd.f32 %v5140_v12, %v5110_v15  ;;  %v6347_v24 = vpop.f32.mrb[28].mxu1  ;;  %v4965_v4 = vpop.f32.mrb[29].mxu0 }
 0x255   : > { %v6585_v59 = vadd.f32 %v6539_v11, %v6347_v24  ;;  %v2825_v23 = vpop.f32.mrb[29].mxu1  ;;  %v6540_v60 = vpop.f32.mrb[30].mxu0 }
 0x256   : > { %v5142_v20 = vadd.f32 %v5141_v51, %v5111_v40  ;;  %v6586_v53 = vadd.f32 %v4965_v4, %v2825_v23  ;;  %v5071_v16 = vadd.f32 %v6583_v42, %v5070_v49  ;;  %v6348_v44 = vpop.f32.mrb[30].mxu1  ;;  %v4968_v39 = vpop.f32.mrb[31].mxu0 }
 0x257   : > { %5042 = vst [vmem:[%s7279_s7 + $0xf0] sm:$0xff] %v6585_v59  ;;  %v6587_v57 = vadd.f32 %v6540_v60, %v6348_v44  ;;  %v2828_v2 = vpop.f32.mrb[31].mxu1  ;;  %v5115_v58 = vmul.f32 %v6585_v59, %v6585_v59 }
 0x258   : > { %5040 = vst [vmem:[%s7279_s7 + $0xe0] sm:$0xff] %v6586_v53  ;;  %v5072_v32 = vadd.f32 %v6586_v53, %v5071_v16  ;;  %v5113_v0 = vmul.f32 %v6586_v53, %v6586_v53  ;;  %v5143_v21 = vadd.f32 %v5142_v20, %v5112_v31  ;;  %v6588_v30 = vadd.f32 %v4968_v39, %v2828_v2 }
 0x259   : > { %5043 = vst [vmem:[%s7279_s7 + $0xf8] sm:$0xff] %v6587_v57  ;;  %v5116_v26 = vmul.f32 %v6587_v57, %v6587_v57 }
 0x25a   : > { %v5144_v45 = vadd.f32 %v5143_v21, %v5113_v0  ;;  %5041 = vst [vmem:[%s7279_s7 + $0xe8] sm:$0xff] %v6588_v30  ;;  %v5073_v36 = vadd.f32 %v6588_v30, %v5072_v32  ;;  %v5114_v5 = vmul.f32 %v6588_v30, %v6588_v30 }
 0x25c   : > { %v5074_v54 = vadd.f32 %v6585_v59, %v5073_v36  ;;  %v5145_v8 = vadd.f32 %v5144_v45, %v5114_v5 }
 0x25e   : > { %v5075_v17 = vadd.f32 %v6587_v57, %v5074_v54  ;;  %v5146_v55 = vadd.f32 %v5145_v8, %v5115_v58 }
 0x260   : > { %v5076_v14 = vrot.slane %v5075_v17, 4  ;;  %v5147_v61 = vadd.f32 %v5146_v55, %v5116_v26 }
 0x262   : > { %v5077_v1 = vadd.f32 %v5076_v14, %v5075_v17  ;;  %v5148_v28 = vrot.slane %v5147_v61, 4 }
 0x264   : > { %v5078_v47 = vrot.slane %v5077_v1, 2  ;;  %v5149_v3 = vadd.f32 %v5148_v28, %v5147_v61 }
 0x266   : > { %v5079_v43 = vadd.f32 %v5078_v47, %v5077_v1  ;;  %v5150_v18 = vrot.slane %v5149_v3, 2 }
 0x268   : > { %v5080_v56 = vrot.slane %v5079_v43, 1  ;;  %v5151_v50 = vadd.f32 %v5150_v18, %v5149_v3 }
 0x26a   : > { %v5081_v25 = vadd.f32 %v5080_v56, %v5079_v43  ;;  %v5152_v41 = vrot.slane %v5151_v50, 1  ;;  %5157 = sbr.rel (!%p187_p13) target bundleno = 652 (0x28c), region = 36 }
 0x26c   : > { %v5082_v22 = vadd.f32 %v5081_v25, %v5044_v29  ;;  %v5153_v46 = vadd.f32 %v5152_v41, %v5151_v50 }
 0x26e   : > { %5083 = vst [vmem:[#allocation4] sm:$0x1] %v5082_v22  ;;  %v5154_v9 = vadd.f32 %v5153_v46, %v5084_v38 }
 0x270   : > { %5155 = vst [vmem:[#allocation4 + $0x1] sm:$0x1] %v5154_v9 }
 0x275   : > { %v5158_v37 = vld [vmem:[#allocation4] sm:$0x1] }
 0x276   : > { %v5160_v13 = vmul.f32 0.001953125, %v5158_v37 }
 0x277   : > { %v5159_v48 = vld [vmem:[#allocation4 + $0x1] sm:$0x1] }
 0x278   : > { %v5161_v52 = vmul.f32 0.001953125, %v5159_v48  ;;  %v5162_v33 = vmul.f32 %v5160_v13, %v5160_v13  ;;  %5165 = vst [vmem:[#allocation4] sm:$0x1] %v5160_v13 }
 0x27a   : > { %v5163_v6 = vsub.f32 %v5161_v52, %v5162_v33 }
 0x27c   : > { %v5164_v62 = vmax.f32 %v5163_v6, 0.0 }
 0x27e   : > { %v5166_v63 = vadd.f32 1e-05, %v5164_v62 }
 0x280   : > { %7069 = vrsqrt.f32 %v5166_v63 }
 0x28a   : > { %v7070_v42 = vpop.eup %7069 }
 0x28b   : > { %5168 = vst [vmem:[#allocation4 + $0x1] sm:$0x1] %v7070_v42 }
 0x28c PF: > { %s5892_s6 = sshll.u32 %s7171_s15, 12  ;;  %s5185_s24 = sshll.u32 %s7279_s7, 4  ;;  %s9090_s24 = int_to_ptr.vmem [resolvable:$true] %s5185_s24 }
 0x28d   : > { %s9087_s21 = scalar_lea.hbm %s9164_s2, %s5892_s6  ;;  %s9094_s28 = scalar_lea.sflag [#allocation3], %s172_s27 }
 0x28e   : > { %s7071_s29 = scalar_lea.vmem %s9090_s24, 4096  ;;  %s7182_s15 = smov [#allocation2]  }
 0x28f   : > { %p7072_p0 = scmp.ne.s32.totalorder %s9090_s24, %s7071_s29  ;;  %s7075_s30 = sshll.u32 %s7182_s15, 4  ;;  %s7076_s30 = int_to_ptr.vmem [resolvable:$false] %s7075_s30 }
 0x290   : > { %s7077_s4 = scalar_lea.vmem %s7076_s30, 8192  ;;  %p7078_p5 = scmp.lt.s32.totalorder %s9090_s24, %s7076_s30 }
 0x291   : > { %p7073_p1 = pnand %p7072_p0, %p7252_p4  ;;  %p7079_p6 = scmp.lt.s32.totalorder %s7077_s4, %s7071_s29 }
 0x293   : > { %p7074_p3 = pneg %p7073_p1  ;;  %p7080_p7 = por %p7079_p6, %p7078_p5 }
 0x295   : > { %p7081_p9 = pnand %p7080_p7, %p7074_p3 }
 0x297   : > { %7084 = shalt.err (!%p7081_p9)
}
 0x298   : > { %s7085_s27 = scalar_lea.hbm %s9087_s21, 4096  ;;  %s7089_s8 = scalar_lea.hbm %s9164_s2, 8192 }
 0x299   : > { %p7086_p10 = scmp.ne.s32.totalorder %s9087_s21, %s7085_s27  ;;  %p7090_p13 = scmp.lt.u32.totalorder %s9087_s21, %s9164_s2 }
 0x29a   : > { %p7091_p0 = scmp.lt.u32.totalorder %s7089_s8, %s7085_s27  ;;  %p7093_p3 = scmp.lt.u32.totalorder %s7085_s27, %s9087_s21 }
 0x29b   : > { %p7087_p11 = pnand %p7086_p10, %p7252_p4 }
 0x29c   : > { %p7092_p1 = por %p7091_p0, %p7090_p13 }
 0x29d   : > { %p7088_p12 = pneg %p7087_p11 }
 0x29e   : > { %p7094_p5 = por %p7093_p3, %p7092_p1 }
 0x2a0   : > { %p7095_p6 = pnand %p7094_p5, %p7088_p12 }
 0x2a2   : > { %7098 = shalt.err (!%p7095_p6)
}
 0x2a3   : > { %s7183_s11 = smov 128   ;;  %s7184_s6 = smov 8  }
 0x2a4   : > { %6814 = dma.vmem_to_hbm [thread:$0]  (%p7252_p4), %s9090_s24, 4096, %s9087_s21, %s9094_s28, %s7183_s11, %s7183_s11, %s7184_s6  }
 0x2a5   : > { %s7185_s18 = smov [#allocation4]  }
 0x2a6   : > { %s5199_s19 = sshll.u32 %s7185_s18, 4  ;;  %s5200_s19 = int_to_ptr.vmem [resolvable:$true] %s5199_s19 }
 0x2a7   : > { %s7099_s29 = scalar_lea.vmem %s5200_s19, 32  ;;  %p7106_p11 = scmp.lt.s32.totalorder %s5200_s19, %s5200_s19 }
 0x2a8   : > { %p7100_p7 = scmp.ne.s32.totalorder %s5200_s19, %s7099_s29  ;;  %p7107_p12 = scmp.lt.s32.totalorder %s7099_s29, %s7099_s29 }
 0x2aa   : > { %p7101_p9 = pnand %p7100_p7, %p7242_p2  ;;  %p7108_p13 = por %p7107_p12, %p7106_p11 }
 0x2ac   : > { %p7102_p10 = pneg %p7101_p9 }
 0x2ae   : > { %p7109_p0 = pnand %p7108_p13, %p7102_p10 }
 0x2b0   : > { %7112 = shalt.err (!%p7109_p0)
}
 0x2b1   : > { %s7113_s4 = scalar_lea.hbm %s9165_s3, 32 }
 0x2b2   : > { %p7114_p4 = scmp.ne.s32.totalorder %s9165_s3, %s7113_s4  ;;  %p7119_p5 = scmp.lt.u32.totalorder %s7113_s4, %s9165_s3 }
 0x2b4   : > { %p7115_p1 = pnand %p7114_p4, %p7242_p2 }
 0x2b6   : > { %p7116_p3 = pneg %p7115_p1 }
 0x2b8   : > { %p7121_p6 = pnand %p7119_p5, %p7116_p3 }
 0x2ba   : > { %7124 = shalt.err (!%p7121_p6)
}
 0x2bb   : > { %6816 = dma.vmem_to_hbm [thread:$0]  (%p7242_p2), %s5200_s19, 32, %s9165_s3, [#allocation5]  }
 0x2bc   : > { %7150 = dma.done.wait (%p7242_p2), [#allocation5], 32  }
 0x2bd   : > { %7152 = vsyncadd (%p7242_p2), [#allocation5], 4294967264 }
 0x2be PF: > { %p6826_p7 = scmp.ge.s32.totalorder %s7179_s17, 2  ;;  %s5215_s5 = sand.u32 1, %s7159_s12  }
 0x2bf   : > { %s5216_s8 = scalar_lea.sflag [#allocation3], %s5215_s5 }
 0x2c0   : > { %p6821_p9 = pnand %p6826_p7, %p7259_p8 }
 0x2c2   : > { %7154 = dma.done.wait (!%p6821_p9), %s5216_s8, 4096  }
 0x2c3   : > { %7156 = vsyncadd (!%p6821_p9), %s5216_s8, 4294963200  ;;  %s18_s17 = sadd.s32 1, %s7179_s17   ;;  %s9235_s12 = smov %s7163_s13 }
 0x2c4   : > { %p15_p10 = scmp.ge.s32.totalorder %s18_s17, 4   ;;  %s9236_s13 = smov %s7167_s14 }
 0x2c5   : > { %s9237_s14 = smov %s7265_s26  ;;  %s9238_s15 = smov %s7175_s16 }
 0x2c6   : > { %s9239_s16 = smov %s9241_s20  ;;  %17 = sbr.rel (!%p15_p10) target bundleno = 5 (0x5), region = 90 }
 0x2cd   :  { %5221 = vsyncpa [#allocation3], 1 }
 0x2ce   :  { %5223 = vsyncpa [#allocation3 + $0x1], 1 }
 0x2cf   :  { %5224 = vsyncpa [#allocation5], 1 }

</bundles_post_ra>
